<compile_context>
chip_gen: v7x
topology: tpu7x:2x2x1
jax: 0.10.0
libtpu: 0.0.40
codegen_flags: <defaults>
</compile_context>

<pallas_src>
import functools

import jax
import jax.numpy as jnp
from jax import lax
from jax.experimental import pallas as pl
from jax.experimental.pallas import tpu as pltpu

NEG_INF = -1e30


def make_cnn_kernel(TB, L, Vp, N_pad, C_pad, F_max):
    TBL = TB * L

    def kernel(ids_ref, pcat_ref, limits_ref, bpack_ref, fcw_ref, fcb_ref, out_ref):
        # ---- 1) combined one-hot (gather + im2col fused): block k selects the
        #         token at row r+k; blocks sit on 128-lane tile boundaries. ----
        ids = ids_ref[...]                                            # (TBL, F_max) i32
        vocab_iota = lax.broadcasted_iota(jnp.int32, (TBL, Vp), 1)    # (TBL, Vp)
        blocks = [(vocab_iota == ids[:, k:k + 1]).astype(jnp.bfloat16)
                  for k in range(F_max)]
        onehot = jnp.concatenate(blocks, axis=1)                      # (TBL, F_max*Vp) bf16

        # ---- 2) ONE MXU matmul: embedding + every conv filter at once ----
        conv = jnp.dot(onehot, pcat_ref[...],
                       preferred_element_type=jnp.float32)            # (TBL, N_pad) f32

        # ---- 3) in-kernel validity mask + fused max-pool over time ----
        conv3 = conv.reshape(TB, L, N_pad)
        t_iota = lax.broadcasted_iota(jnp.int32, (TB, L, N_pad), 1)
        limits = limits_ref[...].reshape(1, 1, N_pad)                  # t valid iff t < limit
        masked = jnp.where(t_iota < limits, conv3, NEG_INF)
        pooled = jnp.max(masked, axis=1)                               # (TB, N_pad)

        # bias after the max (exact) + relu after the max (monotone)
        feat = jnp.maximum(pooled + bpack_ref[...], 0.0)               # (TB, N_pad) f32

        # TODO(synk): dropout is identity at inference time (F.dropout, training=False).

        # ---- 4) classifier; lane-dense padded output ----
        out_ref[...] = (
            jnp.dot(feat.astype(jnp.bfloat16), fcw_ref[...],
                    preferred_element_type=jnp.float32)
            + fcb_ref[...]
        )

    return kernel


@functools.partial(jax.jit, static_argnames=("filters", "filter_num", "tile_b"))
def cnn_forward(inp, emb_w, conv_ws, conv_bs, fc_w, fc_b, *,
                filters, filter_num, tile_b=32):
    """inp: (B, L) int32 token ids. Returns (B, label_size) float32 logits."""
    B, L = inp.shape
    V, D = emb_w.shape                       # V = vocab_size + 2
    C = fc_w.shape[1]
    F_max = max(filters)
    N_sum = sum(filter_num)
    N_pad = max(128, pl.cdiv(N_sum, 128) * 128)
    C_pad = max(128, pl.cdiv(C, 128) * 128)
    Vp = max(128, pl.cdiv(V, 128) * 128)     # lane-padded vocab for the one-hot

    # batch tiling: keep >= 2 grid steps when possible so both v7x TCs get work
    if B % tile_b == 0 and B // tile_b >= 2:
        TB = tile_b
    elif B % 2 == 0:
        TB = B // 2
    else:
        TB = B
    steps = B // TB
    TBL = TB * L

    # ---- tiny index glue: shifted token ids, (row r, col k) = token at r + k ----
    ids_flat = inp.reshape(B * L).astype(jnp.int32)
    pos = (jnp.arange(B * L, dtype=jnp.int32)[:, None]
           + jnp.arange(F_max, dtype=jnp.int32)[None, :])
    pos = jnp.minimum(pos, B * L - 1)        # clamped rows only feed masked / zero-weight cols
    ids_shift = jnp.take(ids_flat, pos, axis=0)                       # (B*L, F_max)

    # ---- fold embedding into conv weights: pcat[k*Vp + v, n] = emb[v] @ W_k[:, n] ----
    pcat = jnp.zeros((F_max * Vp, N_pad), jnp.float32)
    for k in range(F_max):
        wk = jnp.zeros((D, N_pad), jnp.float32)
        off = 0
        for w, Fsz, N in zip(conv_ws, filters, filter_num):
            if k < Fsz:                       # taps beyond a filter's width are zero
                wk = wk.at[:, off:off + N].set(w[k].astype(jnp.float32))
            off += N
        pcat = pcat.at[k * Vp:k * Vp + V, :].set(emb_w.astype(jnp.float32) @ wk)
    pcat_bf = pcat.astype(jnp.bfloat16)

    # per-column valid-window limits (t valid iff t < L - F + 1); pad cols never mask
    limit_segs = [jnp.full((N,), L - Fsz + 1, jnp.int32)
                  for Fsz, N in zip(filters, filter_num)]
    limit_segs.append(jnp.full((N_pad - N_sum,), L, jnp.int32))
    limits = jnp.concatenate(limit_segs)[None, :]                     # (1, N_pad) i32

    bpack = jnp.zeros((1, N_pad), jnp.float32)
    off = 0
    for b, N in zip(conv_bs, filter_num):
        bpack = bpack.at[0, off:off + N].set(b.astype(jnp.float32))
        off += N

    fcw_bf = (jnp.zeros((N_pad, C_pad), jnp.float32)
              .at[:N_sum, :C].set(fc_w).astype(jnp.bfloat16))
    fcb_pad = jnp.zeros((1, C_pad), jnp.float32).at[0, :C].set(fc_b)

    flops = steps * (2 * TBL * (F_max * Vp) * N_pad + 2 * TB * N_pad * C_pad)
    bytes_accessed = (ids_shift.size * 4 + pcat_bf.size * 2 + limits.size * 4
                      + bpack.size * 4 + fcw_bf.size * 2 + fcb_pad.size * 4
                      + B * C_pad * 4)

    kernel = make_cnn_kernel(TB, L, Vp, N_pad, C_pad, F_max)
    out_pad = pl.pallas_call(
        kernel,
        out_shape=jax.ShapeDtypeStruct((B, C_pad), jnp.float32),
        grid=(steps,),
        in_specs=[
            pl.BlockSpec((TBL, F_max), lambda b: (b, 0)),        # shifted token ids (i32)
            pl.BlockSpec((F_max * Vp, N_pad), lambda b: (0, 0)), # folded emb⊗conv weights (bf16)
            pl.BlockSpec((1, N_pad), lambda b: (0, 0)),          # per-column time limits (i32)
            pl.BlockSpec((1, N_pad), lambda b: (0, 0)),          # packed conv bias (f32)
            pl.BlockSpec((N_pad, C_pad), lambda b: (0, 0)),      # padded fc weight (bf16)
            pl.BlockSpec((1, C_pad), lambda b: (0, 0)),          # padded fc bias (f32)
        ],
        out_specs=pl.BlockSpec((TB, C_pad), lambda b: (b, 0)),
        compiler_params=pltpu.CompilerParams(
            dimension_semantics=("parallel",)),
        cost_estimate=pl.CostEstimate(
            flops=flops, transcendentals=0, bytes_accessed=bytes_accessed),
    )(ids_shift, pcat_bf, limits, bpack, fcw_bf, fcb_pad)

    return out_pad[:, :C]


def reference_forward(inp, emb_w, conv_ws, conv_bs, fc_w, fc_b, filters, filter_num):
    """Pure-JAX f32 reference mirroring the PyTorch forward (eval mode)."""
    x_emb = emb_w[inp].astype(jnp.float32)  # (B, L, D)
    B, L, D = x_emb.shape
    feats = []
    for i, Fsz in enumerate(filters):
        outs = []
        for t in range(L - Fsz + 1):
            window = x_emb[:, t:t + Fsz, :].reshape(B, Fsz * D)
            w_flat = conv_ws[i].reshape(Fsz * D, -1)
            outs.append(window @ w_flat + conv_bs[i])
        conv = jnp.stack(outs, axis=1)            # (B, L-F+1, N)
        feats.append(jnp.max(jax.nn.relu(conv), axis=1))
    feat = jnp.concatenate(feats, axis=1)
    return feat @ fc_w + fc_b


if __name__ == "__main__":
    # Small, deterministic config consistent with the module's __init__
    B = 64           # batch_size (two 32-sentence tiles -> 2 parallel grid steps)
    L = 16           # max_sent_len
    D = 32           # embedding_dim (== WORD_DIM == conv stride)
    VOCAB = 50       # vocab_size
    C = 4            # label_size
    FILTERS = (3, 4, 5)
    FILTER_NUM = (16, 16, 16)

    key = jax.random.PRNGKey(0)
    k_emb, k_inp, k_fc_w, k_fc_b, *k_convs = jax.random.split(key, 4 + 2 * len(FILTERS))

    # nn.Embedding(vocab+2, D) with padding_idx = vocab+1 (zero row)
    emb_w = 0.1 * jax.random.normal(k_emb, (VOCAB + 2, D), dtype=jnp.float32)
    emb_w = emb_w.at[VOCAB + 1].set(0.0)

    conv_ws, conv_bs = [], []
    for i, (Fsz, N) in enumerate(zip(FILTERS, FILTER_NUM)):
        kw, kb = k_convs[2 * i], k_convs[2 * i + 1]
        conv_ws.append(0.1 * jax.random.normal(kw, (Fsz, D, N), dtype=jnp.float32))
        conv_bs.append(0.1 * jax.random.normal(kb, (N,), dtype=jnp.float32))

    fc_w = 0.1 * jax.random.normal(k_fc_w, (sum(FILTER_NUM), C), dtype=jnp.float32)
    fc_b = 0.1 * jax.random.normal(k_fc_b, (C,), dtype=jnp.float32)

    inp = jax.random.randint(k_inp, (B, L), 0, VOCAB + 2, dtype=jnp.int32)

    out = cnn_forward(
        inp, emb_w, tuple(conv_ws), tuple(conv_bs), fc_w, fc_b,
        filters=FILTERS, filter_num=FILTER_NUM, tile_b=32,
    )
    out = jax.block_until_ready(out)

    ref = reference_forward(inp, emb_w, conv_ws, conv_bs, fc_w, fc_b, FILTERS, FILTER_NUM)
    assert out.shape == (B, C)
    # bf16 folded weights with f32 MXU accumulation -> relaxed tolerance vs f32 reference
    assert jnp.allclose(out, ref, atol=2e-2, rtol=2e-2), "mismatch vs reference"

    print("KERNEL_OK")
</pallas_src>

<mosaic_0001>
module attributes {stable_mosaic.version = 11 : i64} {
  func.func @kernel(%arg0: i32, %arg1: memref<512x5xi32, #tpu.memory_space<vmem>>, %arg2: memref<640x128xbf16, #tpu.memory_space<vmem>>, %arg3: memref<1x128xi32, #tpu.memory_space<vmem>>, %arg4: memref<1x128xf32, #tpu.memory_space<vmem>>, %arg5: memref<128x128xbf16, #tpu.memory_space<vmem>>, %arg6: memref<1x128xf32, #tpu.memory_space<vmem>>, %arg7: memref<32x128xf32, #tpu.memory_space<vmem>>) attributes {dimension_semantics = [#tpu.dimension_semantics<parallel>], iteration_bounds = array<i64: 2>, scalar_prefetch = 0 : i64, scratch_operands = 0 : i64, tpu.core_type = #tpu.core_type<tc>, window_params = [{transform_indices = @transform_0, window_bounds = array<i64: 512, 5>}, {pipeline_mode = #tpu.pipeline_mode<synchronous>, transform_indices = @transform_1, window_bounds = array<i64: 640, 128>}, {pipeline_mode = #tpu.pipeline_mode<synchronous>, transform_indices = @transform_2, window_bounds = array<i64: 1, 128>}, {pipeline_mode = #tpu.pipeline_mode<synchronous>, transform_indices = @transform_3, window_bounds = array<i64: 1, 128>}, {pipeline_mode = #tpu.pipeline_mode<synchronous>, transform_indices = @transform_4, window_bounds = array<i64: 128, 128>}, {pipeline_mode = #tpu.pipeline_mode<synchronous>, transform_indices = @transform_5, window_bounds = array<i64: 1, 128>}, {transform_indices = @transform_6, window_bounds = array<i64: 32, 128>}]} {
    %c0 = arith.constant 0 : index
    %c0_0 = arith.constant 0 : index
    %0 = vector.load %arg1[%c0, %c0_0] : memref<512x5xi32, #tpu.memory_space<vmem>>, vector<512x5xi32>
    %1 = tpu.iota {dimensions = array<i32: 1>} : vector<512x128xi32>
    %2 = vector.extract_strided_slice %0 {offsets = [0, 0], sizes = [512, 1], strides = [1, 1]} : vector<512x5xi32> to vector<512x1xi32>
    %3 = vector.broadcast %2 : vector<512x1xi32> to vector<512x128xi32>
    %4 = arith.cmpi eq, %1, %3 : vector<512x128xi32>
    %5 = arith.extui %4 : vector<512x128xi1> to vector<512x128xi32>
    %6 = arith.sitofp %5 : vector<512x128xi32> to vector<512x128xf32>
    %7 = arith.truncf %6 : vector<512x128xf32> to vector<512x128xbf16>
    %8 = vector.extract_strided_slice %0 {offsets = [0, 1], sizes = [512, 1], strides = [1, 1]} : vector<512x5xi32> to vector<512x1xi32>
    %9 = vector.broadcast %8 : vector<512x1xi32> to vector<512x128xi32>
    %10 = arith.cmpi eq, %1, %9 : vector<512x128xi32>
    %11 = arith.extui %10 : vector<512x128xi1> to vector<512x128xi32>
    %12 = arith.sitofp %11 : vector<512x128xi32> to vector<512x128xf32>
    %13 = arith.truncf %12 : vector<512x128xf32> to vector<512x128xbf16>
    %14 = vector.extract_strided_slice %0 {offsets = [0, 2], sizes = [512, 1], strides = [1, 1]} : vector<512x5xi32> to vector<512x1xi32>
    %15 = vector.broadcast %14 : vector<512x1xi32> to vector<512x128xi32>
    %16 = arith.cmpi eq, %1, %15 : vector<512x128xi32>
    %17 = arith.extui %16 : vector<512x128xi1> to vector<512x128xi32>
    %18 = arith.sitofp %17 : vector<512x128xi32> to vector<512x128xf32>
    %19 = arith.truncf %18 : vector<512x128xf32> to vector<512x128xbf16>
    %20 = vector.extract_strided_slice %0 {offsets = [0, 3], sizes = [512, 1], strides = [1, 1]} : vector<512x5xi32> to vector<512x1xi32>
    %21 = vector.broadcast %20 : vector<512x1xi32> to vector<512x128xi32>
    %22 = arith.cmpi eq, %1, %21 : vector<512x128xi32>
    %23 = arith.extui %22 : vector<512x128xi1> to vector<512x128xi32>
    %24 = arith.sitofp %23 : vector<512x128xi32> to vector<512x128xf32>
    %25 = arith.truncf %24 : vector<512x128xf32> to vector<512x128xbf16>
    %26 = vector.extract_strided_slice %0 {offsets = [0, 4], sizes = [512, 1], strides = [1, 1]} : vector<512x5xi32> to vector<512x1xi32>
    %27 = vector.broadcast %26 : vector<512x1xi32> to vector<512x128xi32>
    %28 = arith.cmpi eq, %1, %27 : vector<512x128xi32>
    %29 = arith.extui %28 : vector<512x128xi1> to vector<512x128xi32>
    %30 = arith.sitofp %29 : vector<512x128xi32> to vector<512x128xf32>
    %31 = arith.truncf %30 : vector<512x128xf32> to vector<512x128xbf16>
    %32 = tpu.concatenate %7, %13, %19, %25, %31 in 1 : vector<512x128xbf16>, vector<512x128xbf16>, vector<512x128xbf16>, vector<512x128xbf16>, vector<512x128xbf16> -> vector<512x640xbf16>
    %c0_1 = arith.constant 0 : index
    %c0_2 = arith.constant 0 : index
    %33 = vector.load %arg2[%c0_1, %c0_2] : memref<640x128xbf16, #tpu.memory_space<vmem>>, vector<640x128xbf16>
    %cst = arith.constant dense<0.000000e+00> : vector<512x128xf32>
    %34 = tpu.matmul %32, %33, %cst {dimension_numbers = #tpu.dot_dimension_numbers<[1], [0], [0], [1], [0, 0, 1, 1], [], []>} : vector<512x640xbf16>, vector<640x128xbf16>, vector<512x128xf32> -> vector<512x128xf32>
    %35 = vector.shape_cast %34 : vector<512x128xf32> to vector<32x16x128xf32>
    %36 = tpu.iota {dimensions = array<i32: 1>} : vector<32x16x128xi32>
    %c0_3 = arith.constant 0 : index
    %c0_4 = arith.constant 0 : index
    %37 = vector.load %arg3[%c0_3, %c0_4] : memref<1x128xi32, #tpu.memory_space<vmem>>, vector<1x128xi32>
    %38 = vector.shape_cast %37 : vector<1x128xi32> to vector<1x1x128xi32>
    %39 = vector.broadcast %38 : vector<1x1x128xi32> to vector<32x16x128xi32>
    %40 = arith.cmpi slt, %36, %39 : vector<32x16x128xi32>
    %cst_5 = arith.constant -1.000000e+30 : f32
    %41 = vector.broadcast %cst_5 : f32 to vector<32x16x128xf32>
    %42 = arith.select %40, %35, %41 : vector<32x16x128xi1>, vector<32x16x128xf32>
    %cst_6 = arith.constant dense<0xFF800000> : vector<32x128xf32>
    %43 = vector.multi_reduction <maximumf>, %42, %cst_6 [1] : vector<32x16x128xf32> to vector<32x128xf32>
    %c0_7 = arith.constant 0 : index
    %c0_8 = arith.constant 0 : index
    %44 = vector.load %arg4[%c0_7, %c0_8] : memref<1x128xf32, #tpu.memory_space<vmem>>, vector<1x128xf32>
    %45 = vector.broadcast %44 : vector<1x128xf32> to vector<32x128xf32>
    %46 = arith.addf %43, %45 : vector<32x128xf32>
    %cst_9 = arith.constant 0.000000e+00 : f32
    %47 = vector.broadcast %cst_9 : f32 to vector<32x128xf32>
    %48 = arith.maximumf %46, %47 : vector<32x128xf32>
    %49 = arith.truncf %48 : vector<32x128xf32> to vector<32x128xbf16>
    %c0_10 = arith.constant 0 : index
    %c0_11 = arith.constant 0 : index
    %50 = vector.load %arg5[%c0_10, %c0_11] : memref<128x128xbf16, #tpu.memory_space<vmem>>, vector<128x128xbf16>
    %cst_12 = arith.constant dense<0.000000e+00> : vector<32x128xf32>
    %51 = tpu.matmul %49, %50, %cst_12 {dimension_numbers = #tpu.dot_dimension_numbers<[1], [0], [0], [1], [0, 0, 1, 1], [], []>} : vector<32x128xbf16>, vector<128x128xbf16>, vector<32x128xf32> -> vector<32x128xf32>
    %c0_13 = arith.constant 0 : index
    %c0_14 = arith.constant 0 : index
    %52 = vector.load %arg6[%c0_13, %c0_14] : memref<1x128xf32, #tpu.memory_space<vmem>>, vector<1x128xf32>
    %53 = vector.broadcast %52 : vector<1x128xf32> to vector<32x128xf32>
    %54 = arith.addf %51, %53 : vector<32x128xf32>
    %c0_15 = arith.constant 0 : index
    %c0_16 = arith.constant 0 : index
    %55 = vector.load %arg7[%c0_15, %c0_16] : memref<32x128xf32, #tpu.memory_space<vmem>>, vector<32x128xf32>
    tpu.vector_store %arg7[%c0_15, %c0_16], %54 {strides = array<i32>} : memref<32x128xf32, #tpu.memory_space<vmem>>, vector<32x128xf32>,
    return
  }
  func.func @transform_0(%arg0: i32) -> (i32, i32) {
    %c0_i32 = arith.constant 0 : i32
    %c0_i32_0 = arith.constant 0 : i32
    return %arg0, %c0_i32 : i32, i32
  }
  func.func @transform_1(%arg0: i32) -> (i32, i32) {
    %c0_i32 = arith.constant 0 : i32
    %c0_i32_0 = arith.constant 0 : i32
    %c0_i32_1 = arith.constant 0 : i32
    return %c0_i32, %c0_i32_0 : i32, i32
  }
  func.func @transform_2(%arg0: i32) -> (i32, i32) {
    %c0_i32 = arith.constant 0 : i32
    %c0_i32_0 = arith.constant 0 : i32
    %c0_i32_1 = arith.constant 0 : i32
    return %c0_i32, %c0_i32_0 : i32, i32
  }
  func.func @transform_3(%arg0: i32) -> (i32, i32) {
    %c0_i32 = arith.constant 0 : i32
    %c0_i32_0 = arith.constant 0 : i32
    %c0_i32_1 = arith.constant 0 : i32
    return %c0_i32, %c0_i32_0 : i32, i32
  }
  func.func @transform_4(%arg0: i32) -> (i32, i32) {
    %c0_i32 = arith.constant 0 : i32
    %c0_i32_0 = arith.constant 0 : i32
    %c0_i32_1 = arith.constant 0 : i32
    return %c0_i32, %c0_i32_0 : i32, i32
  }
  func.func @transform_5(%arg0: i32) -> (i32, i32) {
    %c0_i32 = arith.constant 0 : i32
    %c0_i32_0 = arith.constant 0 : i32
    %c0_i32_1 = arith.constant 0 : i32
    return %c0_i32, %c0_i32_0 : i32, i32
  }
  func.func @transform_6(%arg0: i32) -> (i32, i32) {
    %c0_i32 = arith.constant 0 : i32
    %c0_i32_0 = arith.constant 0 : i32
    return %arg0, %c0_i32 : i32, i32
  }
}

</mosaic_0001>

<bundles_post_ra>
// kernel: cnn_forward.1
= control target key start
LH: loop header
LB: loop body
LE: loop exit
PB: predicated region body
PF: predicated region fallthrough
CT: control target
= control target key end

     0   :  { %11 = vsyncpa [#allocation3], 0  ;;  %s5648_s21 = smov 0   ;;  %s8030_s0 = inlined_call_operand.vmem [shape: s32[1024,5], index: 0, kind: input, shape index: {}]   ;;  %s8031_s1 = inlined_call_operand.hbm [shape: bf16[640,128], index: 1, kind: input, shape index: {}]   ;;  %s8032_s2 = inlined_call_operand.vmem [shape: s32[1,128], index: 2, kind: input, shape index: {}]   ;;  %s8033_s3 = inlined_call_operand.vmem [shape: f32[1,128], index: 3, kind: input, shape index: {}]   ;;  %s8034_s4 = inlined_call_operand.vmem [shape: bf16[128,128], index: 4, kind: input, shape index: {}]   ;;  %s8035_s5 = inlined_call_operand.vmem [shape: f32[1,128], index: 5, kind: input, shape index: {}]   ;;  %s8036_s6 = inlined_call_operand.vmem [shape: f32[64,128], index: 6, kind: output, shape index: {}]  }
   0x1 LB: > { %s5654_s22 = sadd.s32 4294967295, %s5602_s21   ;;  %p4330_p0 = scmp.ge.s32.totalorder %s5602_s21, 1  ;;  %s5602_s21 = sphi %s5648_s21, %s17_s21  }
   0x2   : > { %p179_p1 = scmp.lt.s32.totalorder %s5602_s21, 3  ;;  %s5604_s23 = smov [#allocation2]  }
   0x3   : > { %s191_s24 = sshll.u32 %s5604_s23, 4  ;;  %p8037_p3 = scmp.eq.s32.totalorder %s5654_s22, 0  ;;  %s192_s24 = int_to_ptr.vmem [resolvable:$true] %s191_s24 }
   0x4   : > { %p5658_p2 = pnand %p4330_p0, %p179_p1  ;;  %s5564_s29 = scalar_lea.hbm %s8031_s1, 5120 }
   0x5   : > { %p5565_p6 = scmp.ne.s32.totalorder %s8031_s1, %s5564_s29  ;;  %p5571_p10 = scmp.lt.u32.totalorder %s5564_s29, %s8031_s1 }
   0x6   : > { %s8060_s25 = scalar_select %p5658_p2, 1, 0 }
   0x7   : > { %p5298_p4 = pneg %p5658_p2 }
   0x9   : > { %p5667_p5 = pnand %p8037_p3, %p5298_p4 }
   0xb   : > { %p5566_p7 = pneg %p5667_p5 }
   0xd   : > { %p5567_p8 = pnand %p5566_p7, %p5565_p6 }
   0xf   : > { %p5568_p9 = pneg %p5567_p8 }
  0x11   : > { %p5573_p11 = pnand %p5571_p10, %p5568_p9 }
  0x13   : > { %5576 = shalt.err (!%p5573_p11)
}
  0x14   : > { %s5577_s10 = scalar_lea.vmem %s192_s24, 5120  ;;  %p5585_p1 = scmp.lt.s32.totalorder %s192_s24, %s192_s24 }
  0x15   : > { %p5578_p12 = scmp.ne.s32.totalorder %s192_s24, %s5577_s10  ;;  %p5586_p4 = scmp.lt.s32.totalorder %s5577_s10, %s5577_s10 }
  0x17   : > { %p5580_p13 = pnand %p5578_p12, %p5566_p7  ;;  %p5587_p3 = por %p5586_p4, %p5585_p1 }
  0x19   : > { %p5581_p0 = pneg %p5580_p13 }
  0x1b   : > { %p5588_p2 = pnand %p5587_p3, %p5581_p0 }
  0x1d   : > { %5591 = shalt.err (!%p5588_p2)
}
  0x1e   : > { %s5605_s11 = smov 64   ;;  %s5606_s12 = smov 4  }
  0x1f   : > { %5301 = dma.hbm_to_vmem [thread:$0]  (!%p5667_p5), %s8031_s1, 5120, %s192_s24, [#allocation3], %s5605_s11, %s5605_s11, %s5606_s12  }
  0x20   : > { %p8062_p6 = scmp.ne.s32.totalorder %s8060_s25, 0 }
  0x22   : > { %228 = sbr.rel (%p8062_p6) target bundleno = 1480 (0x5c8), region = 44 }
  0x29   : > { %p8063_p8 = scmp.eq.s32.totalorder %s5654_s22, 0 }
  0x2b   : > { %5597 = dma.done.wait (%p8063_p8), [#allocation3], 5120   ;;  %p8064_p7 = pmov %p8063_p8 }
  0x2c   : > { %s4335_s15 = sshll.u32 %s5654_s22, 6  ;;  %v8046_v0 = vmov 0   ;;  %v5425_v37 = vld [vmem:[#allocation2] sm:$0xff]   ;;  %v5426_v40 = vld [vmem:[#allocation2 + $0x8] sm:$0xff]   ;;  %v5427_v43 = vld [vmem:[#allocation2 + $0x10] sm:$0xff]   ;;  %s4337_s20 = sshll.u32 %s5654_s22, 2 }
  0x2d   : > { %5599 = vsyncadd (%p8064_p7), [#allocation3], 4294962176  ;;  %5322 = vset.pattern.permute.xlu1 %v8046_v0  ;;  %5321 = vset.pattern.permute.xlu0 %v8046_v0  ;;  %p259_p2 = scmp.lt.s32.totalorder %s4335_s15, 127  ;;  %v5428_v46 = vld [vmem:[#allocation2 + $0x18] sm:$0xff]   ;;  %v5429_v49 = vld [vmem:[#allocation2 + $0x20] sm:$0xff]   ;;  %p265_p3 = scmp.lt.s32.totalorder %s4337_s20, 7 }
  0x2e   : > { %2737 = vmatprep.subr.bf16.mxu0 %v8046_v0  ;;  %5182 = vmatprep.subr.bf16.mxu1 %v8046_v0  ;;  %v5430_v52 = vld [vmem:[#allocation2 + $0x28] sm:$0xff]   ;;  %v5431_v55 = vld [vmem:[#allocation2 + $0x30] sm:$0xff]   ;;  %v5432_v58 = vld [vmem:[#allocation2 + $0x38] sm:$0xff]  }
  0x2f   : > { %s8201_s15 = smov (!%p259_p2, %s4335_s15), 127  ;;  %2738 = vmatpush1.bf16.msra.mxu0 %v5425_v37  ;;  %5198 = vmatpush1.bf16.msra.mxu1 %v5425_v37  ;;  %v5433_v61 = vld [vmem:[#allocation2 + $0x40] sm:$0xff]   ;;  %v5434_v37 = vld [vmem:[#allocation2 + $0x48] sm:$0xff]   ;;  %s8203_s20 = smov (!%p265_p3, %s4337_s20), 7 }
  0x30   : > { %s4336_s16 = sshll.u32 %s8201_s15, 3  ;;  %2739 = vmatprep.subr.bf16.mxu0 %v8046_v0  ;;  %5183 = vmatprep.subr.bf16.mxu1 %v8046_v0  ;;  %s4338_s23 = sshll.u32 %s8203_s20, 3 }
  0x31   : > { %s5701_s19 = scalar_lea.vmem %s8030_s0, %s4336_s16  ;;  %s268_s28 = scalar_lea.vmem %s8036_s6, %s4338_s23 }
  0x32   : > { %v5704_v1 = vld [vmem:[%s5701_s19 + $0x10] sm:$0xff]  ;;  %v5707_v2 = vld [vmem:[%s5701_s19] sm:$0xff]  ;;  %v5712_v3 = vld [vmem:[%s5701_s19 + $0x18] sm:$0xff] }
  0x33   : > { %8065 = vst [vmem:[#allocation5_spill] sm:$0xff] %v5704_v1  ;;  %344 = vperm.xlu1 %5322, %v5704_v1   ;;  %338 = vperm.xlu0 %5321, %v5707_v2   ;;  %v5715_v4 = vld [vmem:[%s5701_s19 + $0x8] sm:$0xff]  ;;  %v5723_v6 = vld [vmem:[%s5701_s19 + $0x20] sm:$0xff]  ;;  %v5728_v7 = vld [vmem:[%s5701_s19 + $0x38] sm:$0xff] }
  0x34   : > { %v5720_v5 = vld [vmem:[%s5701_s19 + $0x28] sm:$0xff]  ;;  %v5731_v8 = vld [vmem:[%s5701_s19 + $0x30] sm:$0xff]  ;;  %v5739_v10 = vld [vmem:[%s5701_s19 + $0x40] sm:$0xff]  ;;  %2740 = vmatpush1.bf16.msra.mxu0 %v5426_v40  ;;  %5199 = vmatpush1.bf16.msra.mxu1 %v5426_v40 }
  0x35   : > { %v5736_v9 = vld [vmem:[%s5701_s19 + $0x48] sm:$0xff]  ;;  %v5744_v11 = vld [vmem:[%s5701_s19 + $0x58] sm:$0xff]  ;;  %v5747_v12 = vld [vmem:[%s5701_s19 + $0x50] sm:$0xff]  ;;  %2741 = vmatprep.subr.bf16.mxu0 %v8046_v0  ;;  %5184 = vmatprep.subr.bf16.mxu1 %v8046_v0 }
  0x36   : > { %v5750_v13 = vld [vmem:[%s5701_s19 + $0x68] sm:$0xff]  ;;  %v5755_v14 = vld [vmem:[%s5701_s19 + $0x60] sm:$0xff]  ;;  %v5758_v15 = vld [vmem:[%s5701_s19 + $0x78] sm:$0xff] }
  0x37   : > { %347 = vperm.xlu1 %5322, %v5712_v3   ;;  %341 = vperm.xlu0 %5321, %v5715_v4   ;;  %v5761_v16 = vld [vmem:[%s5701_s19 + $0x70] sm:$0xff]  ;;  %v5766_v17 = vld [vmem:[%s5701_s19 + $0x88] sm:$0xff]  ;;  %v5769_v18 = vld [vmem:[%s5701_s19 + $0x80] sm:$0xff] }
  0x38   : > { %v5774_v19 = vld [vmem:[%s5701_s19 + $0x98] sm:$0xff]  ;;  %v5777_v20 = vld [vmem:[%s5701_s19 + $0x90] sm:$0xff]  ;;  %v5782_v21 = vld [vmem:[%s5701_s19 + $0xa8] sm:$0xff]  ;;  %2742 = vmatpush1.bf16.msra.mxu0 %v5427_v43  ;;  %5200 = vmatpush1.bf16.msra.mxu1 %v5427_v43 }
  0x39   : > { %v5785_v22 = vld [vmem:[%s5701_s19 + $0xa0] sm:$0xff]  ;;  %v5790_v23 = vld [vmem:[%s5701_s19 + $0xb8] sm:$0xff]  ;;  %v5793_v24 = vld [vmem:[%s5701_s19 + $0xb0] sm:$0xff]  ;;  %2743 = vmatprep.subr.bf16.mxu0 %v8046_v0  ;;  %5185 = vmatprep.subr.bf16.mxu1 %v8046_v0 }
  0x3a   : > { %v5798_v25 = vld [vmem:[%s5701_s19 + $0xc8] sm:$0xff]  ;;  %v5801_v26 = vld [vmem:[%s5701_s19 + $0xc0] sm:$0xff]  ;;  %v5806_v27 = vld [vmem:[%s5701_s19 + $0xd8] sm:$0xff] }
  0x3b   : > { %353 = vperm.xlu1 %5322, %v5720_v5   ;;  %350 = vperm.xlu0 %5321, %v5723_v6   ;;  %v5809_v28 = vld [vmem:[%s5701_s19 + $0xd0] sm:$0xff]  ;;  %v5816_v29 = vld [vmem:[%s5701_s19 + $0xe8] sm:$0xff]  ;;  %v5819_v30 = vld [vmem:[%s5701_s19 + $0xe0] sm:$0xff] }
  0x3c   : > { %v5824_v31 = vld [vmem:[%s5701_s19 + $0xf8] sm:$0xff]  ;;  %v5827_v32 = vld [vmem:[%s5701_s19 + $0xf0] sm:$0xff]  ;;  %v5832_v33 = vld [vmem:[%s5701_s19 + $0x108] sm:$0xff]  ;;  %2744 = vmatpush1.bf16.msra.mxu0 %v5428_v46  ;;  %5201 = vmatpush1.bf16.msra.mxu1 %v5428_v46 }
  0x3d   : > { %v5835_v34 = vld [vmem:[%s5701_s19 + $0x100] sm:$0xff]  ;;  %v5840_v35 = vld [vmem:[%s5701_s19 + $0x118] sm:$0xff]  ;;  %v5843_v36 = vld [vmem:[%s5701_s19 + $0x110] sm:$0xff]  ;;  %2745 = vmatprep.subr.bf16.mxu0 %v8046_v0  ;;  %5186 = vmatprep.subr.bf16.mxu1 %v8046_v0 }
  0x3e   : > { %v5848_v38 = vld [vmem:[%s5701_s19 + $0x128] sm:$0xff]  ;;  %v5851_v39 = vld [vmem:[%s5701_s19 + $0x120] sm:$0xff]  ;;  %v5858_v41 = vld [vmem:[%s5701_s19 + $0x138] sm:$0xff] }
  0x3f   : > { %359 = vperm.xlu1 %5322, %v5728_v7   ;;  %356 = vperm.xlu0 %5321, %v5731_v8   ;;  %v5861_v42 = vld [vmem:[%s5701_s19 + $0x130] sm:$0xff]  ;;  %v5868_v44 = vld [vmem:[%s5701_s19 + $0x148] sm:$0xff]  ;;  %v5871_v45 = vld [vmem:[%s5701_s19 + $0x140] sm:$0xff] }
  0x40   : > { %v5878_v47 = vld [vmem:[%s5701_s19 + $0x158] sm:$0xff]  ;;  %v5881_v48 = vld [vmem:[%s5701_s19 + $0x150] sm:$0xff]  ;;  %v5888_v50 = vld [vmem:[%s5701_s19 + $0x168] sm:$0xff]  ;;  %2746 = vmatpush1.bf16.msra.mxu0 %v5429_v49  ;;  %5202 = vmatpush1.bf16.msra.mxu1 %v5429_v49 }
  0x41   : > { %v5891_v51 = vld [vmem:[%s5701_s19 + $0x160] sm:$0xff]  ;;  %2747 = vmatprep.subr.bf16.mxu0 %v8046_v0  ;;  %5187 = vmatprep.subr.bf16.mxu1 %v8046_v0  ;;  %v5898_v53 = vld [vmem:[%s5701_s19 + $0x178] sm:$0xff]  ;;  %v5901_v54 = vld [vmem:[%s5701_s19 + $0x170] sm:$0xff] }
  0x42   : > { %v5908_v56 = vld [vmem:[%s5701_s19 + $0x188] sm:$0xff]  ;;  %v5911_v57 = vld [vmem:[%s5701_s19 + $0x180] sm:$0xff]  ;;  %v5918_v59 = vld [vmem:[%s5701_s19 + $0x198] sm:$0xff] }
  0x43   : > { %365 = vperm.xlu1 %5322, %v5736_v9   ;;  %362 = vperm.xlu0 %5321, %v5739_v10   ;;  %v5921_v60 = vld [vmem:[%s5701_s19 + $0x190] sm:$0xff]  ;;  %v5928_v62 = vld [vmem:[%s5701_s19 + $0x1a8] sm:$0xff]  ;;  %v5931_v63 = vld [vmem:[%s5701_s19 + $0x1a0] sm:$0xff] }
  0x44   : > { %2748 = vmatpush1.bf16.msra.mxu0 %v5430_v52  ;;  %5203 = vmatpush1.bf16.msra.mxu1 %v5430_v52  ;;  %v5938_v40 = vld [vmem:[%s5701_s19 + $0x1b8] sm:$0xff]  ;;  %v5941_v43 = vld [vmem:[%s5701_s19 + $0x1b0] sm:$0xff]  ;;  %v5948_v49 = vld [vmem:[%s5701_s19 + $0x1c8] sm:$0xff] }
  0x45   : > { %2749 = vmatprep.subr.bf16.mxu0 %v8046_v0  ;;  %5188 = vmatprep.subr.bf16.mxu1 %v8046_v0  ;;  %v5435_v46 = vld [vmem:[#allocation2 + $0x50] sm:$0xff]   ;;  %8066 = vst [vmem:[#allocation6_spill] sm:$0xff] %v5948_v49  ;;  %v5951_v52 = vld [vmem:[%s5701_s19 + $0x1c0] sm:$0xff] }
  0x46   : > { %8067 = vst [vmem:[#allocation7_spill] sm:$0xff] %v5951_v52 }
  0x47   : > { %371 = vperm.xlu1 %5322, %v5744_v11   ;;  %368 = vperm.xlu0 %5321, %v5747_v12  }
  0x48   : > { %2750 = vmatpush1.bf16.msra.mxu0 %v5431_v55  ;;  %5204 = vmatpush1.bf16.msra.mxu1 %v5431_v55  ;;  %v5436_v55 = vld [vmem:[#allocation2 + $0x58] sm:$0xff]  }
  0x49   : > { %2751 = vmatprep.subr.bf16.mxu0 %v8046_v0  ;;  %5189 = vmatprep.subr.bf16.mxu1 %v8046_v0 }
  0x4b   : > { %377 = vperm.xlu1 %5322, %v5750_v13   ;;  %374 = vperm.xlu0 %5321, %v5755_v14  }
  0x4c   : > { %2752 = vmatpush1.bf16.msra.mxu0 %v5432_v58  ;;  %5205 = vmatpush1.bf16.msra.mxu1 %v5432_v58  ;;  %v5958_v58 = vld [vmem:[%s5701_s19 + $0x1d8] sm:$0xff] }
  0x4d   : > { %2753 = vmatprep.subr.bf16.mxu0 %v8046_v0  ;;  %5190 = vmatprep.subr.bf16.mxu1 %v8046_v0  ;;  %8068 = vst [vmem:[#allocation8_spill] sm:$0xff] %v5958_v58 }
  0x4f   : > { %383 = vperm.xlu1 %5322, %v5758_v15   ;;  %380 = vperm.xlu0 %5321, %v5761_v16  }
  0x50   : > { %2754 = vmatpush1.bf16.msra.mxu0 %v5433_v61  ;;  %5206 = vmatpush1.bf16.msra.mxu1 %v5433_v61  ;;  %v5961_v61 = vld [vmem:[%s5701_s19 + $0x1d0] sm:$0xff] }
  0x51   : > { %2755 = vmatprep.subr.bf16.mxu0 %v8046_v0  ;;  %5191 = vmatprep.subr.bf16.mxu1 %v8046_v0  ;;  %8069 = vst [vmem:[#allocation9_spill] sm:$0xff] %v5961_v61 }
  0x53   : > { %389 = vperm.xlu1 %5322, %v5766_v17   ;;  %386 = vperm.xlu0 %5321, %v5769_v18  }
  0x54   : > { %2756 = vmatpush1.bf16.msra.mxu0 %v5434_v37  ;;  %5207 = vmatpush1.bf16.msra.mxu1 %v5434_v37  ;;  %v5437_v37 = vld [vmem:[#allocation2 + $0x60] sm:$0xff]  }
  0x55   : > { %2757 = vmatprep.subr.bf16.mxu0 %v8046_v0  ;;  %5192 = vmatprep.subr.bf16.mxu1 %v8046_v0 }
  0x57   : > { %395 = vperm.xlu1 %5322, %v5774_v19   ;;  %392 = vperm.xlu0 %5321, %v5777_v20  }
  0x58   : > { %2758 = vmatpush1.bf16.msra.mxu0 %v5435_v46  ;;  %5208 = vmatpush1.bf16.msra.mxu1 %v5435_v46  ;;  %v5968_v46 = vld [vmem:[%s5701_s19 + $0x1e8] sm:$0xff] }
  0x59   : > { %2759 = vmatprep.subr.bf16.mxu0 %v8046_v0  ;;  %5193 = vmatprep.subr.bf16.mxu1 %v8046_v0  ;;  %8070 = vst [vmem:[#allocation10_spill] sm:$0xff] %v5968_v46 }
  0x5b   : > { %401 = vperm.xlu1 %5322, %v5782_v21   ;;  %398 = vperm.xlu0 %5321, %v5785_v22  }
  0x5c   : > { %2760 = vmatpush1.bf16.msra.mxu0 %v5436_v55  ;;  %5209 = vmatpush1.bf16.msra.mxu1 %v5436_v55  ;;  %v5438_v55 = vld [vmem:[#allocation2 + $0x68] sm:$0xff]  }
  0x5d   : > { %2761 = vmatprep.subr.bf16.mxu0 %v8046_v0  ;;  %5194 = vmatprep.subr.bf16.mxu1 %v8046_v0 }
  0x5f   : > { %407 = vperm.xlu1 %5322, %v5790_v23   ;;  %404 = vperm.xlu0 %5321, %v5793_v24  }
  0x60   : > { %2762 = vmatpush1.bf16.msra.mxu0 %v5437_v37  ;;  %5210 = vmatpush1.bf16.msra.mxu1 %v5437_v37 }
  0x61   : > { %2763 = vmatprep.subr.bf16.mxu0 %v8046_v0  ;;  %5195 = vmatprep.subr.bf16.mxu1 %v8046_v0 }
  0x63   : > { %413 = vperm.xlu1 %5322, %v5798_v25   ;;  %410 = vperm.xlu0 %5321, %v5801_v26  }
  0x64   : > { %2764 = vmatpush1.bf16.msra.mxu0 %v5438_v55  ;;  %5211 = vmatpush1.bf16.msra.mxu1 %v5438_v55  ;;  %v8045_v55 = vmov 1  }
  0x65   : > { %2765 = vmatprep.subr.bf16.mxu0 %v8046_v0  ;;  %5196 = vmatprep.subr.bf16.mxu1 %v8046_v0 }
  0x67   : > { %419 = vperm.xlu1 %5322, %v5806_v27   ;;  %416 = vperm.xlu0 %5321, %v5809_v28  }
  0x6b   : > { %425 = vperm.xlu1 %5322, %v5816_v29   ;;  %422 = vperm.xlu0 %5321, %v5819_v30  }
  0x6f   : > { %431 = vperm.xlu1 %5322, %v5824_v31   ;;  %428 = vperm.xlu0 %5321, %v5827_v32  }
  0x73   : > { %437 = vperm.xlu1 %5322, %v5832_v33   ;;  %434 = vperm.xlu0 %5321, %v5835_v34  }
  0x77   : > { %443 = vperm.xlu1 %5322, %v5840_v35   ;;  %440 = vperm.xlu0 %5321, %v5843_v36  }
  0x7b   : > { %449 = vperm.xlu1 %5322, %v5848_v38   ;;  %446 = vperm.xlu0 %5321, %v5851_v39  }
  0x7f   : > { %455 = vperm.xlu1 %5322, %v5858_v41   ;;  %452 = vperm.xlu0 %5321, %v5861_v42  }
  0x83   : > { %461 = vperm.xlu1 %5322, %v5868_v44   ;;  %458 = vperm.xlu0 %5321, %v5871_v45  }
  0x87   : > { %467 = vperm.xlu1 %5322, %v5878_v47   ;;  %464 = vperm.xlu0 %5321, %v5881_v48  }
  0x8b   : > { %473 = vperm.xlu1 %5322, %v5888_v50   ;;  %470 = vperm.xlu0 %5321, %v5891_v51  }
  0x8f   : > { %479 = vperm.xlu1 %5322, %v5898_v53   ;;  %476 = vperm.xlu0 %5321, %v5901_v54  }
  0x93   : > { %485 = vperm.xlu1 %5322, %v5908_v56   ;;  %482 = vperm.xlu0 %5321, %v5911_v57  }
  0x97   : > { %491 = vperm.xlu1 %5322, %v5918_v59   ;;  %488 = vperm.xlu0 %5321, %v5921_v60  }
  0x9b   : > { %497 = vperm.xlu1 %5322, %v5928_v62   ;;  %494 = vperm.xlu0 %5321, %v5931_v63  }
  0x9f   : > { %503 = vperm.xlu1 %5322, %v5938_v40   ;;  %500 = vperm.xlu0 %5321, %v5941_v43  }
  0xa3   : > { %509 = vperm.xlu1 %5322, %v5948_v49   ;;  %506 = vperm.xlu0 %5321, %v5951_v52   ;;  %v5971_v49 = vld [vmem:[%s5701_s19 + $0x1e0] sm:$0xff]  ;;  %v5978_v52 = vld [vmem:[%s5701_s19 + $0x1f8] sm:$0xff] }
  0xa4   : > { %8071 = vst [vmem:[#allocation11_spill] sm:$0xff] %v5971_v49 }
  0xa7   : > { %515 = vperm.xlu1 %5322, %v5958_v58   ;;  %512 = vperm.xlu0 %5321, %v5961_v61   ;;  %v333_v58 = vld [vmem:[%s5701_s19 + $0x1f0] sm:$0xff] }
  0xa8   : > { %v5439_v61 = vld [vmem:[#allocation2 + $0x70] sm:$0xff]  }
  0xa9   : > { %2766 = vmatpush1.bf16.msra.mxu0 %v5439_v61  ;;  %5212 = vmatpush1.bf16.msra.mxu1 %v5439_v61 }
  0xaa   : > { %2767 = vmatprep.subr.bf16.mxu0 %v8046_v0  ;;  %5197 = vmatprep.subr.bf16.mxu1 %v8046_v0 }
  0xab   : > { %521 = vperm.xlu1 %5322, %v5968_v46   ;;  %518 = vperm.xlu0 %5321, %v5971_v49   ;;  %v5440_v49 = vld [vmem:[#allocation2 + $0x78] sm:$0xff]  }
  0xad   : > { %2768 = vmatpush1.bf16.msra.mxu0 %v5440_v49  ;;  %5213 = vmatpush1.bf16.msra.mxu1 %v5440_v49 }
  0xae   : > { %3026 = vmatprep.subr.bf16.mxu0 %v8046_v0 }
  0xaf   : > { %527 = vperm.xlu1 %5322, %v5978_v52   ;;  %524 = vperm.xlu0 %5321, %v333_v58  }
  0xb2   : > { %v5986_v37 = vpop.permute.xlu1 %344  ;;  %v5988_v46 = vpop.permute.xlu0 %338 }
  0xb3   : > { %8072 = vst [vmem:[#allocation12_spill] sm:$0xff] %v5986_v37  ;;  %8073 = vst [vmem:[#allocation13_spill] sm:$0xff] %v5988_v46  ;;  %5324 = vset.pattern.permute.xlu1 %v8045_v55  ;;  %5323 = vset.pattern.permute.xlu0 %v8045_v55 }
  0xb4   : > { %757 = vperm.xlu1 %5324, %v5715_v4   ;;  %754 = vperm.xlu0 %5323, %v5707_v2  }
  0xb6   : > { %v5994_v58 = vpop.permute.xlu1 %347  ;;  %v5996_v61 = vpop.permute.xlu0 %341 }
  0xb8   : > { %760 = vperm.xlu1 %5324, %v5704_v1   ;;  %763 = vperm.xlu0 %5323, %v5712_v3  }
  0xba   : > { %v6001_v37 = vpop.permute.xlu1 %353  ;;  %v6003_v46 = vpop.permute.xlu0 %350 }
  0xbb   : > { %8074 = vst [vmem:[#allocation14_spill] sm:$0xff] %v6001_v37  ;;  %8075 = vst [vmem:[#allocation15_spill] sm:$0xff] %v6003_v46 }
  0xbc   : > { %766 = vperm.xlu1 %5324, %v5723_v6   ;;  %769 = vperm.xlu0 %5323, %v5720_v5  }
  0xbe   : > { %v6007_v55 = vpop.permute.xlu1 %359  ;;  %v6009_v49 = vpop.permute.xlu0 %356 }
  0xbf   : > { %8076 = vst [vmem:[#allocation16_spill] sm:$0xff] %v6009_v49 }
  0xc0   : > { %772 = vperm.xlu1 %5324, %v5731_v8   ;;  %775 = vperm.xlu0 %5323, %v5728_v7  }
  0xc2   : > { %v6013_v0 = vpop.permute.xlu1 %365  ;;  %v6015_v1 = vpop.permute.xlu0 %362 }
  0xc3   : > { %8077 = vst [vmem:[#allocation17_spill] sm:$0xff] %v6015_v1 }
  0xc4   : > { %778 = vperm.xlu1 %5324, %v5739_v10   ;;  %781 = vperm.xlu0 %5323, %v5736_v9  }
  0xc6   : > { %v6019_v46 = vpop.permute.xlu1 %371  ;;  %v6021_v37 = vpop.permute.xlu0 %368 }
  0xc8   : > { %784 = vperm.xlu1 %5324, %v5747_v12   ;;  %787 = vperm.xlu0 %5323, %v5744_v11  }
  0xca   : > { %v6025_v49 = vpop.permute.xlu1 %377  ;;  %v6027_v8 = vpop.permute.xlu0 %374 }
  0xcb   : > { %8078 = vst [vmem:[#allocation18_spill] sm:$0xff] %v6027_v8 }
  0xcc   : > { %790 = vperm.xlu1 %5324, %v5755_v14   ;;  %793 = vperm.xlu0 %5323, %v5750_v13  }
  0xce   : > { %v6031_v7 = vpop.permute.xlu1 %383  ;;  %v6033_v1 = vpop.permute.xlu0 %380 }
  0xcf   : > { %8079 = vst [vmem:[#allocation19_spill] sm:$0xff] %v6031_v7  ;;  %8080 = vst [vmem:[#allocation20_spill] sm:$0xff] %v6033_v1 }
  0xd0   : > { %796 = vperm.xlu1 %5324, %v5761_v16   ;;  %799 = vperm.xlu0 %5323, %v5758_v15  }
  0xd2   : > { %v6037_v9 = vpop.permute.xlu1 %389  ;;  %v6039_v12 = vpop.permute.xlu0 %386 }
  0xd4   : > { %802 = vperm.xlu1 %5324, %v5769_v18   ;;  %805 = vperm.xlu0 %5323, %v5766_v17  }
  0xd6   : > { %v6043_v11 = vpop.permute.xlu1 %395  ;;  %v6045_v8 = vpop.permute.xlu0 %392 }
  0xd8   : > { %808 = vperm.xlu1 %5324, %v5777_v20   ;;  %811 = vperm.xlu0 %5323, %v5774_v19  }
  0xda   : > { %v6049_v13 = vpop.permute.xlu1 %401  ;;  %v6051_v16 = vpop.permute.xlu0 %398 }
  0xdc   : > { %814 = vperm.xlu1 %5324, %v5785_v22   ;;  %817 = vperm.xlu0 %5323, %v5782_v21  }
  0xde   : > { %v6055_v15 = vpop.permute.xlu1 %407  ;;  %v6057_v1 = vpop.permute.xlu0 %404 }
  0xe0   : > { %820 = vperm.xlu1 %5324, %v5793_v24   ;;  %823 = vperm.xlu0 %5323, %v5790_v23  }
  0xe2   : > { %v6061_v17 = vpop.permute.xlu1 %413  ;;  %v6063_v20 = vpop.permute.xlu0 %410 }
  0xe3   : > { %8081 = vst [vmem:[#allocation21_spill] sm:$0xff] %v6063_v20 }
  0xe4   : > { %826 = vperm.xlu1 %5324, %v5801_v26   ;;  %829 = vperm.xlu0 %5323, %v5798_v25  }
  0xe6   : > { %v6067_v19 = vpop.permute.xlu1 %419  ;;  %v6069_v7 = vpop.permute.xlu0 %416 }
  0xe8   : > { %832 = vperm.xlu1 %5324, %v5809_v28   ;;  %835 = vperm.xlu0 %5323, %v5806_v27  }
  0xea   : > { %v6073_v21 = vpop.permute.xlu1 %425  ;;  %v6075_v24 = vpop.permute.xlu0 %422 }
  0xec   : > { %838 = vperm.xlu1 %5324, %v5819_v30   ;;  %841 = vperm.xlu0 %5323, %v5816_v29  }
  0xee   : > { %v6079_v23 = vpop.permute.xlu1 %431  ;;  %v6081_v20 = vpop.permute.xlu0 %428 }
  0xf0   : > { %844 = vperm.xlu1 %5324, %v5827_v32   ;;  %847 = vperm.xlu0 %5323, %v5824_v31  }
  0xf2   : > { %v6085_v25 = vpop.permute.xlu1 %437  ;;  %v6087_v28 = vpop.permute.xlu0 %434 }
  0xf4   : > { %850 = vperm.xlu1 %5324, %v5835_v34   ;;  %853 = vperm.xlu0 %5323, %v5832_v33  }
  0xf6   : > { %v6091_v27 = vpop.permute.xlu1 %443  ;;  %v6093_v30 = vpop.permute.xlu0 %440 }
  0xf7   : > { %8082 = vst [vmem:[#allocation22_spill] sm:$0xff] %v6093_v30 }
  0xf8   : > { %856 = vperm.xlu1 %5324, %v5843_v36   ;;  %859 = vperm.xlu0 %5323, %v5840_v35  }
  0xfa   : > { %v6097_v29 = vpop.permute.xlu1 %449  ;;  %v6099_v32 = vpop.permute.xlu0 %446 }
  0xfc   : > { %862 = vperm.xlu1 %5324, %v5851_v39   ;;  %865 = vperm.xlu0 %5323, %v5848_v38  }
  0xfe   : > { %v6103_v31 = vpop.permute.xlu1 %455  ;;  %v6105_v34 = vpop.permute.xlu0 %452 }
 0x100   : > { %868 = vperm.xlu1 %5324, %v5861_v42   ;;  %871 = vperm.xlu0 %5323, %v5858_v41  }
 0x102   : > { %v6109_v30 = vpop.permute.xlu1 %461  ;;  %v6111_v36 = vpop.permute.xlu0 %458 }
 0x104   : > { %874 = vperm.xlu1 %5324, %v5871_v45   ;;  %877 = vperm.xlu0 %5323, %v5868_v44  }
 0x106   : > { %v6115_v35 = vpop.permute.xlu1 %467  ;;  %v6117_v39 = vpop.permute.xlu0 %464 }
 0x108   : > { %880 = vperm.xlu1 %5324, %v5881_v48   ;;  %883 = vperm.xlu0 %5323, %v5878_v47  }
 0x10a   : > { %v6121_v38 = vpop.permute.xlu1 %473  ;;  %v6123_v42 = vpop.permute.xlu0 %470 }
 0x10c   : > { %886 = vperm.xlu1 %5324, %v5891_v51   ;;  %889 = vperm.xlu0 %5323, %v5888_v50  }
 0x10e   : > { %v6127_v41 = vpop.permute.xlu1 %479  ;;  %v6129_v45 = vpop.permute.xlu0 %476 }
 0x110   : > { %892 = vperm.xlu1 %5324, %v5901_v54   ;;  %895 = vperm.xlu0 %5323, %v5898_v53  }
 0x112   : > { %v6133_v44 = vpop.permute.xlu1 %485  ;;  %v6135_v48 = vpop.permute.xlu0 %482 }
 0x114   : > { %898 = vperm.xlu1 %5324, %v5911_v57   ;;  %901 = vperm.xlu0 %5323, %v5908_v56  }
 0x116   : > { %v6139_v47 = vpop.permute.xlu1 %491  ;;  %v6141_v51 = vpop.permute.xlu0 %488 }
 0x118   : > { %904 = vperm.xlu1 %5324, %v5921_v60   ;;  %907 = vperm.xlu0 %5323, %v5918_v59   ;;  %v8089_v59 = vld [vmem:[#allocation7_spill] sm:$0xff] }
 0x11a   : > { %v6145_v50 = vpop.permute.xlu1 %497  ;;  %v6147_v54 = vpop.permute.xlu0 %494 }
 0x11b   : > { %8083 = vst [vmem:[#allocation23_spill] sm:$0xff] %v6145_v50  ;;  %8084 = vst [vmem:[#allocation24_spill] sm:$0xff] %v6147_v54  ;;  %v8090_v50 = vld [vmem:[#allocation6_spill] sm:$0xff] }
 0x11c   : > { %910 = vperm.xlu1 %5324, %v5931_v63   ;;  %913 = vperm.xlu0 %5323, %v5928_v62   ;;  %v8093_v62 = vld [vmem:[#allocation9_spill] sm:$0xff] }
 0x11e   : > { %v6151_v53 = vpop.permute.xlu1 %503  ;;  %v6153_v57 = vpop.permute.xlu0 %500 }
 0x11f   : > { %8085 = vst [vmem:[#allocation25_spill] sm:$0xff] %v6151_v53  ;;  %8086 = vst [vmem:[#allocation26_spill] sm:$0xff] %v6153_v57  ;;  %v8094_v53 = vld [vmem:[#allocation8_spill] sm:$0xff] }
 0x120   : > { %916 = vperm.xlu1 %5324, %v5941_v43   ;;  %919 = vperm.xlu0 %5323, %v5938_v40   ;;  %v8049_v40 = vlaneseq }
 0x122   : > { %v6157_v56 = vpop.permute.xlu1 %509  ;;  %v6159_v60 = vpop.permute.xlu0 %506 }
 0x123   : > { %8087 = vst [vmem:[#allocation27_spill] sm:$0xff] %v6157_v56  ;;  %8088 = vst [vmem:[#allocation28_spill] sm:$0xff] %v6159_v60  ;;  %v8095_v56 = vld [vmem:[#allocation11_spill] sm:$0xff]  ;;  %v8096_v60 = vld [vmem:[#allocation10_spill] sm:$0xff] }
 0x124   : > { %922 = vperm.xlu1 %5324, %v8089_v59   ;;  %925 = vperm.xlu0 %5323, %v8090_v50  }
 0x126   : > { %v6163_v54 = vpop.permute.xlu1 %515  ;;  %v6165_v63 = vpop.permute.xlu0 %512 }
 0x127   : > { %8091 = vst [vmem:[#allocation7_spill] sm:$0xff] %v6163_v54  ;;  %8092 = vst [vmem:[#allocation6_spill] sm:$0xff] %v6165_v63  ;;  %v6180_v54 = vand.u32 127, %v8049_v40  ;;  %v8050_v63 = vmov 3   ;;  %v8052_v40 = vmov 2  }
 0x128   : > { %928 = vperm.xlu1 %5324, %v8093_v62   ;;  %931 = vperm.xlu0 %5323, %v8094_v53   ;;  %v8099_v53 = vld [vmem:[#allocation13_spill] sm:$0xff] }
 0x129   : > { %vm529_vm0 = vcmp.eq.s32.totalorder %v6180_v54, %v8099_v53  ;;  %vm530_vm1 = vcmp.eq.s32.totalorder %v6180_v54, %v5996_v61  ;;  %v5441_v62 = vld [vmem:[#allocation2 + $0x80] sm:$0xff]   ;;  %v5442_v53 = vld [vmem:[#allocation2 + $0x88] sm:$0xff]   ;;  %vm532_vm9 = vcmp.eq.s32.totalorder %v6180_v54, %v5994_v58 }
 0x12a   : > { %v6169_v57 = vpop.permute.xlu1 %521  ;;  %v6171_v43 = vpop.permute.xlu0 %518  ;;  %vm4701_vm2 = vmpackc.low %vm530_vm1, %vm529_vm0 }
 0x12c   : > { %934 = vperm.xlu1 %5324, %v8095_v56   ;;  %937 = vperm.xlu0 %5323, %v8096_v60  }
 0x12e   : > { %v6175_v59 = vpop.permute.xlu1 %527  ;;  %v6177_v50 = vpop.permute.xlu0 %524 }
 0x12f   : > { %8097 = vst [vmem:[#allocation9_spill] sm:$0xff] %v6175_v59  ;;  %8098 = vst [vmem:[#allocation8_spill] sm:$0xff] %v6177_v50  ;;  %v8117_v59 = vmov 3  }
 0x130   : > { %5325 = vset.pattern.permute.xlu1 %v8050_v63  ;;  %943 = vperm.xlu0 %5323, %v5978_v52   ;;  %v8054_v52 = vmov 1.0|1.0  }
 0x131   : > { %1589 = vperm.xlu1 %5325, %v5715_v4  }
 0x133   : > { %v758_v56 = vpop.permute.xlu1 %757  ;;  %v755_v60 = vpop.permute.xlu0 %754 }
 0x134   : > { %5356 = vset.pattern.permute.xlu0 %v8050_v63  ;;  %vm945_vm3 = vcmp.eq.s32.totalorder %v6180_v54, %v755_v60  ;;  %vm946_vm4 = vcmp.eq.s32.totalorder %v6180_v54, %v758_v56  ;;  %v8100_v56 = vmov 0   ;;  %v8101_v60 = vld [vmem:[#allocation5_spill] sm:$0xff] }
 0x135   : > { %5326 = vset.pattern.permute.xlu1 %v8052_v40  ;;  %1586 = vperm.xlu0 %5356, %v5707_v2   ;;  %vm4699_vm5 = vmpackc.low %vm946_vm4, %vm945_vm3 }
 0x136   : > { %1170 = vperm.xlu1 %5326, %v5707_v2   ;;  %4700 = vmatprep.mubr.msk.bf16.mxu0 %vm4699_vm5, %v8054_v52  ;;  %vm536_vm5 = vcmp.eq.s32.totalorder %v6180_v54, %v6007_v55 }
 0x137   : > { %v761_v4 = vpop.permute.xlu1 %760  ;;  %4702 = vmatmul.mubr.msk.bf16.vlgmr.msra.gmra.mrb[0].mxu0 %vm4701_vm2, %v8054_v52  ;;  %v764_v61 = vpop.permute.xlu0 %763 }
 0x138   : > { %vm947_vm6 = vcmp.eq.s32.totalorder %v6180_v54, %v761_v4  ;;  %vm948_vm7 = vcmp.eq.s32.totalorder %v6180_v54, %v764_v61  ;;  %3027 = vmatpush1.bf16.msra.mxu0 %v5441_v62  ;;  %v5443_v62 = vld [vmem:[#allocation2 + $0x90] sm:$0xff]  }
 0x139   : > { %vm4703_vm8 = vmpackc.low %vm948_vm7, %vm947_vm6  ;;  %1598 = vperm.xlu0 %5356, %v5723_v6   ;;  %3028 = vmatprep.subr.bf16.mxu0 %v8100_v56  ;;  %v8102_v6 = vld [vmem:[#allocation12_spill] sm:$0xff] }
 0x13a   : > { %5327 = vset.pattern.permute.xlu1 %v8050_v63  ;;  %4704 = vmatprep.mubr.msk.bf16.mxu0 %vm4703_vm8, %v8054_v52  ;;  %vm531_vm12 = vcmp.eq.s32.totalorder %v6180_v54, %v8102_v6 }
 0x13b   : > { %v767_v2 = vpop.permute.xlu1 %766  ;;  %1592 = vperm.xlu1 %5327, %v8101_v60   ;;  %v770_v4 = vpop.permute.xlu0 %769  ;;  %vm4705_vm13 = vmpackc.low %vm532_vm9, %vm531_vm12 }
 0x13c   : > { %vm949_vm10 = vcmp.eq.s32.totalorder %v6180_v54, %v767_v2  ;;  %vm950_vm11 = vcmp.eq.s32.totalorder %v6180_v54, %v770_v4  ;;  %3029 = vmatpush1.bf16.msra.mxu0 %v5442_v53  ;;  %v5444_v53 = vld [vmem:[#allocation2 + $0x98] sm:$0xff]   ;;  %v8103_v2 = vld [vmem:[#allocation14_spill] sm:$0xff] }
 0x13d   : > { %1610 = vperm.xlu0 %5356, %v5739_v10   ;;  %3030 = vmatprep.subr.bf16.mxu0 %v8100_v56  ;;  %vm4707_vm14 = vmpackc.low %vm950_vm11, %vm949_vm10  ;;  %vm534_vm15 = vcmp.eq.s32.totalorder %v6180_v54, %v8103_v2  ;;  %v8104_v10 = vld [vmem:[#allocation15_spill] sm:$0xff]  ;;  %vm538_vm11 = vcmp.eq.s32.totalorder %v6180_v54, %v6013_v0 }
 0x13e   : > { %vm533_vm0 = vcmp.eq.s32.totalorder %v6180_v54, %v8104_v10  ;;  %v6267_v10 = vld [vmem:[%s5701_s19 + $0x30] sm:$0xff] }
 0x13f   : > { %v773_v58 = vpop.permute.xlu1 %772  ;;  %1595 = vperm.xlu1 %5327, %v5712_v3   ;;  %4706 = vmatmul.mubr.msk.bf16.gmra.mrb[4].mxu0 %vm4705_vm13, %v8054_v52  ;;  %v776_v61 = vpop.permute.xlu0 %775  ;;  %vm4709_vm3 = vmpackc.low %vm534_vm15, %vm533_vm0  ;;  %vm546_vm13 = vcmp.eq.s32.totalorder %v6180_v54, %v6037_v9  ;;  %v5449_v9 = vld [vmem:[#allocation2 + $0xc0] sm:$0xff]  }
 0x140   : > { %4708 = vmatprep.mubr.msk.bf16.mxu0 %vm4707_vm14, %v8054_v52  ;;  %3031 = vmatpush1.bf16.msra.mxu0 %v5443_v62  ;;  %vm951_vm1 = vcmp.eq.s32.totalorder %v6180_v54, %v773_v58  ;;  %vm952_vm2 = vcmp.eq.s32.totalorder %v6180_v54, %v776_v61  ;;  %vm545_vm14 = vcmp.eq.s32.totalorder %v6180_v54, %v6039_v12  ;;  %v5448_v12 = vld [vmem:[#allocation2 + $0xb8] sm:$0xff]  }
 0x141   : > { %1622 = vperm.xlu0 %5356, %v5755_v14   ;;  %3032 = vmatprep.subr.bf16.mxu0 %v8100_v56  ;;  %v5445_v14 = vld [vmem:[#allocation2 + $0xa0] sm:$0xff]   ;;  %vm4711_vm4 = vmpackc.low %vm952_vm2, %vm951_vm1 }
 0x143   : > { %v779_v60 = vpop.permute.xlu1 %778  ;;  %5328 = vset.pattern.permute.xlu1 %v8052_v40  ;;  %v782_v4 = vpop.permute.xlu0 %781 }
 0x144   : > { %1179 = vperm.xlu1 %5328, %v5712_v3   ;;  %3033 = vmatpush1.bf16.msra.mxu0 %v5444_v53  ;;  %v5446_v3 = vld [vmem:[#allocation2 + $0xa8] sm:$0xff]   ;;  %vm953_vm7 = vcmp.eq.s32.totalorder %v6180_v54, %v779_v60  ;;  %vm954_vm8 = vcmp.eq.s32.totalorder %v6180_v54, %v782_v4 }
 0x145   : > { %1634 = vperm.xlu0 %5356, %v5769_v18   ;;  %3034 = vmatprep.subr.bf16.mxu0 %v8100_v56  ;;  %v8105_v18 = vld [vmem:[#allocation16_spill] sm:$0xff]  ;;  %vm4715_vm10 = vmpackc.low %vm954_vm8, %vm953_vm7  ;;  %v6284_v60 = vld [vmem:[%s5701_s19 + $0x8] sm:$0xff] }
 0x146   : > { %vm535_vm6 = vcmp.eq.s32.totalorder %v6180_v54, %v8105_v18  ;;  %v5450_v18 = vld [vmem:[#allocation2 + $0xc8] sm:$0xff]  }
 0x147   : > { %v785_v62 = vpop.permute.xlu1 %784  ;;  %4710 = vmatmul.mubr.msk.bf16.gmra.mrb[8].mxu0 %vm4709_vm3, %v8054_v52  ;;  %v788_v6 = vpop.permute.xlu0 %787  ;;  %vm4713_vm9 = vmpackc.low %vm536_vm5, %vm535_vm6 }
 0x148   : > { %5329 = vset.pattern.permute.xlu1 %v8050_v63  ;;  %4712 = vmatprep.mubr.msk.bf16.mxu0 %vm4711_vm4, %v8054_v52  ;;  %vm955_vm0 = vcmp.eq.s32.totalorder %v6180_v54, %v785_v62  ;;  %vm956_vm1 = vcmp.eq.s32.totalorder %v6180_v54, %v788_v6  ;;  %vm4733_vm5 = vmpackc.low %vm546_vm13, %vm545_vm14  ;;  %v6304_v6 = vld [vmem:[%s5701_s19 + $0x10] sm:$0xff]  ;;  %vm547_vm13 = vcmp.eq.s32.totalorder %v6180_v54, %v6045_v8 }
 0x149   : > { %1601 = vperm.xlu1 %5329, %v5720_v5   ;;  %1646 = vperm.xlu0 %5356, %v5785_v22   ;;  %v6246_v5 = vld [vmem:[%s5701_s19 + $0x20] sm:$0xff]  ;;  %v5447_v22 = vld [vmem:[#allocation2 + $0xb0] sm:$0xff]   ;;  %vm4719_vm6 = vmpackc.low %vm956_vm1, %vm955_vm0 }
 0x14a   : > { %3035 = vmatpush1.bf16.msra.mxu0 %v5445_v14  ;;  %v6289_v14 = vld [vmem:[%s5701_s19 + $0x38] sm:$0xff] }
 0x14b   : > { %v6236_v58 = vpop.permute.xlu1 %790  ;;  %v6238_v61 = vpop.permute.xlu0 %793  ;;  %3036 = vmatprep.subr.bf16.mxu0 %v8100_v56 }
 0x14c   : > { %vm957_vm14 = vcmp.eq.s32.totalorder %v6180_v54, %v6236_v58  ;;  %v8109_v58 = vld [vmem:[#allocation18_spill] sm:$0xff] }
 0x14d   : > { %5330 = vset.pattern.permute.xlu1 %v8052_v40  ;;  %1658 = vperm.xlu0 %5356, %v5801_v26   ;;  %v8106_v26 = vld [vmem:[#allocation17_spill] sm:$0xff] }
 0x14e   : > { %1182 = vperm.xlu1 %5330, %v6246_v5   ;;  %3037 = vmatpush1.bf16.msra.mxu0 %v5446_v3  ;;  %vm537_vm12 = vcmp.eq.s32.totalorder %v6180_v54, %v8106_v26 }
 0x14f   : > { %v6249_v55 = vpop.permute.xlu1 %796  ;;  %4714 = vmatmul.mubr.msk.bf16.gmra.mrb[12].mxu0 %vm4713_vm9, %v8054_v52  ;;  %v6252_v53 = vpop.permute.xlu0 %799  ;;  %3038 = vmatprep.subr.bf16.mxu0 %v8100_v56  ;;  %vm6271_vm15 = vmpackc.low %vm538_vm11, %vm537_vm12  ;;  %vm539_vm11 = vcmp.eq.s32.totalorder %v6180_v54, %v6021_v37  ;;  %vm548_vm12 = vcmp.eq.s32.totalorder %v6180_v54, %v6043_v11  ;;  %v6322_v37 = vld [vmem:[%s5701_s19 + $0x28] sm:$0xff] }
 0x150   : > { %4716 = vmatprep.mubr.msk.bf16.mxu0 %vm4715_vm10, %v8054_v52  ;;  %vm540_vm10 = vcmp.eq.s32.totalorder %v6180_v54, %v6019_v46 }
 0x151   : > { %1685 = vperm.xlu0 %5356, %v5832_v33   ;;  %vm4721_vm0 = vmpackc.low %vm540_vm10, %vm539_vm11  ;;  %vm959_vm10 = vcmp.eq.s32.totalorder %v6180_v54, %v6249_v55  ;;  %vm960_vm11 = vcmp.eq.s32.totalorder %v6180_v54, %v6252_v53  ;;  %v5452_v53 = vld [vmem:[#allocation2 + $0xd8] sm:$0xff]  }
 0x152   : > { %5331 = vset.pattern.permute.xlu1 %v8050_v63  ;;  %3039 = vmatpush1.bf16.msra.mxu0 %v5447_v22 }
 0x153   : > { %v803_v2 = vpop.permute.xlu1 %802  ;;  %1604 = vperm.xlu1 %5331, %v6267_v10   ;;  %v806_v0 = vpop.permute.xlu0 %805  ;;  %3040 = vmatprep.subr.bf16.mxu0 %v8100_v56 }
 0x154   : > { %vm961_vm2 = vcmp.eq.s32.totalorder %v6180_v54, %v803_v2  ;;  %vm962_vm3 = vcmp.eq.s32.totalorder %v6180_v54, %v806_v0  ;;  %v5481_v2 = vld [vmem:[%s5701_s19 + $0x50] sm:$0xff]  ;;  %v8111_v0 = vld [vmem:[#allocation20_spill] sm:$0xff] }
 0x155   : > { %5360 = vset.pattern.permute.xlu0 %v8052_v40  ;;  %vm4731_vm4 = vmpackc.low %vm962_vm3, %vm961_vm2 }
 0x156   : > { %1173 = vperm.xlu0 %5360, %v6284_v60   ;;  %4732 = vmatprep.mubr.msk.bf16.mxu1 %vm4731_vm4, %v8054_v52  ;;  %vm4737_vm3 = vmpackc.low %vm548_vm12, %vm547_vm13 }
 0x157   : > { %v809_v4 = vpop.permute.xlu1 %808  ;;  %1607 = vperm.xlu1 %5331, %v6289_v14   ;;  %4718 = vmatmul.mubr.msk.bf16.gmra.mrb[16].mxu0 %vm6271_vm15, %v8054_v52  ;;  %v812_v62 = vpop.permute.xlu0 %811  ;;  %vm958_vm15 = vcmp.eq.s32.totalorder %v6180_v54, %v6238_v61  ;;  %v5479_v61 = vld [vmem:[%s5701_s19 + $0x48] sm:$0xff] }
 0x158   : > { %vm963_vm7 = vcmp.eq.s32.totalorder %v6180_v54, %v809_v4  ;;  %4734 = vmatmul.mubr.msk.bf16.vlgmr.msra.gmra.mrb[0].mxu1 %vm4733_vm5, %v8054_v52  ;;  %vm964_vm8 = vcmp.eq.s32.totalorder %v6180_v54, %v812_v62  ;;  %4720 = vmatprep.mubr.msk.bf16.mxu0 %vm4719_vm6, %v8054_v52  ;;  %vm4723_vm4 = vmpackc.low %vm958_vm15, %vm957_vm14  ;;  %vm542_vm6 = vcmp.eq.s32.totalorder %v6180_v54, %v6025_v49  ;;  %v5451_v49 = vld [vmem:[#allocation2 + $0xd0] sm:$0xff]   ;;  %v5453_v4 = vld [vmem:[#allocation2 + $0xe0] sm:$0xff]  }
 0x159   : > { %vm4735_vm9 = vmpackc.low %vm964_vm8, %vm963_vm7  ;;  %3041 = vmatpush1.bf16.msra.mxu0 %v5448_v12  ;;  %vm541_vm7 = vcmp.eq.s32.totalorder %v6180_v54, %v8109_v58  ;;  %vm550_vm8 = vcmp.eq.s32.totalorder %v6180_v54, %v6049_v13  ;;  %v6350_v13 = vld [vmem:[%s5701_s19 + $0x40] sm:$0xff]  ;;  %v5482_v62 = vld [vmem:[%s5701_s19 + $0x68] sm:$0xff] }
 0x15a   : > { %1176 = vperm.xlu0 %5360, %v6304_v6   ;;  %4736 = vmatprep.mubr.msk.bf16.mxu1 %vm4735_vm9, %v8054_v52  ;;  %vm549_vm9 = vcmp.eq.s32.totalorder %v6180_v54, %v6051_v16  ;;  %vm4725_vm12 = vmpackc.low %vm542_vm6, %vm541_vm7  ;;  %v6402_v58 = vld [vmem:[%s5701_s19 + $0x88] sm:$0xff] }
 0x15b   : > { %v815_v3 = vpop.permute.xlu1 %814  ;;  %5332 = vset.pattern.permute.xlu1 %v8052_v40  ;;  %v818_v46 = vpop.permute.xlu0 %817  ;;  %3042 = vmatprep.subr.bf16.mxu0 %v8100_v56  ;;  %vm4741_vm15 = vmpackc.low %vm550_vm8, %vm549_vm9 }
 0x15c   : > { %1191 = vperm.xlu1 %5332, %v6289_v14   ;;  %vm965_vm1 = vcmp.eq.s32.totalorder %v6180_v54, %v815_v3  ;;  %vm966_vm2 = vcmp.eq.s32.totalorder %v6180_v54, %v818_v46  ;;  %v5454_v3 = vld [vmem:[#allocation2 + $0xe8] sm:$0xff]   ;;  %v5484_v46 = vld [vmem:[%s5701_s19 + $0x70] sm:$0xff] }
 0x15d   : > { %3043 = vmatpush1.bf16.msra.mxu0 %v5449_v9  ;;  %vm4739_vm5 = vmpackc.low %vm966_vm2, %vm965_vm1 }
 0x15e   : > { %1185 = vperm.xlu0 %5360, %v6322_v37   ;;  %3044 = vmatprep.subr.bf16.mxu0 %v8100_v56 }
 0x15f   : > { %v821_v8 = vpop.permute.xlu1 %820  ;;  %4722 = vmatmul.mubr.msk.bf16.gmra.mrb[20].mxu0 %vm4721_vm0, %v8054_v52  ;;  %v824_v11 = vpop.permute.xlu0 %823  ;;  %vm4727_vm0 = vmpackc.low %vm960_vm11, %vm959_vm10  ;;  %vm554_vm11 = vcmp.eq.s32.totalorder %v6180_v54, %v6061_v17 }
 0x160   : > { %4738 = vmatmul.mubr.msk.bf16.gmra.mrb[4].mxu1 %vm4737_vm3, %v8054_v52  ;;  %5333 = vset.pattern.permute.xlu1 %v8050_v63  ;;  %vm967_vm13 = vcmp.eq.s32.totalorder %v6180_v54, %v821_v8  ;;  %vm968_vm14 = vcmp.eq.s32.totalorder %v6180_v54, %v824_v11  ;;  %vm543_vm3 = vcmp.eq.s32.totalorder %v6180_v54, %v8111_v0 }
 0x161   : > { %4724 = vmatprep.mubr.msk.bf16.mxu0 %vm4723_vm4, %v8054_v52  ;;  %4740 = vmatprep.mubr.msk.bf16.mxu1 %vm4739_vm5, %v8054_v52  ;;  %vm4743_vm1 = vmpackc.low %vm968_vm14, %vm967_vm13  ;;  %vm552_vm4 = vcmp.eq.s32.totalorder %v6180_v54, %v6055_v15  ;;  %vm551_vm5 = vcmp.eq.s32.totalorder %v6180_v54, %v6057_v1  ;;  %v6382_v1 = vld [vmem:[%s5701_s19 + $0x58] sm:$0xff] }
 0x162   : > { %1613 = vperm.xlu1 %5333, %v5479_v61   ;;  %1188 = vperm.xlu0 %5360, %v6267_v10   ;;  %v8110_v10 = vld [vmem:[#allocation19_spill] sm:$0xff]  ;;  %vm4745_vm9 = vmpackc.low %vm552_vm4, %vm551_vm5 }
 0x163   : > { %v827_v22 = vpop.permute.xlu1 %826  ;;  %v830_v26 = vpop.permute.xlu0 %829  ;;  %3045 = vmatpush1.bf16.msra.mxu0 %v5450_v18  ;;  %vm544_vm2 = vcmp.eq.s32.totalorder %v6180_v54, %v8110_v10  ;;  %v8112_v18 = vld [vmem:[#allocation21_spill] sm:$0xff] }
 0x164   : > { %3046 = vmatprep.subr.bf16.mxu0 %v8100_v56  ;;  %vm969_vm6 = vcmp.eq.s32.totalorder %v6180_v54, %v827_v22  ;;  %vm970_vm7 = vcmp.eq.s32.totalorder %v6180_v54, %v830_v26  ;;  %vm4729_vm8 = vmpackc.low %vm544_vm2, %vm543_vm3  ;;  %v5455_v22 = vld [vmem:[#allocation2 + $0xf0] sm:$0xff]   ;;  %vm555_vm2 = vcmp.eq.s32.totalorder %v6180_v54, %v6069_v7 }
 0x165   : > { %vm4747_vm10 = vmpackc.low %vm970_vm7, %vm969_vm6  ;;  %v6414_v26 = vld [vmem:[%s5701_s19 + $0x90] sm:$0xff]  ;;  %vm558_vm7 = vcmp.eq.s32.totalorder %v6180_v54, %v6073_v21  ;;  %v6471_v21 = vld [vmem:[%s5701_s19 + $0x78] sm:$0xff] }
 0x166   : > { %5334 = vset.pattern.permute.xlu1 %v8052_v40  ;;  %1197 = vperm.xlu0 %5360, %v5479_v61  }
 0x167   : > { %1194 = vperm.xlu1 %5334, %v6350_v13   ;;  %v833_v16 = vpop.permute.xlu1 %832  ;;  %4726 = vmatmul.mubr.msk.bf16.gmra.mrb[24].mxu0 %vm4725_vm12, %v8054_v52  ;;  %v836_v55 = vpop.permute.xlu0 %835  ;;  %vm553_vm12 = vcmp.eq.s32.totalorder %v6180_v54, %v8112_v18  ;;  %v6528_v18 = vld [vmem:[%s5701_s19 + $0x80] sm:$0xff] }
 0x168   : > { %4742 = vmatmul.mubr.msk.bf16.gmra.mrb[8].mxu1 %vm4741_vm15, %v8054_v52  ;;  %4728 = vmatprep.mubr.msk.bf16.mxu0 %vm4727_vm0, %v8054_v52  ;;  %vm971_vm13 = vcmp.eq.s32.totalorder %v6180_v54, %v833_v16  ;;  %vm972_vm14 = vcmp.eq.s32.totalorder %v6180_v54, %v836_v55  ;;  %vm4749_vm15 = vmpackc.low %vm554_vm11, %vm553_vm12  ;;  %v5456_v55 = vld [vmem:[#allocation2 + $0xf8] sm:$0xff]  }
 0x169   : > { %4744 = vmatprep.mubr.msk.bf16.mxu1 %vm4743_vm1, %v8054_v52  ;;  %3047 = vmatpush1.bf16.msra.mxu0 %v5451_v49  ;;  %vm4751_vm0 = vmpackc.low %vm972_vm14, %vm971_vm13  ;;  %vm556_vm1 = vcmp.eq.s32.totalorder %v6180_v54, %v6067_v19  ;;  %v6436_v19 = vld [vmem:[%s5701_s19 + $0x60] sm:$0xff]  ;;  %vm560_vm13 = vcmp.eq.s32.totalorder %v6180_v54, %v6079_v23  ;;  %vm559_vm14 = vcmp.eq.s32.totalorder %v6180_v54, %v6081_v20  ;;  %v6507_v20 = vld [vmem:[%s5701_s19 + $0xf0] sm:$0xff] }
 0x16a   : > { %1200 = vperm.xlu0 %5360, %v5481_v2   ;;  %3048 = vmatprep.subr.bf16.mxu0 %v8100_v56  ;;  %vm4753_vm5 = vmpackc.low %vm556_vm1, %vm555_vm2 }
 0x16b   : > { %5335 = vset.pattern.permute.xlu1 %v8050_v63  ;;  %v6364_v33 = vpop.permute.xlu1 %838  ;;  %v6366_v12 = vpop.permute.xlu0 %841  ;;  %vm4761_vm1 = vmpackc.low %vm560_vm13, %vm559_vm14 }
 0x16c   : > { %1616 = vperm.xlu1 %5335, %v5481_v2   ;;  %vm973_vm3 = vcmp.eq.s32.totalorder %v6180_v54, %v6364_v33  ;;  %vm974_vm4 = vcmp.eq.s32.totalorder %v6180_v54, %v6366_v12  ;;  %v6446_v2 = vld [vmem:[%s5701_s19 + $0xb0] sm:$0xff]  ;;  %v6463_v33 = vld [vmem:[%s5701_s19 + $0xc8] sm:$0xff] }
 0x16d   : > { %3049 = vmatpush1.bf16.msra.mxu0 %v5452_v53  ;;  %v6432_v53 = vld [vmem:[%s5701_s19 + $0xa8] sm:$0xff]  ;;  %vm4755_vm6 = vmpackc.low %vm974_vm4, %vm973_vm3  ;;  %vm562_vm3 = vcmp.eq.s32.totalorder %v6180_v54, %v6085_v25  ;;  %vm561_vm4 = vcmp.eq.s32.totalorder %v6180_v54, %v6087_v28 }
 0x16e   : > { %1209 = vperm.xlu0 %5360, %v5482_v62   ;;  %3050 = vmatprep.subr.bf16.mxu0 %v8100_v56 }
 0x16f   : > { %v6376_v9 = vpop.permute.xlu1 %844  ;;  %4730 = vmatmul.mubr.msk.bf16.gmra.mrb[28].mxu0 %vm4729_vm8, %v8054_v52  ;;  %v6379_v15 = vpop.permute.xlu0 %847  ;;  %vm557_vm8 = vcmp.eq.s32.totalorder %v6180_v54, %v6075_v24  ;;  %v6477_v24 = vld [vmem:[%s5701_s19 + $0xd0] sm:$0xff] }
 0x170   : > { %1619 = vperm.xlu1 %5335, %v6382_v1   ;;  %4746 = vmatmul.mubr.msk.bf16.gmra.mrb[12].mxu1 %vm4745_vm9, %v8054_v52  ;;  %vm975_vm9 = vcmp.eq.s32.totalorder %v6180_v54, %v6376_v9  ;;  %vm4757_vm11 = vmpackc.low %vm558_vm7, %vm557_vm8 }
 0x171   : > { %4748 = vmatprep.mubr.msk.bf16.mxu1 %vm4747_vm10, %v8054_v52  ;;  %3051 = vmatpush1.bf16.msra.mxu0 %v5453_v4  ;;  %vm976_vm10 = vcmp.eq.s32.totalorder %v6180_v54, %v6379_v15  ;;  %v6495_v15 = vld [vmem:[%s5701_s19 + $0xe0] sm:$0xff]  ;;  %vm4765_vm7 = vmpackc.low %vm562_vm3, %vm561_vm4 }
 0x172   : > { %1212 = vperm.xlu0 %5360, %v5484_v46   ;;  %3052 = vmatprep.subr.bf16.mxu0 %v8100_v56  ;;  %vm4759_vm12 = vmpackc.low %vm976_vm10, %vm975_vm9  ;;  %vm564_vm9 = vcmp.eq.s32.totalorder %v6180_v54, %v6091_v27  ;;  %v6564_v27 = vld [vmem:[%s5701_s19 + $0x98] sm:$0xff] }
 0x173   : > { %v6389_v8 = vpop.permute.xlu1 %850  ;;  %v6391_v11 = vpop.permute.xlu0 %853 }
 0x174   : > { %5336 = vset.pattern.permute.xlu1 %v8052_v40 }
 0x175   : > { %1203 = vperm.xlu1 %5336, %v6382_v1   ;;  %3053 = vmatpush1.bf16.msra.mxu0 %v5454_v3 }
 0x176   : > { %1221 = vperm.xlu0 %5360, %v6402_v58   ;;  %3054 = vmatprep.subr.bf16.mxu0 %v8100_v56 }
 0x177   : > { %v6406_v17 = vpop.permute.xlu1 %856  ;;  %v6408_v61 = vpop.permute.xlu0 %859 }
 0x178   : > { %4750 = vmatmul.mubr.msk.bf16.gmra.mrb[16].mxu1 %vm4749_vm15, %v8054_v52  ;;  %vm977_vm15 = vcmp.eq.s32.totalorder %v6180_v54, %v6389_v8 }
 0x179   : > { %5337 = vset.pattern.permute.xlu1 %v8050_v63  ;;  %4752 = vmatprep.mubr.msk.bf16.mxu1 %vm4751_vm0, %v8054_v52  ;;  %vm978_vm0 = vcmp.eq.s32.totalorder %v6180_v54, %v6391_v11  ;;  %v6524_v11 = vld [vmem:[%s5701_s19 + $0x100] sm:$0xff] }
 0x17a   : > { %1625 = vperm.xlu1 %5337, %v5482_v62   ;;  %1224 = vperm.xlu0 %5360, %v6414_v26   ;;  %vm4763_vm2 = vmpackc.low %vm978_vm0, %vm977_vm15  ;;  %vm566_vm15 = vcmp.eq.s32.totalorder %v6180_v54, %v6097_v29  ;;  %vm565_vm0 = vcmp.eq.s32.totalorder %v6180_v54, %v6099_v32  ;;  %v8116_v32 = vmov 1.0|1.0  }
 0x17b   : > { %v6417_v49 = vpop.permute.xlu1 %862  ;;  %v6419_v16 = vpop.permute.xlu0 %865  ;;  %3055 = vmatpush1.bf16.msra.mxu0 %v5455_v22  ;;  %v8113_v22 = vld [vmem:[#allocation22_spill] sm:$0xff]  ;;  %vm4773_vm3 = vmpackc.low %vm566_vm15, %vm565_vm0 }
 0x17c   : > { %3056 = vmatprep.subr.bf16.mxu0 %v8100_v56  ;;  %vm563_vm10 = vcmp.eq.s32.totalorder %v6180_v54, %v8113_v22  ;;  %v8115_v22 = vmov 2  }
 0x17d   : > { %vm4769_vm13 = vmpackc.low %vm564_vm9, %vm563_vm10 }
 0x17e   : > { %5338 = vset.pattern.permute.xlu1 %v8052_v40  ;;  %1233 = vperm.xlu0 %5360, %v6432_v53  }
 0x17f   : > { %1206 = vperm.xlu1 %5338, %v6436_v19   ;;  %v6439_v7 = vpop.permute.xlu1 %868  ;;  %v6441_v56 = vpop.permute.xlu0 %871  ;;  %3057 = vmatpush1.bf16.msra.mxu0 %v5456_v55  ;;  %v6556_v55 = vld [vmem:[%s5701_s19 + $0x120] sm:$0xff] }
 0x180   : > { %4754 = vmatmul.mubr.msk.bf16.gmra.mrb[20].mxu1 %vm4753_vm5, %v8054_v52  ;;  %vm979_vm5 = vcmp.eq.s32.totalorder %v6180_v54, %v6406_v17 }
 0x181   : > { %4756 = vmatprep.mubr.msk.bf16.mxu1 %vm4755_vm6, %v8054_v52  ;;  %vm980_vm6 = vcmp.eq.s32.totalorder %v6180_v54, %v6408_v61 }
 0x182   : > { %1236 = vperm.xlu0 %5360, %v6446_v2   ;;  %vm4767_vm8 = vmpackc.low %vm980_vm6, %vm979_vm5  ;;  %vm568_vm5 = vcmp.eq.s32.totalorder %v6180_v54, %v6103_v31  ;;  %vm567_vm6 = vcmp.eq.s32.totalorder %v6180_v54, %v6105_v34 }
 0x183   : > { %5339 = vset.pattern.permute.xlu1 %v8050_v63  ;;  %v6450_v10 = vpop.permute.xlu1 %874  ;;  %v6452_v0 = vpop.permute.xlu0 %877  ;;  %vm4777_vm9 = vmpackc.low %vm568_vm5, %vm567_vm6  ;;  %vm571_vm5 = vcmp.eq.s32.totalorder %v6180_v54, %v6117_v39  ;;  %v5510_v39 = vld [vmem:[%s5701_s19 + $0x1b0] sm:$0xff] }
 0x184   : > { %1628 = vperm.xlu1 %5339, %v5484_v46  }
 0x186   : > { %1245 = vperm.xlu0 %5360, %v6463_v33  }
 0x187   : > { %v6466_v12 = vpop.permute.xlu1 %880  ;;  %v6468_v4 = vpop.permute.xlu0 %883 }
 0x188   : > { %1631 = vperm.xlu1 %5339, %v6471_v21   ;;  %4758 = vmatmul.mubr.msk.bf16.gmra.mrb[24].mxu1 %vm4757_vm11, %v8054_v52  ;;  %vm981_vm11 = vcmp.eq.s32.totalorder %v6180_v54, %v6417_v49 }
 0x189   : > { %4760 = vmatprep.mubr.msk.bf16.mxu1 %vm4759_vm12, %v8054_v52  ;;  %vm982_vm12 = vcmp.eq.s32.totalorder %v6180_v54, %v6419_v16 }
 0x18a   : > { %1248 = vperm.xlu0 %5360, %v6477_v24   ;;  %vm4771_vm14 = vmpackc.low %vm982_vm12, %vm981_vm11  ;;  %vm570_vm11 = vcmp.eq.s32.totalorder %v6180_v54, %v6109_v30  ;;  %vm569_vm12 = vcmp.eq.s32.totalorder %v6180_v54, %v6111_v36  ;;  %v6644_v30 = vld [vmem:[%s5701_s19 + $0x180] sm:$0xff]  ;;  %v6649_v36 = vld [vmem:[%s5701_s19 + $0xb8] sm:$0xff] }
 0x18b   : > { %v6480_v62 = vpop.permute.xlu1 %886  ;;  %v6482_v9 = vpop.permute.xlu0 %889 }
 0x18c   : > { %5340 = vset.pattern.permute.xlu1 %v8052_v40  ;;  %vm989_vm6 = vcmp.eq.s32.totalorder %v6180_v54, %v6480_v62 }
 0x18d   : > { %1215 = vperm.xlu1 %5340, %v6471_v21  }
 0x18e   : > { %1254 = vperm.xlu0 %5360, %v6495_v15  }
 0x18f   : > { %v6498_v23 = vpop.permute.xlu1 %892  ;;  %v6500_v3 = vpop.permute.xlu0 %895 }
 0x190   : > { %4762 = vmatmul.mubr.msk.bf16.gmra.mrb[28].mxu1 %vm4761_vm1, %v8054_v52  ;;  %vm983_vm1 = vcmp.eq.s32.totalorder %v6180_v54, %v6439_v7  ;;  %v6600_v7 = vld [vmem:[%s5701_s19 + $0x150] sm:$0xff] }
 0x191   : > { %5341 = vset.pattern.permute.xlu1 %v8050_v63  ;;  %4764 = vmatprep.mubr.msk.bf16.mxu1 %vm4763_vm2, %v8054_v52  ;;  %vm984_vm2 = vcmp.eq.s32.totalorder %v6180_v54, %v6441_v56  ;;  %8118 = vst [vmem:[#allocation10_spill] sm:$0xff] %v6600_v7 }
 0x192   : > { %1637 = vperm.xlu1 %5341, %v6402_v58   ;;  %1260 = vperm.xlu0 %5360, %v6507_v20   ;;  %v6538_v58 = vld [vmem:[%s5701_s19 + $0x110] sm:$0xff]  ;;  %vm4775_vm4 = vmpackc.low %vm984_vm2, %vm983_vm1 }
 0x193   : > { %v6510_v46 = vpop.permute.xlu1 %898  ;;  %v6512_v8 = vpop.permute.xlu0 %901  ;;  %vm4781_vm2 = vmpackc.low %vm570_vm11, %vm569_vm12  ;;  %vm573_vm11 = vcmp.eq.s32.totalorder %v6180_v54, %v6123_v42  ;;  %vm991_vm12 = vcmp.eq.s32.totalorder %v6180_v54, %v6498_v23 }
 0x196   : > { %5342 = vset.pattern.permute.xlu1 %v8052_v40  ;;  %1266 = vperm.xlu0 %5360, %v6524_v11  }
 0x197   : > { %1218 = vperm.xlu1 %5342, %v6528_v18   ;;  %v6531_v25 = vpop.permute.xlu1 %904  ;;  %v6533_v28 = vpop.permute.xlu0 %907 }
 0x198   : > { %4766 = vmatmul.mubr.msk.bf16.gmra.mrb[32].mxu1 %vm4765_vm7, %v8054_v52  ;;  %vm985_vm7 = vcmp.eq.s32.totalorder %v6180_v54, %v6450_v10  ;;  %v5505_v10 = vld [vmem:[%s5701_s19 + $0x170] sm:$0xff] }
 0x199   : > { %4768 = vmatprep.mubr.msk.bf16.mxu1 %vm4767_vm8, %v8054_v52  ;;  %vm986_vm8 = vcmp.eq.s32.totalorder %v6180_v54, %v6452_v0 }
 0x19a   : > { %1272 = vperm.xlu0 %5360, %v6538_v58   ;;  %vm4779_vm10 = vmpackc.low %vm986_vm8, %vm985_vm7  ;;  %vm990_vm7 = vcmp.eq.s32.totalorder %v6180_v54, %v6482_v9 }
 0x19b   : > { %5343 = vset.pattern.permute.xlu1 %v8050_v63  ;;  %v6542_v17 = vpop.permute.xlu1 %910  ;;  %v6544_v61 = vpop.permute.xlu0 %913 }
 0x19c   : > { %1640 = vperm.xlu1 %5343, %v6414_v26   ;;  %v6570_v26 = vld [vmem:[%s5701_s19 + $0x130] sm:$0xff] }
 0x19d   : > { %8114 = vst [vmem:[#allocation11_spill] sm:$0xff] %v6570_v26 }
 0x19e   : > { %1278 = vperm.xlu0 %5360, %v6556_v55  }
 0x19f   : > { %v6559_v63 = vpop.permute.xlu1 %916  ;;  %v6561_v40 = vpop.permute.xlu0 %919 }
 0x1a0   : > { %1643 = vperm.xlu1 %5343, %v6564_v27   ;;  %4770 = vmatmul.mubr.msk.bf16.gmra.mrb[36].mxu1 %vm4769_vm13, %v8054_v52  ;;  %vm987_vm13 = vcmp.eq.s32.totalorder %v6180_v54, %v6466_v12 }
 0x1a1   : > { %4772 = vmatprep.mubr.msk.bf16.mxu1 %vm4771_vm14, %v8054_v52  ;;  %v6588_v52 = vld [vmem:[%s5701_s19 + $0x140] sm:$0xff]  ;;  %vm988_vm14 = vcmp.eq.s32.totalorder %v6180_v54, %v6468_v4  ;;  %v5508_v4 = vld [vmem:[%s5701_s19 + $0x190] sm:$0xff] }
 0x1a2   : > { %1284 = vperm.xlu0 %5360, %v6570_v26  }
 0x1a3   : > { %v6573_v49 = vpop.permute.xlu1 %922  ;;  %v6575_v16 = vpop.permute.xlu0 %925 }
 0x1a4   : > { %5344 = vset.pattern.permute.xlu1 %v8115_v22 }
 0x1a5   : > { %1227 = vperm.xlu1 %5344, %v6564_v27  }
 0x1a6   : > { %1290 = vperm.xlu0 %5360, %v6588_v52  }
 0x1a7   : > { %v6591_v29 = vpop.permute.xlu1 %928  ;;  %v6593_v50 = vpop.permute.xlu0 %931 }
 0x1a8   : > { %4774 = vmatmul.mubr.msk.bf16.gmra.mrb[40].mxu1 %vm4773_vm3, %v8116_v32  ;;  %vm4783_vm3 = vmpackc.low %vm988_vm14, %vm987_vm13  ;;  %vm992_vm13 = vcmp.eq.s32.totalorder %v6180_v54, %v6500_v3  ;;  %v5513_v3 = vld [vmem:[%s5701_s19 + $0x1d0] sm:$0xff] }
 0x1a9   : > { %5345 = vset.pattern.permute.xlu1 %v8117_v59  ;;  %4776 = vmatprep.mubr.msk.bf16.mxu1 %vm4775_vm4, %v8116_v32  ;;  %vm572_vm4 = vcmp.eq.s32.totalorder %v6180_v54, %v6115_v35 }
 0x1aa   : > { %1649 = vperm.xlu1 %5345, %v6432_v53   ;;  %1296 = vperm.xlu0 %5360, %v6600_v7   ;;  %v6617_v53 = vld [vmem:[%s5701_s19 + $0x160] sm:$0xff]  ;;  %vm4785_vm8 = vmpackc.low %vm572_vm4, %vm571_vm5 }
 0x1ab   : > { %v6603_v56 = vpop.permute.xlu1 %934  ;;  %v6605_v26 = vpop.permute.xlu0 %937  ;;  %v6621_v7 = vld [vmem:[%s5701_s19 + $0xa0] sm:$0xff] }
 0x1ae   : > { %5346 = vset.pattern.permute.xlu1 %v8115_v22  ;;  %1302 = vperm.xlu0 %5360, %v6617_v53  }
 0x1af   : > { %1230 = vperm.xlu1 %5346, %v6621_v7   ;;  %v6624_v31 = vpop.permute.xlu0 %943 }
 0x1b0   : > { %8119 = vst [vmem:[#allocation13_spill] sm:$0xff] %v6624_v31  ;;  %4778 = vmatmul.mubr.msk.bf16.gmra.mrb[44].mxu1 %vm4777_vm9, %v8116_v32  ;;  %v1590_v34 = vpop.permute.xlu1 %1589  ;;  %vm4787_vm9 = vmpackc.low %vm990_vm7, %vm989_vm6  ;;  %v6727_v31 = vld [vmem:[%s5701_s19 + $0x1e0] sm:$0xff]  ;;  %vm578_vm6 = vcmp.eq.s32.totalorder %v6180_v54, %v6133_v44  ;;  %vm577_vm7 = vcmp.eq.s32.totalorder %v6180_v54, %v6135_v48  ;;  %v8058_v48 = vmov 4  }
 0x1b1   : > { %4780 = vmatprep.mubr.msk.bf16.mxu1 %vm4779_vm10, %v8116_v32  ;;  %vm1778_vm15 = vcmp.eq.s32.totalorder %v6180_v54, %v1590_v34  ;;  %vm574_vm10 = vcmp.eq.s32.totalorder %v6180_v54, %v6121_v38  ;;  %v6702_v38 = vld [vmem:[%s5701_s19 + $0xc0] sm:$0xff] }
 0x1b2   : > { %1308 = vperm.xlu0 %5360, %v5505_v10   ;;  %vm4789_vm14 = vmpackc.low %vm574_vm10, %vm573_vm11 }
 0x1b3   : > { %5347 = vset.pattern.permute.xlu1 %v8117_v59  ;;  %vm4797_vm10 = vmpackc.low %vm578_vm6, %vm577_vm7 }
 0x1b4   : > { %1652 = vperm.xlu1 %5347, %v6446_v2   ;;  %v1587_v0 = vpop.permute.xlu0 %1586 }
 0x1b5   : > { %vm1777_vm0 = vcmp.eq.s32.totalorder %v6180_v54, %v1587_v0  ;;  %v6641_v10 = vpop.permute.xlu1 %1170 }
 0x1b6   : > { %vm4827_vm1 = vmpackc.low %vm1778_vm15, %vm1777_vm0  ;;  %1314 = vperm.xlu0 %5360, %v6644_v30   ;;  %vm576_vm0 = vcmp.eq.s32.totalorder %v6180_v54, %v6127_v41  ;;  %v6731_v41 = vld [vmem:[%s5701_s19 + $0xd8] sm:$0xff]  ;;  %vm1361_vm11 = vcmp.eq.s32.totalorder %v6180_v54, %v6641_v10 }
 0x1b7   : > { %4828 = vmatprep.mubr.msk.bf16.mxu0 %vm4827_vm1, %v8116_v32  ;;  %vm4791_vm15 = vmpackc.low %vm992_vm13, %vm991_vm12  ;;  %vm575_vm1 = vcmp.eq.s32.totalorder %v6180_v54, %v6129_v45 }
 0x1b8   : > { %1655 = vperm.xlu1 %5347, %v6649_v36   ;;  %4782 = vmatmul.mubr.msk.bf16.gmra.mrb[48].mxu1 %vm4781_vm2, %v8116_v32  ;;  %v6653_v2 = vpop.permute.xlu0 %1598  ;;  %vm993_vm2 = vcmp.eq.s32.totalorder %v6180_v54, %v6510_v46  ;;  %vm4793_vm4 = vmpackc.low %vm576_vm0, %vm575_vm1  ;;  %v6741_v46 = vld [vmem:[%s5701_s19 + $0x1f0] sm:$0xff] }
 0x1b9   : > { %4784 = vmatprep.mubr.msk.bf16.mxu1 %vm4783_vm3, %v8116_v32  ;;  %vm994_vm3 = vcmp.eq.s32.totalorder %v6180_v54, %v6512_v8 }
 0x1ba   : > { %v6656_v12 = vpop.permute.xlu1 %1592  ;;  %1320 = vperm.xlu0 %5360, %v5508_v4   ;;  %v6674_v4 = vld [vmem:[%s5701_s19 + $0x1a0] sm:$0xff]  ;;  %vm4795_vm5 = vmpackc.low %vm994_vm3, %vm993_vm2  ;;  %vm580_vm2 = vcmp.eq.s32.totalorder %v6180_v54, %v6139_v47  ;;  %vm579_vm3 = vcmp.eq.s32.totalorder %v6180_v54, %v6141_v51  ;;  %v6788_v47 = vld [vmem:[%s5701_s19 + $0xe8] sm:$0xff] }
 0x1bb   : > { %vm1779_vm0 = vcmp.eq.s32.totalorder %v6180_v54, %v6656_v12  ;;  %vm4801_vm7 = vmpackc.low %vm580_vm2, %vm579_vm3  ;;  %v8122_v12 = vmov 1  }
 0x1bc   : > { %5348 = vset.pattern.permute.xlu1 %v8115_v22  ;;  %v6664_v34 = vpop.permute.xlu0 %1610 }
 0x1bd   : > { %1239 = vperm.xlu1 %5348, %v6649_v36  }
 0x1be   : > { %v6671_v0 = vpop.permute.xlu1 %1595  ;;  %1326 = vperm.xlu0 %5360, %v6674_v4  }
 0x1bf   : > { %vm1780_vm12 = vcmp.eq.s32.totalorder %v6180_v54, %v6671_v0 }
 0x1c0   : > { %4786 = vmatmul.mubr.msk.bf16.gmra.mrb[52].mxu1 %vm4785_vm8, %v8116_v32  ;;  %v6678_v35 = vpop.permute.xlu0 %1622  ;;  %vm995_vm8 = vcmp.eq.s32.totalorder %v6180_v54, %v6531_v25  ;;  %v5517_v25 = vld [vmem:[%s5701_s19 + $0x18] sm:$0xff]  ;;  %vm4831_vm1 = vmpackc.low %vm1780_vm12, %vm1779_vm0  ;;  %vm999_vm0 = vcmp.eq.s32.totalorder %v6180_v54, %v6559_v63 }
 0x1c1   : > { %5349 = vset.pattern.permute.xlu1 %v8117_v59  ;;  %4788 = vmatprep.mubr.msk.bf16.mxu1 %vm4787_vm9, %v8116_v32  ;;  %vm996_vm9 = vcmp.eq.s32.totalorder %v6180_v54, %v6533_v28 }
 0x1c2   : > { %1661 = vperm.xlu1 %5349, %v6463_v33   ;;  %1332 = vperm.xlu0 %5360, %v5510_v39   ;;  %v6698_v33 = vld [vmem:[%s5701_s19 + $0x1c0] sm:$0xff] }
 0x1c3   : > { %v6684_v62 = vpop.permute.xlu1 %1179 }
 0x1c4   : > { %v6690_v9 = vpop.permute.xlu0 %1634 }
 0x1c6   : > { %5350 = vset.pattern.permute.xlu1 %v8115_v22  ;;  %1338 = vperm.xlu0 %5360, %v6698_v33  }
 0x1c7   : > { %1242 = vperm.xlu1 %5350, %v6702_v38  }
 0x1c8   : > { %4790 = vmatmul.mubr.msk.bf16.gmra.mrb[56].mxu1 %vm4789_vm14, %v8116_v32  ;;  %v6706_v42 = vpop.permute.xlu1 %1601  ;;  %v6708_v23 = vpop.permute.xlu0 %1646 }
 0x1c9   : > { %4792 = vmatprep.mubr.msk.bf16.mxu1 %vm4791_vm15, %v8116_v32  ;;  %vm4799_vm15 = vmpackc.low %vm996_vm9, %vm995_vm8  ;;  %vm1781_vm8 = vcmp.eq.s32.totalorder %v6180_v54, %v6653_v2  ;;  %vm1782_vm9 = vcmp.eq.s32.totalorder %v6180_v54, %v6706_v42 }
 0x1ca   : > { %1344 = vperm.xlu0 %5360, %v5513_v3  }
 0x1cb   : > { %5351 = vset.pattern.permute.xlu1 %v8117_v59 }
 0x1cc   : > { %1664 = vperm.xlu1 %5351, %v6477_v24   ;;  %v6718_v39 = vpop.permute.xlu0 %1658 }
 0x1cd   : > { %v6724_v3 = vpop.permute.xlu1 %1182 }
 0x1ce   : > { %1350 = vperm.xlu0 %5360, %v6727_v31  }
 0x1d0   : > { %1667 = vperm.xlu1 %5351, %v6731_v41   ;;  %4794 = vmatmul.mubr.msk.bf16.gmra.mrb[60].mxu1 %vm4793_vm4, %v8116_v32  ;;  %v6735_v45 = vpop.permute.xlu0 %1685  ;;  %vm997_vm4 = vcmp.eq.s32.totalorder %v6180_v54, %v6542_v17  ;;  %v8120_v17 = vld [vmem:[#allocation23_spill] sm:$0xff] }
 0x1d1   : > { %4796 = vmatprep.mubr.msk.bf16.mxu1 %vm4795_vm5, %v8116_v32  ;;  %vm998_vm5 = vcmp.eq.s32.totalorder %v6180_v54, %v6544_v61  ;;  %v8121_v61 = vld [vmem:[#allocation24_spill] sm:$0xff] }
 0x1d2   : > { %v6738_v24 = vpop.permute.xlu1 %1604  ;;  %1356 = vperm.xlu0 %5360, %v6741_v46  }
 0x1d4   : > { %5352 = vset.pattern.permute.xlu1 %v8115_v22 }
 0x1d5   : > { %1251 = vperm.xlu1 %5352, %v6731_v41   ;;  %v1174_v8 = vpop.permute.xlu0 %1173 }
 0x1d6   : > { %vm1362_vm13 = vcmp.eq.s32.totalorder %v6180_v54, %v1174_v8  ;;  %v1608_v44 = vpop.permute.xlu1 %1607  ;;  %5422 = vset.pattern.permute.xlu0 %v8058_v48 }
 0x1d7   : > { %vm4829_vm14 = vmpackc.low %vm1362_vm13, %vm1361_vm11  ;;  %2011 = vperm.xlu0 %5422, %v5517_v25   ;;  %vm1364_vm11 = vcmp.eq.s32.totalorder %v6180_v54, %v6684_v62 }
 0x1d8   : > { %4798 = vmatmul.mubr.msk.bf16.gmra.mrb[64].mxu1 %vm4797_vm10, %v8116_v32  ;;  %4830 = vmatmul.mubr.msk.bf16.vlgmr.msra.gmra.mrb[0].mxu0 %vm4829_vm14, %v8116_v32  ;;  %vm4803_vm10 = vmpackc.low %vm998_vm5, %vm997_vm4  ;;  %vm582_vm14 = vcmp.eq.s32.totalorder %v6180_v54, %v8120_v17  ;;  %vm1784_vm4 = vcmp.eq.s32.totalorder %v6180_v54, %v1608_v44  ;;  %v5462_v44 = vld [vmem:[#allocation2 + $0x128] sm:$0xff]  }
 0x1d9   : > { %5353 = vset.pattern.permute.xlu1 %v8117_v59  ;;  %4800 = vmatprep.mubr.msk.bf16.mxu1 %vm4799_vm15, %v8116_v32  ;;  %v1177_v28 = vpop.permute.xlu0 %1176  ;;  %vm4835_vm13 = vmpackc.low %vm1782_vm9, %vm1781_vm8  ;;  %vm581_vm15 = vcmp.eq.s32.totalorder %v6180_v54, %v8121_v61  ;;  %v5524_v61 = vld [vmem:[%s5701_s19 + $0x30] sm:$0xff] }
 0x1da   : > { %1670 = vperm.xlu1 %5353, %v6495_v15   ;;  %4832 = vmatprep.mubr.msk.bf16.mxu0 %vm4831_vm1, %v8116_v32  ;;  %vm1363_vm6 = vcmp.eq.s32.totalorder %v6180_v54, %v1177_v28  ;;  %vm1000_vm1 = vcmp.eq.s32.totalorder %v6180_v54, %v6561_v40  ;;  %vm4805_vm3 = vmpackc.low %vm582_vm14, %vm581_vm15  ;;  %v8123_v40 = vld [vmem:[#allocation25_spill] sm:$0xff]  ;;  %v5463_v28 = vld [vmem:[#allocation2 + $0x130] sm:$0xff]  }
 0x1db   : > { %v6777_v10 = vpop.permute.xlu1 %1191  ;;  %2014 = vperm.xlu0 %5422, %v6246_v5   ;;  %vm4833_vm12 = vmpackc.low %vm1364_vm11, %vm1363_vm6  ;;  %vm1365_vm6 = vcmp.eq.s32.totalorder %v6180_v54, %v6724_v3  ;;  %v8127_v3 = vld [vmem:[#allocation7_spill] sm:$0xff] }
 0x1dc   : > { %vm4807_vm5 = vmpackc.low %vm1000_vm1, %vm999_vm0  ;;  %vm1785_vm0 = vcmp.eq.s32.totalorder %v6180_v54, %v6664_v34  ;;  %v8126_v34 = vld [vmem:[#allocation28_spill] sm:$0xff] }
 0x1dd   : > { %v1186_v51 = vpop.permute.xlu0 %1185 }
 0x1de   : > { %1673 = vperm.xlu1 %5353, %v6788_v47   ;;  %vm1366_vm2 = vcmp.eq.s32.totalorder %v6180_v54, %v1186_v51 }
 0x1df   : > { %2023 = vperm.xlu0 %5422, %v6289_v14   ;;  %vm4837_vm8 = vmpackc.low %vm1366_vm2, %vm1365_vm6 }
 0x1e0   : > { %4802 = vmatmul.mubr.msk.bf16.gmra.mrb[68].mxu1 %vm4801_vm7, %v8116_v32  ;;  %4834 = vmatmul.mubr.msk.bf16.gmra.mrb[4].mxu0 %vm4833_vm12, %v8116_v32  ;;  %vm1783_vm7 = vcmp.eq.s32.totalorder %v6180_v54, %v6738_v24  ;;  %vm1001_vm12 = vcmp.eq.s32.totalorder %v6180_v54, %v6573_v49  ;;  %v8128_v24 = vld [vmem:[#allocation6_spill] sm:$0xff] }
 0x1e1   : > { %v1614_v5 = vpop.permute.xlu1 %1613  ;;  %4804 = vmatprep.mubr.msk.bf16.mxu1 %vm4803_vm10, %v8116_v32  ;;  %4836 = vmatprep.mubr.msk.bf16.mxu0 %vm4835_vm13, %v8116_v32  ;;  %v1189_v14 = vpop.permute.xlu0 %1188  ;;  %vm4839_vm9 = vmpackc.low %vm1784_vm4, %vm1783_vm7  ;;  %vm584_vm10 = vcmp.eq.s32.totalorder %v6180_v54, %v8123_v40  ;;  %vm1002_vm13 = vcmp.eq.s32.totalorder %v6180_v54, %v6575_v16  ;;  %v8125_v16 = vld [vmem:[#allocation27_spill] sm:$0xff]  ;;  %vm585_vm7 = vcmp.eq.s32.totalorder %v6180_v54, %v8126_v34 }
 0x1e2   : > { %5354 = vset.pattern.permute.xlu1 %v8115_v22  ;;  %vm1367_vm14 = vcmp.eq.s32.totalorder %v6180_v54, %v1189_v14  ;;  %vm1786_vm1 = vcmp.eq.s32.totalorder %v6180_v54, %v1614_v5  ;;  %vm4811_vm2 = vmpackc.low %vm1002_vm13, %vm1001_vm12  ;;  %vm586_vm6 = vcmp.eq.s32.totalorder %v6180_v54, %v8125_v16  ;;  %v5528_v16 = vld [vmem:[%s5701_s19 + $0x48] sm:$0xff] }
 0x1e3   : > { %1257 = vperm.xlu1 %5354, %v6788_v47   ;;  %2026 = vperm.xlu0 %5422, %v6350_v13   ;;  %v8124_v13 = vld [vmem:[#allocation26_spill] sm:$0xff]  ;;  %vm4813_vm12 = vmpackc.low %vm586_vm6, %vm585_vm7 }
 0x1e4   : > { %vm583_vm11 = vcmp.eq.s32.totalorder %v6180_v54, %v8124_v13 }
 0x1e5   : > { %vm4809_vm15 = vmpackc.low %vm584_vm10, %vm583_vm11 }
 0x1e6   : > { %v6809_v2 = vpop.permute.xlu1 %1194 }
 0x1e7   : > { %5355 = vset.pattern.permute.xlu1 %v8122_v12  ;;  %2035 = vperm.xlu0 %5422, %v6382_v1   ;;  %v1198_v1 = vpop.permute.xlu0 %1197  ;;  %vm1369_vm10 = vcmp.eq.s32.totalorder %v6180_v54, %v6809_v2 }
 0x1e8   : > { %940 = vperm.xlu1 %5355, %v6741_v46   ;;  %4806 = vmatmul.mubr.msk.bf16.gmra.mrb[72].mxu1 %vm4805_vm3, %v8116_v32  ;;  %vm1368_vm3 = vcmp.eq.s32.totalorder %v6180_v54, %v6777_v10  ;;  %vm1370_vm11 = vcmp.eq.s32.totalorder %v6180_v54, %v1198_v1 }
 0x1e9   : > { %4808 = vmatprep.mubr.msk.bf16.mxu1 %vm4807_vm5, %v8116_v32  ;;  %4838 = vmatmul.mubr.msk.bf16.gmra.mrb[8].mxu0 %vm4837_vm8, %v8116_v32  ;;  %vm4841_vm4 = vmpackc.low %vm1368_vm3, %vm1367_vm14  ;;  %vm1003_vm8 = vcmp.eq.s32.totalorder %v6180_v54, %v6591_v29  ;;  %vm587_vm3 = vcmp.eq.s32.totalorder %v6180_v54, %v8128_v24  ;;  %v5530_v24 = vld [vmem:[%s5701_s19 + $0x50] sm:$0xff] }
 0x1ea   : > { %4840 = vmatprep.mubr.msk.bf16.mxu0 %vm4839_vm9, %v8116_v32  ;;  %vm4843_vm5 = vmpackc.low %vm1786_vm1, %vm1785_vm0  ;;  %vm1004_vm9 = vcmp.eq.s32.totalorder %v6180_v54, %v6593_v50 }
 0x1eb   : > { %v1617_v63 = vpop.permute.xlu1 %1616  ;;  %2038 = vperm.xlu0 %5422, %v6436_v19   ;;  %v5457_v19 = vld [vmem:[#allocation2 + $0x100] sm:$0xff]   ;;  %v6841_v49 = vpop.permute.xlu0 %1200  ;;  %vm4815_vm14 = vmpackc.low %vm1004_vm9, %vm1003_vm8  ;;  %vm1789_vm9 = vcmp.eq.s32.totalorder %v6180_v54, %v6678_v35 }
 0x1ec   : > { %5357 = vset.pattern.permute.xlu1 %v8117_v59  ;;  %5082 = vmatprep.subr.bf16.mxu1 %v5457_v19  ;;  %vm1787_vm0 = vcmp.eq.s32.totalorder %v6180_v54, %v1617_v63  ;;  %vm1371_vm7 = vcmp.eq.s32.totalorder %v6180_v54, %v6841_v49  ;;  %v6983_v63 = vld [vmem:[%s5701_s19 + $0x158] sm:$0xff] }
 0x1ed   : > { %1676 = vperm.xlu1 %5357, %v6507_v20   ;;  %v6844_v20 = vld [vmem:[%s5701_s19 + $0xf8] sm:$0xff]  ;;  %5083 = vmatpush3.bf16.msra.mxu1 %v5457_v19  ;;  %v6995_v19 = vld [vmem:[%s5701_s19 + $0x128] sm:$0xff] }
 0x1ef   : > { %v1620_v0 = vpop.permute.xlu1 %1619  ;;  %2047 = vperm.xlu0 %5422, %v6471_v21   ;;  %v5458_v21 = vld [vmem:[#allocation2 + $0x108] sm:$0xff]   ;;  %v6855_v42 = vpop.permute.xlu0 %1209 }
 0x1f0   : > { %4810 = vmatmul.mubr.msk.bf16.gmra.mrb[76].mxu1 %vm4809_vm15, %v8116_v32  ;;  %5084 = vmatprep.subr.bf16.mxu1 %v5458_v21  ;;  %vm1788_vm13 = vcmp.eq.s32.totalorder %v6180_v54, %v1620_v0  ;;  %vm4845_vm15 = vmpackc.low %vm1370_vm11, %vm1369_vm10 }
 0x1f1   : > { %1679 = vperm.xlu1 %5357, %v6844_v20   ;;  %4812 = vmatprep.mubr.msk.bf16.mxu1 %vm4811_vm2, %v8116_v32  ;;  %vm4847_vm1 = vmpackc.low %vm1788_vm13, %vm1787_vm0  ;;  %vm588_vm2 = vcmp.eq.s32.totalorder %v6180_v54, %v8127_v3 }
 0x1f2   : > { %4842 = vmatmul.mubr.msk.bf16.gmra.mrb[12].mxu0 %vm4841_vm4, %v8116_v32  ;;  %5085 = vmatpush3.bf16.msra.mxu1 %v5458_v21  ;;  %vm1005_vm4 = vcmp.eq.s32.totalorder %v6180_v54, %v6603_v56  ;;  %vm4817_vm8 = vmpackc.low %vm588_vm2, %vm587_vm3  ;;  %v5520_v56 = vld [vmem:[%s5701_s19] sm:$0xff]  ;;  %v7006_v21 = vld [vmem:[%s5701_s19 + $0x178] sm:$0xff] }
 0x1f3   : > { %4844 = vmatprep.mubr.msk.bf16.mxu0 %vm4843_vm5, %v8116_v32  ;;  %2050 = vperm.xlu0 %5422, %v6528_v18   ;;  %v5459_v18 = vld [vmem:[#allocation2 + $0x110] sm:$0xff]   ;;  %v6869_v50 = vpop.permute.xlu0 %1212  ;;  %vm1006_vm5 = vcmp.eq.s32.totalorder %v6180_v54, %v6605_v26 }
 0x1f4   : > { %v1204_v62 = vpop.permute.xlu1 %1203  ;;  %5086 = vmatprep.subr.bf16.mxu1 %v5459_v18  ;;  %vm4819_vm11 = vmpackc.low %vm1006_vm5, %vm1005_vm4 }
 0x1f5   : > { %5358 = vset.pattern.permute.xlu1 %v8115_v22  ;;  %vm1372_vm6 = vcmp.eq.s32.totalorder %v6180_v54, %v1204_v62 }
 0x1f6   : > { %1263 = vperm.xlu1 %5358, %v6844_v20   ;;  %5087 = vmatpush3.bf16.msra.mxu1 %v5459_v18 }
 0x1f7   : > { %2059 = vperm.xlu0 %5422, %v6564_v27   ;;  %v5460_v27 = vld [vmem:[#allocation2 + $0x118] sm:$0xff]   ;;  %v6881_v46 = vpop.permute.xlu0 %1221 }
 0x1f8   : > { %4814 = vmatmul.mubr.msk.bf16.gmra.mrb[80].mxu1 %vm4813_vm12, %v8116_v32  ;;  %5088 = vmatprep.subr.bf16.mxu1 %v5460_v27  ;;  %vm4849_vm12 = vmpackc.low %vm1372_vm6, %vm1371_vm7 }
 0x1f9   : > { %v1626_v29 = vpop.permute.xlu1 %1625  ;;  %4816 = vmatprep.mubr.msk.bf16.mxu1 %vm4815_vm14, %v8116_v32  ;;  %vm590_vm14 = vcmp.eq.s32.totalorder %v6180_v54, %v6169_v57 }
 0x1fa   : > { %4846 = vmatmul.mubr.msk.bf16.gmra.mrb[16].mxu0 %vm4845_vm15, %v8116_v32  ;;  %5359 = vset.pattern.permute.xlu1 %v8117_v59  ;;  %vm1790_vm10 = vcmp.eq.s32.totalorder %v6180_v54, %v1626_v29  ;;  %vm589_vm15 = vcmp.eq.s32.totalorder %v6180_v54, %v6171_v43  ;;  %v6921_v43 = vld [vmem:[%s5701_s19 + $0x108] sm:$0xff] }
 0x1fb   : > { %4848 = vmatprep.mubr.msk.bf16.mxu0 %vm4847_vm1, %v8116_v32  ;;  %1682 = vperm.xlu1 %5359, %v6524_v11   ;;  %v6897_v26 = vpop.permute.xlu0 %1224  ;;  %vm4851_vm13 = vmpackc.low %vm1790_vm10, %vm1789_vm9  ;;  %vm1374_vm1 = vcmp.eq.s32.totalorder %v6180_v54, %v6855_v42  ;;  %vm1793_vm9 = vcmp.eq.s32.totalorder %v6180_v54, %v6690_v9  ;;  %v5522_v9 = vld [vmem:[%s5701_s19 + $0x118] sm:$0xff] }
 0x1fc   : > { %2062 = vperm.xlu0 %5422, %v6621_v7   ;;  %v5461_v7 = vld [vmem:[#allocation2 + $0x120] sm:$0xff]   ;;  %5089 = vmatpush3.bf16.msra.mxu1 %v5460_v27  ;;  %vm4821_vm2 = vmpackc.low %vm590_vm14, %vm589_vm15 }
 0x1fd   : > { %5090 = vmatprep.subr.bf16.mxu1 %v5461_v7 }
 0x1fe   : > { %v1207_v8 = vpop.permute.xlu1 %1206 }
 0x1ff   : > { %5361 = vset.pattern.permute.xlu1 %v8058_v48  ;;  %v6908_v25 = vpop.permute.xlu0 %1233  ;;  %vm1373_vm0 = vcmp.eq.s32.totalorder %v6180_v54, %v1207_v8 }
 0x200   : > { %2002 = vperm.xlu1 %5361, %v5520_v56   ;;  %4818 = vmatmul.mubr.msk.bf16.gmra.mrb[84].mxu1 %vm4817_vm8, %v8116_v32  ;;  %vm4853_vm3 = vmpackc.low %vm1374_vm1, %vm1373_vm0  ;;  %vm1375_vm8 = vcmp.eq.s32.totalorder %v6180_v54, %v6869_v50  ;;  %v8129_v56 = vld [vmem:[#allocation11_spill] sm:$0xff] }
 0x201   : > { %4820 = vmatprep.mubr.msk.bf16.mxu1 %vm4819_vm11, %v8116_v32  ;;  %2071 = vperm.xlu0 %5422, %v6649_v36  }
 0x202   : > { %4850 = vmatmul.mubr.msk.bf16.gmra.mrb[20].mxu0 %vm4849_vm12, %v8116_v32  ;;  %5091 = vmatpush3.bf16.msra.mxu1 %v5461_v7 }
 0x203   : > { %4852 = vmatprep.mubr.msk.bf16.mxu0 %vm4851_vm13, %v8116_v32  ;;  %v1629_v35 = vpop.permute.xlu1 %1628  ;;  %5092 = vmatprep.subr.bf16.mxu1 %v5462_v44  ;;  %v6918_v57 = vpop.permute.xlu0 %1236  ;;  %vm1378_vm13 = vcmp.eq.s32.totalorder %v6180_v54, %v6881_v46 }
 0x204   : > { %2005 = vperm.xlu1 %5361, %v6284_v60   ;;  %vm1791_vm4 = vcmp.eq.s32.totalorder %v6180_v54, %v1629_v35  ;;  %v5464_v60 = vld [vmem:[#allocation2 + $0x138] sm:$0xff]  }
 0x205   : > { %2074 = vperm.xlu0 %5422, %v6702_v38   ;;  %v7045_v35 = vld [vmem:[%s5701_s19 + $0x1b8] sm:$0xff] }
 0x206   : > { %5093 = vmatpush3.bf16.msra.mxu1 %v5462_v44 }
 0x207   : > { %v1632_v36 = vpop.permute.xlu1 %1631  ;;  %5094 = vmatprep.subr.bf16.mxu1 %v5463_v28  ;;  %v6932_v10 = vpop.permute.xlu0 %1245 }
 0x208   : > { %vm1792_vm5 = vcmp.eq.s32.totalorder %v6180_v54, %v1632_v36  ;;  %5362 = vset.pattern.permute.xlu1 %v8115_v22  ;;  %4822 = vmatmul.mubr.msk.bf16.gmra.mrb[88].mxu1 %vm4821_vm2, %v8116_v32 }
 0x209   : > { %vm4855_vm6 = vmpackc.low %vm1792_vm5, %vm1791_vm4  ;;  %1269 = vperm.xlu1 %5362, %v6921_v43   ;;  %2083 = vperm.xlu0 %5422, %v6731_v41  }
 0x20a   : > { %4854 = vmatmul.mubr.msk.bf16.gmra.mrb[24].mxu0 %vm4853_vm3, %v8116_v32  ;;  %5095 = vmatpush3.bf16.msra.mxu1 %v5463_v28  ;;  %vm1379_vm3 = vcmp.eq.s32.totalorder %v6180_v54, %v6897_v26 }
 0x20b   : > { %4856 = vmatprep.mubr.msk.bf16.mxu0 %vm4855_vm6, %v8116_v32  ;;  %5096 = vmatprep.subr.bf16.mxu1 %v5464_v60  ;;  %vm1797_vm6 = vcmp.eq.s32.totalorder %v6180_v54, %v6708_v23 }
 0x20c   : > { %v1216_v38 = vpop.permute.xlu1 %1215 }
 0x20d   : > { %5363 = vset.pattern.permute.xlu1 %v8058_v48  ;;  %vm1376_vm7 = vcmp.eq.s32.totalorder %v6180_v54, %v1216_v38  ;;  %2086 = vperm.xlu0 %5422, %v6495_v15   ;;  %v5533_v38 = vld [vmem:[%s5701_s19 + $0x68] sm:$0xff] }
 0x20e   : > { %2008 = vperm.xlu1 %5363, %v6304_v6   ;;  %vm4857_vm10 = vmpackc.low %vm1376_vm7, %vm1375_vm8  ;;  %5097 = vmatpush3.bf16.msra.mxu1 %v5464_v60  ;;  %v6943_v6 = vpop.permute.xlu0 %1248  ;;  %v7063_v60 = vld [vmem:[%s5701_s19 + $0x1d8] sm:$0xff] }
 0x211   : > { %v1638_v41 = vpop.permute.xlu1 %1637  ;;  %2095 = vperm.xlu0 %5422, %v6844_v20  }
 0x212   : > { %vm1794_vm11 = vcmp.eq.s32.totalorder %v6180_v54, %v1638_v41  ;;  %4858 = vmatmul.mubr.msk.bf16.gmra.mrb[28].mxu0 %vm4857_vm10, %v8116_v32  ;;  %5364 = vset.pattern.permute.xlu1 %v8117_v59 }
 0x213   : > { %vm4859_vm12 = vmpackc.low %vm1794_vm11, %vm1793_vm9  ;;  %1688 = vperm.xlu1 %5364, %v6538_v58   ;;  %v6951_v58 = vpop.permute.xlu0 %1254  ;;  %vm1382_vm9 = vcmp.eq.s32.totalorder %v6180_v54, %v6908_v25 }
 0x214   : > { %4860 = vmatprep.mubr.msk.bf16.mxu0 %vm4859_vm12, %v8116_v32 }
 0x215   : > { %2098 = vperm.xlu0 %5422, %v6524_v11  }
 0x216   : > { %v1219_v15 = vpop.permute.xlu1 %1218 }
 0x217   : > { %vm1377_vm14 = vcmp.eq.s32.totalorder %v6180_v54, %v1219_v15  ;;  %1691 = vperm.xlu1 %5364, %v5522_v9   ;;  %v6959_v11 = vpop.permute.xlu0 %1260 }
 0x218   : > { %vm4861_vm15 = vmpackc.low %vm1378_vm13, %vm1377_vm14 }
 0x219   : > { %2107 = vperm.xlu0 %5422, %v5522_v9  }
 0x21a   : > { %4862 = vmatmul.mubr.msk.bf16.gmra.mrb[32].mxu0 %vm4861_vm15, %v8116_v32  ;;  %vm1383_vm15 = vcmp.eq.s32.totalorder %v6180_v54, %v6918_v57 }
 0x21b   : > { %5365 = vset.pattern.permute.xlu1 %v8058_v48  ;;  %v1641_v51 = vpop.permute.xlu1 %1640  ;;  %v6971_v14 = vpop.permute.xlu0 %1266 }
 0x21c   : > { %2017 = vperm.xlu1 %5365, %v6322_v37   ;;  %vm1795_vm0 = vcmp.eq.s32.totalorder %v6180_v54, %v1641_v51  ;;  %v6965_v37 = vld [vmem:[%s5701_s19 + $0x138] sm:$0xff] }
 0x21d   : > { %2110 = vperm.xlu0 %5422, %v6556_v55  }
 0x21f   : > { %v1644_v5 = vpop.permute.xlu1 %1643  ;;  %v6987_v23 = vpop.permute.xlu0 %1272 }
 0x220   : > { %vm1796_vm1 = vcmp.eq.s32.totalorder %v6180_v54, %v1644_v5  ;;  %5366 = vset.pattern.permute.xlu1 %v8115_v22 }
 0x221   : > { %vm4863_vm2 = vmpackc.low %vm1796_vm1, %vm1795_vm0  ;;  %1275 = vperm.xlu1 %5366, %v5522_v9   ;;  %2119 = vperm.xlu0 %5422, %v6965_v37  }
 0x222   : > { %4864 = vmatprep.mubr.msk.bf16.mxu0 %vm4863_vm2, %v8116_v32  ;;  %vm1801_vm2 = vcmp.eq.s32.totalorder %v6180_v54, %v6718_v39 }
 0x223   : > { %v7000_v0 = vpop.permute.xlu0 %1278 }
 0x224   : > { %v1228_v17 = vpop.permute.xlu1 %1227 }
 0x225   : > { %vm1380_vm4 = vcmp.eq.s32.totalorder %v6180_v54, %v1228_v17  ;;  %5367 = vset.pattern.permute.xlu1 %v8058_v48  ;;  %2122 = vperm.xlu0 %5422, %v6588_v52  }
 0x226   : > { %vm4865_vm5 = vmpackc.low %vm1380_vm4, %vm1379_vm3  ;;  %2020 = vperm.xlu1 %5367, %v5524_v61  }
 0x227   : > { %4866 = vmatmul.mubr.msk.bf16.gmra.mrb[36].mxu0 %vm4865_vm5, %v8116_v32  ;;  %v7017_v18 = vpop.permute.xlu0 %1284  ;;  %vm1386_vm5 = vcmp.eq.s32.totalorder %v6180_v54, %v6932_v10 }
 0x229   : > { %v1650_v2 = vpop.permute.xlu1 %1649  ;;  %2131 = vperm.xlu0 %5422, %v6983_v63  }
 0x22a   : > { %vm1798_vm7 = vcmp.eq.s32.totalorder %v6180_v54, %v1650_v2  ;;  %5368 = vset.pattern.permute.xlu1 %v8117_v59 }
 0x22b   : > { %vm4867_vm8 = vmpackc.low %vm1798_vm7, %vm1797_vm6  ;;  %1694 = vperm.xlu1 %5368, %v6556_v55   ;;  %v6980_v12 = vpop.f32.mrb[0].mxu1  ;;  %v7034_v8 = vpop.permute.xlu0 %1290 }
 0x22c   : > { %v2837_v40 = vpop.f32.mrb[1].mxu1  ;;  %4868 = vmatprep.mubr.msk.bf16.mxu0 %vm4867_vm8, %v8116_v32 }
 0x22d   : > { %v6989_v13 = vpop.f32.mrb[2].mxu1  ;;  %2134 = vperm.xlu0 %5422, %v6617_v53  }
 0x22e   : > { %v1231_v1 = vpop.permute.xlu1 %1230  ;;  %v2840_v55 = vpop.f32.mrb[3].mxu1 }
 0x22f   : > { %vm1381_vm10 = vcmp.eq.s32.totalorder %v6180_v54, %v1231_v1  ;;  %1697 = vperm.xlu1 %5368, %v6995_v19   ;;  %v7053_v39 = vpop.permute.xlu0 %1296 }
 0x230   : > { %vm4869_vm11 = vmpackc.low %vm1382_vm9, %vm1381_vm10 }
 0x231   : > { %4870 = vmatmul.mubr.msk.bf16.gmra.mrb[40].mxu0 %vm4869_vm11, %v8116_v32  ;;  %2143 = vperm.xlu0 %5422, %v7006_v21   ;;  %vm1387_vm11 = vcmp.eq.s32.totalorder %v6180_v54, %v6943_v6 }
 0x233   : > { %5369 = vset.pattern.permute.xlu1 %v8058_v48  ;;  %v1653_v49 = vpop.permute.xlu1 %1652  ;;  %v7003_v20 = vpop.f32.mrb[4].mxu1 }
 0x234   : > { %2029 = vperm.xlu1 %5369, %v5528_v16   ;;  %v2845_v34 = vpop.f32.mrb[5].mxu1  ;;  %vm1799_vm12 = vcmp.eq.s32.totalorder %v6180_v54, %v1653_v49  ;;  %v7067_v41 = vpop.permute.xlu0 %1302 }
 0x235   : > { %v7010_v62 = vpop.f32.mrb[6].mxu1  ;;  %2146 = vperm.xlu0 %5422, %v6644_v30   ;;  %v7025_v30 = vld [vmem:[%s5701_s19 + $0x198] sm:$0xff] }
 0x236   : > { %v2848_v53 = vpop.f32.mrb[7].mxu1 }
 0x237   : > { %v1656_v42 = vpop.permute.xlu1 %1655 }
 0x238   : > { %vm1800_vm13 = vcmp.eq.s32.totalorder %v6180_v54, %v1656_v42  ;;  %5370 = vset.pattern.permute.xlu1 %v8115_v22  ;;  %v7077_v51 = vpop.permute.xlu0 %1308 }
 0x239   : > { %vm4871_vm14 = vmpackc.low %vm1800_vm13, %vm1799_vm12  ;;  %1281 = vperm.xlu1 %5370, %v6995_v19   ;;  %2155 = vperm.xlu0 %5422, %v7025_v30  }
 0x23a   : > { %4872 = vmatprep.mubr.msk.bf16.mxu0 %vm4871_vm14, %v8116_v32 }
 0x23b   : > { %v7022_v50 = vpop.f32.mrb[8].mxu1 }
 0x23c   : > { %v1240_v29 = vpop.permute.xlu1 %1239  ;;  %v2853_v27 = vpop.f32.mrb[9].mxu1 }
 0x23d   : > { %vm1384_vm0 = vcmp.eq.s32.totalorder %v6180_v54, %v1240_v29  ;;  %5371 = vset.pattern.permute.xlu1 %v8058_v48  ;;  %v7030_v3 = vpop.f32.mrb[10].mxu1  ;;  %2158 = vperm.xlu0 %5422, %v6674_v4   ;;  %v7090_v6 = vpop.permute.xlu0 %1314  ;;  %v7103_v29 = vld [vmem:[%s5701_s19 + $0x148] sm:$0xff] }
 0x23e   : > { %vm4873_vm1 = vmpackc.low %vm1384_vm0, %vm1383_vm15  ;;  %2032 = vperm.xlu1 %5371, %v5530_v24   ;;  %v2856_v46 = vpop.f32.mrb[11].mxu1  ;;  %v5537_v24 = vld [vmem:[%s5701_s19 + $0x88] sm:$0xff] }
 0x23f   : > { %4874 = vmatmul.mubr.msk.bf16.gmra.mrb[44].mxu0 %vm4873_vm1, %v8116_v32  ;;  %vm1389_vm1 = vcmp.eq.s32.totalorder %v6180_v54, %v6951_v58  ;;  %v8131_v58 = vld [vmem:[#allocation8_spill] sm:$0xff] }
 0x241   : > { %v1662_v7 = vpop.permute.xlu1 %1661  ;;  %2167 = vperm.xlu0 %5422, %v7045_v35   ;;  %v7100_v42 = vpop.permute.xlu0 %1320 }
 0x242   : > { %vm1802_vm3 = vcmp.eq.s32.totalorder %v6180_v54, %v1662_v7  ;;  %5372 = vset.pattern.permute.xlu1 %v8117_v59 }
 0x243   : > { %vm4875_vm4 = vmpackc.low %vm1802_vm3, %vm1801_vm2  ;;  %1700 = vperm.xlu1 %5372, %v8129_v56   ;;  %v7042_v26 = vpop.f32.mrb[12].mxu1 }
 0x244   : > { %v2861_v44 = vpop.f32.mrb[13].mxu1  ;;  %4876 = vmatprep.mubr.msk.bf16.mxu0 %vm4875_vm4, %v8116_v32 }
 0x245   : > { %v7051_v4 = vpop.f32.mrb[14].mxu1  ;;  %2170 = vperm.xlu0 %5422, %v6698_v33   ;;  %v7114_v7 = vpop.permute.xlu0 %1326 }
 0x246   : > { %v1243_v25 = vpop.permute.xlu1 %1242  ;;  %v2864_v36 = vpop.f32.mrb[15].mxu1 }
 0x247   : > { %vm1385_vm6 = vcmp.eq.s32.totalorder %v6180_v54, %v1243_v25  ;;  %1703 = vperm.xlu1 %5372, %v6965_v37   ;;  %v8130_v25 = vld [vmem:[#allocation9_spill] sm:$0xff] }
 0x248   : > { %vm4877_vm7 = vmpackc.low %vm1386_vm5, %vm1385_vm6  ;;  %vm592_vm4 = vcmp.eq.s32.totalorder %v6180_v54, %v8130_v25  ;;  %vm591_vm5 = vcmp.eq.s32.totalorder %v6180_v54, %v8131_v58  ;;  %v5539_v25 = vld [vmem:[%s5701_s19 + $0xa8] sm:$0xff] }
 0x249   : > { %4878 = vmatmul.mubr.msk.bf16.gmra.mrb[48].mxu0 %vm4877_vm7, %v8116_v32  ;;  %2179 = vperm.xlu0 %5422, %v7063_v60  }
 0x24b   : > { %5373 = vset.pattern.permute.xlu1 %v8058_v48  ;;  %v1665_v28 = vpop.permute.xlu1 %1664  ;;  %v7060_v57 = vpop.f32.mrb[16].mxu1 }
 0x24c   : > { %2041 = vperm.xlu1 %5373, %v5533_v38   ;;  %v2869_v10 = vpop.f32.mrb[17].mxu1  ;;  %vm1803_vm8 = vcmp.eq.s32.totalorder %v6180_v54, %v1665_v28  ;;  %v8132_v28 = vld [vmem:[#allocation13_spill] sm:$0xff]  ;;  %v7129_v38 = vpop.permute.xlu0 %1332 }
 0x24d   : > { %v7069_v15 = vpop.f32.mrb[18].mxu1  ;;  %2182 = vperm.xlu0 %5422, %v6727_v31   ;;  %v5534_v31 = vld [vmem:[%s5701_s19 + $0x1f8] sm:$0xff]  ;;  %vm1008_vm6 = vcmp.eq.s32.totalorder %v6180_v54, %v8132_v28 }
 0x24e   : > { %v2872_v33 = vpop.f32.mrb[19].mxu1 }
 0x24f   : > { %v1668_v9 = vpop.permute.xlu1 %1667 }
 0x250   : > { %vm1804_vm9 = vcmp.eq.s32.totalorder %v6180_v54, %v1668_v9  ;;  %5374 = vset.pattern.permute.xlu1 %v8115_v22 }
 0x251   : > { %vm4879_vm10 = vmpackc.low %vm1804_vm9, %vm1803_vm8  ;;  %1287 = vperm.xlu1 %5374, %v6965_v37   ;;  %2191 = vperm.xlu0 %5422, %v5534_v31   ;;  %v5535_v37 = vld [vmem:[%s5701_s19 + $0x70] sm:$0xff] }
 0x252   : > { %4880 = vmatprep.mubr.msk.bf16.mxu0 %vm4879_vm10, %v8116_v32  ;;  %vm4825_vm9 = vmpackc.low %vm592_vm4, %vm591_vm5 }
 0x253   : > { %v7081_v5 = vpop.f32.mrb[20].mxu1 }
 0x254   : > { %v1252_v17 = vpop.permute.xlu1 %1251  ;;  %v2877_v61 = vpop.f32.mrb[21].mxu1 }
 0x255   : > { %vm1388_vm12 = vcmp.eq.s32.totalorder %v6180_v54, %v1252_v17  ;;  %5375 = vset.pattern.permute.xlu1 %v8058_v48  ;;  %v7086_v2 = vpop.f32.mrb[22].mxu1  ;;  %v5538_v17 = vld [vmem:[%s5701_s19 + $0x90] sm:$0xff] }
 0x256   : > { %vm4881_vm13 = vmpackc.low %vm1388_vm12, %vm1387_vm11  ;;  %2044 = vperm.xlu1 %5375, %v5535_v37   ;;  %v2880_v40 = vpop.f32.mrb[23].mxu1 }
 0x257   : > { %4882 = vmatmul.mubr.msk.bf16.gmra.mrb[52].mxu0 %vm4881_vm13, %v8116_v32  ;;  %v7138_v40 = vpop.permute.xlu0 %1338  ;;  %vm1391_vm13 = vcmp.eq.s32.totalorder %v6180_v54, %v6959_v11 }
 0x258   : > { %8133 = vst [vmem:[#allocation5_spill] sm:$0xff] %v7138_v40 }
 0x259   : > { %v1671_v1 = vpop.permute.xlu1 %1670 }
 0x25a   : > { %5376 = vset.pattern.permute.xlu1 %v8117_v59  ;;  %vm1805_vm14 = vcmp.eq.s32.totalorder %v6180_v54, %v1671_v1  ;;  %v8134_v1 = vld [vmem:[#allocation10_spill] sm:$0xff] }
 0x25b   : > { %1706 = vperm.xlu1 %5376, %v6588_v52   ;;  %v7094_v55 = vpop.f32.mrb[24].mxu1 }
 0x25c   : > { %v2885_v49 = vpop.f32.mrb[25].mxu1 }
 0x25d   : > { %v1674_v16 = vpop.permute.xlu1 %1673  ;;  %v7096_v34 = vpop.f32.mrb[26].mxu1 }
 0x25e   : > { %vm1806_vm15 = vcmp.eq.s32.totalorder %v6180_v54, %v1674_v16  ;;  %v2888_v53 = vpop.f32.mrb[27].mxu1 }
 0x25f   : > { %vm4883_vm0 = vmpackc.low %vm1806_vm15, %vm1805_vm14  ;;  %1709 = vperm.xlu1 %5376, %v7103_v29  }
 0x260   : > { %4884 = vmatprep.mubr.msk.bf16.mxu0 %vm4883_vm0, %v8116_v32  ;;  %vm1810_vm0 = vcmp.eq.s32.totalorder %v6180_v54, %v6735_v45 }
 0x262   : > { %v1258_v52 = vpop.permute.xlu1 %1257 }
 0x263   : > { %vm1390_vm2 = vcmp.eq.s32.totalorder %v6180_v54, %v1258_v52  ;;  %5377 = vset.pattern.permute.xlu1 %v8058_v48  ;;  %v7111_v27 = vpop.f32.mrb[28].mxu1 }
 0x264   : > { %vm4885_vm3 = vmpackc.low %vm1390_vm2, %vm1389_vm1  ;;  %2053 = vperm.xlu1 %5377, %v5537_v24   ;;  %v2893_v46 = vpop.f32.mrb[29].mxu1 }
 0x265   : > { %v7116_v56 = vpop.f32.mrb[30].mxu1  ;;  %4886 = vmatmul.mubr.msk.bf16.gmra.mrb[56].mxu0 %vm4885_vm3, %v8116_v32  ;;  %v7152_v46 = vpop.permute.xlu0 %1344 }
 0x266   : > { %v2896_v44 = vpop.f32.mrb[31].mxu1  ;;  %8135 = vst [vmem:[#allocation12_spill] sm:$0xff] %v7152_v46 }
 0x267   : > { %v941_v36 = vpop.permute.xlu1 %940 }
 0x268   : > { %vm1007_vm7 = vcmp.eq.s32.totalorder %v6180_v54, %v941_v36  ;;  %5378 = vset.pattern.permute.xlu1 %v8115_v22 }
 0x269   : > { %vm4823_vm8 = vmpackc.low %vm1008_vm6, %vm1007_vm7  ;;  %1293 = vperm.xlu1 %5378, %v7103_v29   ;;  %v7163_v36 = vpop.permute.xlu0 %1350  ;;  %vm1393_vm6 = vcmp.eq.s32.totalorder %v6180_v54, %v6971_v14 }
 0x26a   : > { %4824 = vmatprep.mubr.msk.bf16.mxu1 %vm4823_vm8, %v8116_v32  ;;  %8136 = vst [vmem:[#allocation14_spill] sm:$0xff] %v7163_v36 }
 0x26b   : > { %v7131_v10 = vpop.f32.mrb[32].mxu1  ;;  %4826 = vmatmul.mubr.msk.bf16.gmra.mrb[92].mxu1 %vm4825_vm9, %v8116_v32 }
 0x26c   : > { %v1677_v33 = vpop.permute.xlu1 %1676  ;;  %v2901_v9 = vpop.f32.mrb[33].mxu1 }
 0x26d   : > { %5379 = vset.pattern.permute.xlu1 %v8058_v48  ;;  %v7135_v31 = vpop.f32.mrb[34].mxu1  ;;  %vm1807_vm10 = vcmp.eq.s32.totalorder %v6180_v54, %v1677_v33  ;;  %v7170_v9 = vpop.permute.xlu0 %1356 }
 0x26e   : > { %2056 = vperm.xlu1 %5379, %v5538_v17   ;;  %v2904_v61 = vpop.f32.mrb[35].mxu1  ;;  %8137 = vst [vmem:[#allocation15_spill] sm:$0xff] %v7170_v9 }
 0x270   : > { %v1680_v37 = vpop.permute.xlu1 %1679 }
 0x271   : > { %vm1808_vm11 = vcmp.eq.s32.totalorder %v6180_v54, %v1680_v37 }
 0x272   : > { %vm4887_vm12 = vmpackc.low %vm1808_vm11, %vm1807_vm10  ;;  %5380 = vset.pattern.permute.xlu1 %v8117_v59 }
 0x273   : > { %1712 = vperm.xlu1 %5380, %v8134_v1   ;;  %v7144_v49 = vpop.f32.mrb[36].mxu1  ;;  %4888 = vmatprep.mubr.msk.bf16.mxu0 %vm4887_vm12, %v8116_v32 }
 0x274   : > { %v2909_v16 = vpop.f32.mrb[37].mxu1 }
 0x275   : > { %v1264_v53 = vpop.permute.xlu1 %1263  ;;  %v7149_v52 = vpop.f32.mrb[38].mxu1  ;;  %v5540_v16 = vld [vmem:[%s5701_s19 + $0xb0] sm:$0xff] }
 0x276   : > { %vm1392_vm14 = vcmp.eq.s32.totalorder %v6180_v54, %v1264_v53  ;;  %v2912_v24 = vpop.f32.mrb[39].mxu1 }
 0x277   : > { %vm4889_vm15 = vmpackc.low %vm1392_vm14, %vm1391_vm13  ;;  %1715 = vperm.xlu1 %5380, %v6983_v63   ;;  %v2012_v24 = vpop.permute.xlu0 %2011 }
 0x278   : > { %4890 = vmatmul.mubr.msk.bf16.gmra.mrb[60].mxu0 %vm4889_vm15, %v8116_v32  ;;  %vm2196_vm9 = vcmp.eq.s32.totalorder %v6180_v54, %v2012_v24 }
 0x27a   : > { %v1683_v44 = vpop.permute.xlu1 %1682 }
 0x27b   : > { %vm1809_vm1 = vcmp.eq.s32.totalorder %v6180_v54, %v1683_v44  ;;  %5381 = vset.pattern.permute.xlu1 %v8058_v48  ;;  %v7160_v11 = vpop.f32.mrb[40].mxu1  ;;  %v5541_v44 = vld [vmem:[%s5701_s19 + $0x160] sm:$0xff] }
 0x27c   : > { %vm4891_vm2 = vmpackc.low %vm1810_vm0, %vm1809_vm1  ;;  %2065 = vperm.xlu1 %5381, %v5539_v25   ;;  %v2917_v58 = vpop.f32.mrb[41].mxu1 }
 0x27d   : > { %v7165_v28 = vpop.f32.mrb[42].mxu1  ;;  %4892 = vmatprep.mubr.msk.bf16.mxu0 %vm4891_vm2, %v8116_v32  ;;  %vm1395_vm2 = vcmp.eq.s32.totalorder %v6180_v54, %v6987_v23 }
 0x27e   : > { %v2920_v33 = vpop.f32.mrb[43].mxu1 }
 0x27f   : > { %v2003_v45 = vpop.permute.xlu1 %2002 }
 0x280   : > { %5382 = vset.pattern.permute.xlu1 %v8115_v22  ;;  %vm2193_vm3 = vcmp.eq.s32.totalorder %v6180_v54, %v2003_v45 }
 0x281   : > { %1299 = vperm.xlu1 %5382, %v6983_v63  }
 0x283   : > { %v2006_v17 = vpop.permute.xlu1 %2005  ;;  %v7172_v61 = vpop.f32.mrb[44].mxu1 }
 0x284   : > { %8138 = vst [vmem:[#allocation16_spill] sm:$0xff] %v7172_v61  ;;  %vm2194_vm4 = vcmp.eq.s32.totalorder %v6180_v54, %v2006_v17  ;;  %v2925_v37 = vpop.f32.mrb[45].mxu1  ;;  %v7194_v17 = vld [vmem:[%s5701_s19 + $0x168] sm:$0xff] }
 0x285   : > { %vm4955_vm5 = vmpackc.low %vm2194_vm4, %vm2193_vm3  ;;  %5383 = vset.pattern.permute.xlu1 %v8058_v48  ;;  %v7177_v1 = vpop.f32.mrb[46].mxu1 }
 0x286   : > { %8139 = vst [vmem:[#allocation17_spill] sm:$0xff] %v7177_v1  ;;  %2068 = vperm.xlu1 %5383, %v5540_v16   ;;  %v2928_v53 = vpop.f32.mrb[47].mxu1  ;;  %5098 = vmatprep.mubr.msk.bf16.mxu1 %vm4955_vm5, %v8116_v32 }
 0x287   : > { %v5543_v53 = vld [vmem:[%s5701_s19 + $0xc8] sm:$0xff] }
 0x288   : > { %v1270_v63 = vpop.permute.xlu1 %1269 }
 0x289   : > { %vm1394_vm7 = vcmp.eq.s32.totalorder %v6180_v54, %v1270_v63 }
 0x28a   : > { %vm4893_vm8 = vmpackc.low %vm1394_vm7, %vm1393_vm6  ;;  %5384 = vset.pattern.permute.xlu1 %v8117_v59 }
 0x28b   : > { %1718 = vperm.xlu1 %5384, %v5541_v44   ;;  %v7186_v25 = vpop.f32.mrb[48].mxu1  ;;  %4894 = vmatmul.mubr.msk.bf16.gmra.mrb[64].mxu0 %vm4893_vm8, %v8116_v32 }
 0x28c   : > { %8140 = vst [vmem:[#allocation18_spill] sm:$0xff] %v7186_v25  ;;  %v2933_v58 = vpop.f32.mrb[49].mxu1 }
 0x28d   : > { %v2009_v33 = vpop.permute.xlu1 %2008  ;;  %v7190_v14 = vpop.f32.mrb[50].mxu1 }
 0x28e   : > { %8141 = vst [vmem:[#allocation19_spill] sm:$0xff] %v7190_v14  ;;  %vm2195_vm10 = vcmp.eq.s32.totalorder %v6180_v54, %v2009_v33  ;;  %v2936_v45 = vpop.f32.mrb[51].mxu1  ;;  %v2015_v33 = vpop.permute.xlu0 %2014 }
 0x28f   : > { %vm4957_vm11 = vmpackc.low %vm2196_vm9, %vm2195_vm10  ;;  %1721 = vperm.xlu1 %5384, %v7194_v17   ;;  %vm2197_vm15 = vcmp.eq.s32.totalorder %v6180_v54, %v2015_v33 }
 0x290   : > { %5099 = vmatmul.mubr.msk.bf16.vlgmr.msra.gmra.mrb[96].mxu1 %vm4957_vm11, %v8116_v32 }
 0x292   : > { %v1689_v37 = vpop.permute.xlu1 %1688  ;;  %v2024_v9 = vpop.permute.xlu0 %2023 }
 0x293   : > { %5385 = vset.pattern.permute.xlu1 %v8058_v48  ;;  %v7199_v16 = vpop.f32.mrb[52].mxu1  ;;  %vm1811_vm12 = vcmp.eq.s32.totalorder %v6180_v54, %v1689_v37  ;;  %vm2200_vm5 = vcmp.eq.s32.totalorder %v6180_v54, %v2024_v9 }
 0x294   : > { %8142 = vst [vmem:[#allocation20_spill] sm:$0xff] %v7199_v16  ;;  %2077 = vperm.xlu1 %5385, %v5543_v53   ;;  %v2941_v63 = vpop.f32.mrb[53].mxu1 }
 0x295   : > { %v7202_v24 = vpop.f32.mrb[54].mxu1 }
 0x296   : > { %8143 = vst [vmem:[#allocation21_spill] sm:$0xff] %v7202_v24  ;;  %v1692_v44 = vpop.permute.xlu1 %1691  ;;  %v2944_v58 = vpop.f32.mrb[55].mxu1 }
 0x297   : > { %vm1812_vm13 = vcmp.eq.s32.totalorder %v6180_v54, %v1692_v44  ;;  %v5544_v44 = vld [vmem:[%s5701_s19 + $0xd0] sm:$0xff]  ;;  %v2027_v16 = vpop.permute.xlu0 %2026 }
 0x298   : > { %vm4895_vm14 = vmpackc.low %vm1812_vm13, %vm1811_vm12  ;;  %5386 = vset.pattern.permute.xlu1 %v8115_v22  ;;  %vm2201_vm11 = vcmp.eq.s32.totalorder %v6180_v54, %v2027_v16 }
 0x299   : > { %1305 = vperm.xlu1 %5386, %v7194_v17   ;;  %4896 = vmatprep.mubr.msk.bf16.mxu0 %vm4895_vm14, %v8116_v32  ;;  %vm1397_vm14 = vcmp.eq.s32.totalorder %v6180_v54, %v7000_v0 }
 0x29b   : > { %v2018_v45 = vpop.permute.xlu1 %2017  ;;  %v7210_v53 = vpop.f32.mrb[56].mxu1 }
 0x29c   : > { %8144 = vst [vmem:[#allocation22_spill] sm:$0xff] %v7210_v53  ;;  %vm2198_vm0 = vcmp.eq.s32.totalorder %v6180_v54, %v2018_v45  ;;  %v2949_v63 = vpop.f32.mrb[57].mxu1  ;;  %v7223_v45 = vld [vmem:[%s5701_s19 + $0x170] sm:$0xff] }
 0x29d   : > { %vm4959_vm1 = vmpackc.low %vm2198_vm0, %vm2197_vm15  ;;  %5387 = vset.pattern.permute.xlu1 %v8058_v48  ;;  %v7214_v37 = vpop.f32.mrb[58].mxu1 }
 0x29e   : > { %8145 = vst [vmem:[#allocation23_spill] sm:$0xff] %v7214_v37  ;;  %2080 = vperm.xlu1 %5387, %v5544_v44   ;;  %v2952_v58 = vpop.f32.mrb[59].mxu1  ;;  %5102 = vmatprep.mubr.msk.bf16.mxu1 %vm4959_vm1, %v8116_v32  ;;  %v8148_v37 = vmov 4  }
 0x2a0   : > { %v1276_v33 = vpop.permute.xlu1 %1275 }
 0x2a1   : > { %vm1396_vm3 = vcmp.eq.s32.totalorder %v6180_v54, %v1276_v33 }
 0x2a2   : > { %vm4897_vm4 = vmpackc.low %vm1396_vm3, %vm1395_vm2  ;;  %5388 = vset.pattern.permute.xlu1 %v8117_v59 }
 0x2a3   : > { %1724 = vperm.xlu1 %5388, %v7223_v45   ;;  %v7226_v63 = vpop.f32.mrb[60].mxu1  ;;  %4898 = vmatmul.mubr.msk.bf16.gmra.mrb[68].mxu0 %vm4897_vm4, %v8116_v32 }
 0x2a4   : > { %8146 = vst [vmem:[#allocation24_spill] sm:$0xff] %v7226_v63  ;;  %v2957_v44 = vpop.f32.mrb[61].mxu1 }
 0x2a5   : > { %v2021_v58 = vpop.permute.xlu1 %2020  ;;  %v7230_v23 = vpop.f32.mrb[62].mxu1 }
 0x2a6   : > { %8147 = vst [vmem:[#allocation25_spill] sm:$0xff] %v7230_v23  ;;  %vm2199_vm6 = vcmp.eq.s32.totalorder %v6180_v54, %v2021_v58  ;;  %v2960_v33 = vpop.f32.mrb[63].mxu1 }
 0x2a7   : > { %vm4961_vm7 = vmpackc.low %vm2200_vm5, %vm2199_vm6  ;;  %1727 = vperm.xlu1 %5388, %v7006_v21  }
 0x2a8   : > { %5103 = vmatmul.mubr.msk.bf16.gmra.mrb[100].mxu1 %vm4961_vm7, %v8116_v32 }
 0x2aa   : > { %v1695_v48 = vpop.permute.xlu1 %1694 }
 0x2ab   : > { %5389 = vset.pattern.permute.xlu1 %v8148_v37  ;;  %v7236_v63 = vpop.f32.mrb[64].mxu1  ;;  %v7238_v53 = vpop.f32.mrb[0].mxu0  ;;  %vm1813_vm8 = vcmp.eq.s32.totalorder %v6180_v54, %v1695_v48 }
 0x2ac   : > { %8149 = vst [vmem:[#allocation26_spill] sm:$0xff] %v7236_v63  ;;  %2089 = vperm.xlu1 %5389, %v6788_v47   ;;  %v2965_v9 = vpop.f32.mrb[65].mxu1  ;;  %v3062_v44 = vpop.f32.mrb[1].mxu0 }
 0x2ad   : > { %v7241_v23 = vpop.f32.mrb[66].mxu1  ;;  %v7243_v58 = vpop.f32.mrb[2].mxu0 }
 0x2ae   : > { %8150 = vst [vmem:[#allocation27_spill] sm:$0xff] %v7241_v23  ;;  %v1698_v33 = vpop.permute.xlu1 %1697  ;;  %v2968_v24 = vpop.f32.mrb[67].mxu1 }
 0x2af   : > { %vm1814_vm9 = vcmp.eq.s32.totalorder %v6180_v54, %v1698_v33  ;;  %v3065_v36 = vpop.f32.mrb[3].mxu0 }
 0x2b0   : > { %vm4899_vm10 = vmpackc.low %vm1814_vm9, %vm1813_vm8  ;;  %5390 = vset.pattern.permute.xlu1 %v8115_v22 }
 0x2b1   : > { %1311 = vperm.xlu1 %5390, %v7006_v21   ;;  %4900 = vmatprep.mubr.msk.bf16.mxu0 %vm4899_vm10, %v8116_v32  ;;  %v5546_v21 = vld [vmem:[%s5701_s19 + $0xf0] sm:$0xff]  ;;  %vm1399_vm10 = vcmp.eq.s32.totalorder %v6180_v54, %v7017_v18 }
 0x2b3   : > { %v2030_v47 = vpop.permute.xlu1 %2029  ;;  %v7251_v9 = vpop.f32.mrb[68].mxu1 }
 0x2b4   : > { %8151 = vst [vmem:[#allocation28_spill] sm:$0xff] %v7251_v9  ;;  %vm2202_vm12 = vcmp.eq.s32.totalorder %v6180_v54, %v2030_v47  ;;  %v2973_v48 = vpop.f32.mrb[69].mxu1  ;;  %v7254_v24 = vpop.f32.mrb[4].mxu0 }
 0x2b5   : > { %vm4963_vm13 = vmpackc.low %vm2202_vm12, %vm2201_vm11  ;;  %5391 = vset.pattern.permute.xlu1 %v8148_v37  ;;  %v7257_v36 = vpop.f32.mrb[70].mxu1  ;;  %v3070_v44 = vpop.f32.mrb[5].mxu0 }
 0x2b6   : > { %8152 = vst [vmem:[#allocation7_spill] sm:$0xff] %v7257_v36  ;;  %2092 = vperm.xlu1 %5391, %v5546_v21   ;;  %v2976_v33 = vpop.f32.mrb[71].mxu1  ;;  %v7260_v23 = vpop.f32.mrb[6].mxu0  ;;  %5106 = vmatprep.mubr.msk.bf16.mxu1 %vm4963_vm13, %v8116_v32  ;;  %v5547_v44 = vld [vmem:[%s5701_s19 + $0x180] sm:$0xff] }
 0x2b7   : > { %v3073_v16 = vpop.f32.mrb[7].mxu0  ;;  %v2036_v48 = vpop.permute.xlu0 %2035 }
 0x2b8   : > { %v1282_v47 = vpop.permute.xlu1 %1281  ;;  %vm2204_vm1 = vcmp.eq.s32.totalorder %v6180_v54, %v2036_v48 }
 0x2b9   : > { %vm1398_vm15 = vcmp.eq.s32.totalorder %v6180_v54, %v1282_v47 }
 0x2ba   : > { %vm4901_vm0 = vmpackc.low %vm1398_vm15, %vm1397_vm14  ;;  %5392 = vset.pattern.permute.xlu1 %v8117_v59 }
 0x2bb   : > { %1730 = vperm.xlu1 %5392, %v5547_v44   ;;  %v7268_v21 = vpop.f32.mrb[72].mxu1  ;;  %4902 = vmatmul.mubr.msk.bf16.gmra.mrb[72].mxu0 %vm4901_vm0, %v8116_v32  ;;  %v7280_v44 = vld [vmem:[%s5701_s19 + $0x188] sm:$0xff] }
 0x2bc   : > { %8153 = vst [vmem:[#allocation6_spill] sm:$0xff] %v7268_v21  ;;  %v2981_v33 = vpop.f32.mrb[73].mxu1  ;;  %v7271_v36 = vpop.f32.mrb[8].mxu0 }
 0x2bd   : > { %v2033_v0 = vpop.permute.xlu1 %2032  ;;  %v7274_v16 = vpop.f32.mrb[74].mxu1 }
 0x2be   : > { %8154 = vst [vmem:[#allocation11_spill] sm:$0xff] %v7274_v16  ;;  %vm2203_vm2 = vcmp.eq.s32.totalorder %v6180_v54, %v2033_v0  ;;  %v3078_v47 = vpop.f32.mrb[9].mxu0  ;;  %v2984_v9 = vpop.f32.mrb[75].mxu1 }
 0x2bf   : > { %vm4965_vm3 = vmpackc.low %vm2204_vm1, %vm2203_vm2  ;;  %v7277_v63 = vpop.f32.mrb[10].mxu0  ;;  %1733 = vperm.xlu1 %5392, %v7280_v44   ;;  %v2039_v47 = vpop.permute.xlu0 %2038 }
 0x2c0   : > { %v3081_v21 = vpop.f32.mrb[11].mxu0  ;;  %5107 = vmatmul.mubr.msk.bf16.gmra.mrb[104].mxu1 %vm4965_vm3, %v8116_v32  ;;  %vm2205_vm7 = vcmp.eq.s32.totalorder %v6180_v54, %v2039_v47 }
 0x2c2   : > { %v1701_v33 = vpop.permute.xlu1 %1700 }
 0x2c3   : > { %5393 = vset.pattern.permute.xlu1 %v8148_v37  ;;  %v7285_v48 = vpop.f32.mrb[76].mxu1  ;;  %vm1815_vm4 = vcmp.eq.s32.totalorder %v6180_v54, %v1701_v33 }
 0x2c4   : > { %8155 = vst [vmem:[#allocation9_spill] sm:$0xff] %v7285_v48  ;;  %2101 = vperm.xlu1 %5393, %v6921_v43   ;;  %v2989_v0 = vpop.f32.mrb[77].mxu1 }
 0x2c5   : > { %v7288_v9 = vpop.f32.mrb[12].mxu0  ;;  %v7290_v16 = vpop.f32.mrb[78].mxu1 }
 0x2c6   : > { %8156 = vst [vmem:[#allocation8_spill] sm:$0xff] %v7290_v16  ;;  %v3086_v14 = vpop.f32.mrb[13].mxu0  ;;  %v1704_v46 = vpop.permute.xlu1 %1703 }
 0x2c7   : > { %vm1816_vm5 = vcmp.eq.s32.totalorder %v6180_v54, %v1704_v46  ;;  %v2992_v21 = vpop.f32.mrb[79].mxu1  ;;  %v7294_v25 = vpop.f32.mrb[14].mxu0 }
 0x2c8   : > { %vm4903_vm6 = vmpackc.low %vm1816_vm5, %vm1815_vm4  ;;  %v3089_v48 = vpop.f32.mrb[15].mxu0  ;;  %5394 = vset.pattern.permute.xlu1 %v8115_v22  ;;  %v5549_v21 = vld [vmem:[%s5701_s19 + $0x110] sm:$0xff] }
 0x2c9   : > { %1317 = vperm.xlu1 %5394, %v7280_v44   ;;  %4904 = vmatprep.mubr.msk.bf16.mxu0 %vm4903_vm6, %v8116_v32  ;;  %vm1401_vm6 = vcmp.eq.s32.totalorder %v6180_v54, %v7034_v8 }
 0x2cb   : > { %v2042_v43 = vpop.permute.xlu1 %2041  ;;  %v7300_v14 = vpop.f32.mrb[80].mxu1 }
 0x2cc   : > { %8157 = vst [vmem:[#allocation13_spill] sm:$0xff] %v7300_v14  ;;  %vm2206_vm8 = vcmp.eq.s32.totalorder %v6180_v54, %v2042_v43  ;;  %v2997_v46 = vpop.f32.mrb[81].mxu1  ;;  %v2048_v14 = vpop.permute.xlu0 %2047 }
 0x2cd   : > { %vm4967_vm9 = vmpackc.low %vm2206_vm8, %vm2205_vm7  ;;  %v7303_v33 = vpop.f32.mrb[16].mxu0  ;;  %5395 = vset.pattern.permute.xlu1 %v8148_v37  ;;  %v7306_v48 = vpop.f32.mrb[82].mxu1  ;;  %vm2208_vm13 = vcmp.eq.s32.totalorder %v6180_v54, %v2048_v14 }
 0x2ce   : > { %8158 = vst [vmem:[#allocation10_spill] sm:$0xff] %v7306_v48  ;;  %v3094_v0 = vpop.f32.mrb[17].mxu0  ;;  %2104 = vperm.xlu1 %5395, %v5549_v21   ;;  %v3000_v16 = vpop.f32.mrb[83].mxu1  ;;  %5110 = vmatprep.mubr.msk.bf16.mxu1 %vm4967_vm9, %v8116_v32  ;;  %v7317_v48 = vld [vmem:[%s5701_s19 + $0x190] sm:$0xff] }
 0x2cf   : > { %v7312_v47 = vpop.f32.mrb[18].mxu0 }
 0x2d0   : > { %8159 = vst [vmem:[#allocation29_spill] sm:$0xff] %v7312_v47  ;;  %v3097_v43 = vpop.f32.mrb[19].mxu0  ;;  %v1288_v46 = vpop.permute.xlu1 %1287 }
 0x2d1   : > { %vm1400_vm11 = vcmp.eq.s32.totalorder %v6180_v54, %v1288_v46  ;;  %v2051_v61 = vpop.permute.xlu0 %2050 }
 0x2d2   : > { %vm4905_vm12 = vmpackc.low %vm1400_vm11, %vm1399_vm10  ;;  %5396 = vset.pattern.permute.xlu1 %v8117_v59  ;;  %vm2209_vm3 = vcmp.eq.s32.totalorder %v6180_v54, %v2051_v61 }
 0x2d3   : > { %1736 = vperm.xlu1 %5396, %v7317_v48   ;;  %v7320_v16 = vpop.f32.mrb[84].mxu1  ;;  %4906 = vmatmul.mubr.msk.bf16.gmra.mrb[76].mxu0 %vm4905_vm12, %v8116_v32 }
 0x2d4   : > { %8160 = vst [vmem:[#allocation30_spill] sm:$0xff] %v7320_v16  ;;  %v3005_v0 = vpop.f32.mrb[85].mxu1 }
 0x2d5   : > { %v7324_v18 = vpop.f32.mrb[20].mxu0  ;;  %v2045_v21 = vpop.permute.xlu1 %2044 }
 0x2d6   : > { %vm2207_vm14 = vcmp.eq.s32.totalorder %v6180_v54, %v2045_v21  ;;  %v7327_v43 = vpop.f32.mrb[86].mxu1  ;;  %v3102_v46 = vpop.f32.mrb[21].mxu0 }
 0x2d7   : > { %8161 = vst [vmem:[#allocation31_spill] sm:$0xff] %v7327_v43  ;;  %vm4969_vm15 = vmpackc.low %vm2208_vm13, %vm2207_vm14  ;;  %v3008_v1 = vpop.f32.mrb[87].mxu1  ;;  %v7329_v40 = vpop.f32.mrb[22].mxu0  ;;  %1739 = vperm.xlu1 %5396, %v7025_v30  }
 0x2d8   : > { %8162 = vst [vmem:[#allocation32_spill] sm:$0xff] %v7329_v40  ;;  %v3105_v16 = vpop.f32.mrb[23].mxu0  ;;  %5111 = vmatmul.mubr.msk.bf16.gmra.mrb[108].mxu1 %vm4969_vm15, %v8116_v32 }
 0x2da   : > { %v1707_v0 = vpop.permute.xlu1 %1706 }
 0x2db   : > { %5397 = vset.pattern.permute.xlu1 %v8148_v37  ;;  %v7334_v14 = vpop.f32.mrb[88].mxu1  ;;  %vm1817_vm0 = vcmp.eq.s32.totalorder %v6180_v54, %v1707_v0 }
 0x2dc   : > { %8163 = vst [vmem:[#allocation33_spill] sm:$0xff] %v7334_v14  ;;  %2113 = vperm.xlu1 %5397, %v6995_v19   ;;  %v3013_v21 = vpop.f32.mrb[89].mxu1 }
 0x2dd   : > { %v7337_v43 = vpop.f32.mrb[24].mxu0  ;;  %v7339_v46 = vpop.f32.mrb[90].mxu1  ;;  %v5551_v21 = vld [vmem:[%s5701_s19 + $0x130] sm:$0xff] }
 0x2de   : > { %8164 = vst [vmem:[#allocation34_spill] sm:$0xff] %v7339_v46  ;;  %v3110_v1 = vpop.f32.mrb[25].mxu0  ;;  %v1710_v47 = vpop.permute.xlu1 %1709 }
 0x2df   : > { %vm1818_vm1 = vcmp.eq.s32.totalorder %v6180_v54, %v1710_v47  ;;  %v3016_v16 = vpop.f32.mrb[91].mxu1  ;;  %v7343_v40 = vpop.f32.mrb[26].mxu0 }
 0x2e0   : > { %vm4907_vm2 = vmpackc.low %vm1818_vm1, %vm1817_vm0  ;;  %v3113_v14 = vpop.f32.mrb[27].mxu0  ;;  %5398 = vset.pattern.permute.xlu1 %v8115_v22  ;;  %v2060_v1 = vpop.permute.xlu0 %2059  ;;  %v5552_v16 = vld [vmem:[%s5701_s19 + $0x1a0] sm:$0xff] }
 0x2e1   : > { %1323 = vperm.xlu1 %5398, %v7025_v30   ;;  %4908 = vmatprep.mubr.msk.bf16.mxu0 %vm4907_vm2, %v8116_v32  ;;  %vm2212_vm9 = vcmp.eq.s32.totalorder %v6180_v54, %v2060_v1  ;;  %vm1403_vm2 = vcmp.eq.s32.totalorder %v6180_v54, %v7053_v39 }
 0x2e3   : > { %v2054_v19 = vpop.permute.xlu1 %2053 }
 0x2e4   : > { %vm2210_vm4 = vcmp.eq.s32.totalorder %v6180_v54, %v2054_v19 }
 0x2e5   : > { %vm4971_vm5 = vmpackc.low %vm2210_vm4, %vm2209_vm3  ;;  %v7350_v0 = vpop.f32.mrb[28].mxu0  ;;  %5399 = vset.pattern.permute.xlu1 %v8148_v37 }
 0x2e6   : > { %v3118_v47 = vpop.f32.mrb[29].mxu0  ;;  %2116 = vperm.xlu1 %5399, %v5551_v21   ;;  %5114 = vmatprep.mubr.msk.bf16.mxu1 %vm4971_vm5, %v8116_v32 }
 0x2e7   : > { %v7357_v30 = vpop.f32.mrb[30].mxu0 }
 0x2e8   : > { %v3121_v61 = vpop.f32.mrb[31].mxu0  ;;  %v1294_v14 = vpop.permute.xlu1 %1293 }
 0x2e9   : > { %vm1402_vm7 = vcmp.eq.s32.totalorder %v6180_v54, %v1294_v14  ;;  %v7369_v14 = vld [vmem:[%s5701_s19 + $0x1a8] sm:$0xff] }
 0x2ea   : > { %vm4909_vm8 = vmpackc.low %vm1402_vm7, %vm1401_vm6  ;;  %5400 = vset.pattern.permute.xlu1 %v8117_v59 }
 0x2eb   : > { %1742 = vperm.xlu1 %5400, %v5552_v16   ;;  %4910 = vmatmul.mubr.msk.bf16.gmra.mrb[80].mxu0 %vm4909_vm8, %v8116_v32 }
 0x2ed   : > { %v3124_v19 = vpop.f32.mrb[32].mxu0  ;;  %v2057_v47 = vpop.permute.xlu1 %2056 }
 0x2ee   : > { %v7365_v8 = vadd.f32 %v3124_v19, %v6980_v12  ;;  %vm2211_vm10 = vcmp.eq.s32.totalorder %v6180_v54, %v2057_v47  ;;  %v3126_v21 = vpop.f32.mrb[33].mxu0  ;;  %v2063_v19 = vpop.permute.xlu0 %2062 }
 0x2ef   : > { %vm4973_vm11 = vmpackc.low %vm2212_vm9, %vm2211_vm10  ;;  %v3127_v61 = vpop.f32.mrb[34].mxu0  ;;  %1745 = vperm.xlu1 %5400, %v7369_v14   ;;  %vm2213_vm15 = vcmp.eq.s32.totalorder %v6180_v54, %v2063_v19 }
 0x2f0   : > { %v7373_v16 = vadd.f32 %v3127_v61, %v6989_v13  ;;  %v3129_v46 = vpop.f32.mrb[35].mxu0  ;;  %5115 = vmatmul.mubr.msk.bf16.gmra.mrb[112].mxu1 %vm4973_vm11, %v8116_v32 }
 0x2f2   : > { %v1713_v1 = vpop.permute.xlu1 %1712 }
 0x2f3   : > { %5401 = vset.pattern.permute.xlu1 %v8148_v37  ;;  %vm1819_vm12 = vcmp.eq.s32.totalorder %v6180_v54, %v1713_v1 }
 0x2f4   : > { %2125 = vperm.xlu1 %5401, %v7103_v29  }
 0x2f6   : > { %v1716_v12 = vpop.permute.xlu1 %1715 }
 0x2f7   : > { %vm1820_vm13 = vcmp.eq.s32.totalorder %v6180_v54, %v1716_v12  ;;  %v5554_v12 = vld [vmem:[%s5701_s19 + $0x150] sm:$0xff] }
 0x2f8   : > { %vm4911_vm14 = vmpackc.low %vm1820_vm13, %vm1819_vm12  ;;  %5402 = vset.pattern.permute.xlu1 %v8115_v22 }
 0x2f9   : > { %1329 = vperm.xlu1 %5402, %v7369_v14   ;;  %4912 = vmatprep.mubr.msk.bf16.mxu0 %vm4911_vm14, %v8116_v32  ;;  %vm1405_vm14 = vcmp.eq.s32.totalorder %v6180_v54, %v7067_v41 }
 0x2fa   : > { %v3132_v13 = vpop.f32.mrb[36].mxu0 }
 0x2fb   : > { %v7385_v46 = vadd.f32 %v3132_v13, %v7003_v20  ;;  %v2066_v29 = vpop.permute.xlu1 %2065  ;;  %v3134_v47 = vpop.f32.mrb[37].mxu0  ;;  %v7399_v13 = vld [vmem:[%s5701_s19 + $0x1b0] sm:$0xff] }
 0x2fc   : > { %vm2214_vm0 = vcmp.eq.s32.totalorder %v6180_v54, %v2066_v29  ;;  %v3135_v21 = vpop.f32.mrb[38].mxu0  ;;  %v2072_v20 = vpop.permute.xlu0 %2071 }
 0x2fd   : > { %vm4975_vm1 = vmpackc.low %vm2214_vm0, %vm2213_vm15  ;;  %v7389_v61 = vadd.f32 %v3135_v21, %v7010_v62  ;;  %5403 = vset.pattern.permute.xlu1 %v8148_v37  ;;  %v3137_v1 = vpop.f32.mrb[39].mxu0  ;;  %vm2216_vm5 = vcmp.eq.s32.totalorder %v6180_v54, %v2072_v20 }
 0x2fe   : > { %2128 = vperm.xlu1 %5403, %v5554_v12   ;;  %5118 = vmatprep.mubr.msk.bf16.mxu1 %vm4975_vm1, %v8116_v32 }
 0x300   : > { %v1300_v19 = vpop.permute.xlu1 %1299  ;;  %v2075_v20 = vpop.permute.xlu0 %2074 }
 0x301   : > { %vm1404_vm3 = vcmp.eq.s32.totalorder %v6180_v54, %v1300_v19  ;;  %vm2217_vm11 = vcmp.eq.s32.totalorder %v6180_v54, %v2075_v20 }
 0x302   : > { %vm4913_vm4 = vmpackc.low %vm1404_vm3, %vm1403_vm2  ;;  %5404 = vset.pattern.permute.xlu1 %v8117_v59 }
 0x303   : > { %1748 = vperm.xlu1 %5404, %v7399_v13   ;;  %4914 = vmatmul.mubr.msk.bf16.gmra.mrb[84].mxu0 %vm4913_vm4, %v8116_v32 }
 0x304   : > { %v3140_v62 = vpop.f32.mrb[40].mxu0 }
 0x305   : > { %v7405_v29 = vadd.f32 %v3140_v62, %v7022_v50  ;;  %v2069_v47 = vpop.permute.xlu1 %2068  ;;  %v3142_v39 = vpop.f32.mrb[41].mxu0 }
 0x306   : > { %vm2215_vm6 = vcmp.eq.s32.totalorder %v6180_v54, %v2069_v47  ;;  %v3143_v21 = vpop.f32.mrb[42].mxu0 }
 0x307   : > { %vm4977_vm7 = vmpackc.low %vm2216_vm5, %vm2215_vm6  ;;  %v7409_v1 = vadd.f32 %v3143_v21, %v7030_v3  ;;  %1751 = vperm.xlu1 %5404, %v7045_v35   ;;  %v3145_v12 = vpop.f32.mrb[43].mxu0 }
 0x308   : > { %5119 = vmatmul.mubr.msk.bf16.gmra.mrb[116].mxu1 %vm4977_vm7, %v8116_v32 }
 0x30a   : > { %v1719_v19 = vpop.permute.xlu1 %1718 }
 0x30b   : > { %5405 = vset.pattern.permute.xlu1 %v8148_v37  ;;  %vm1821_vm8 = vcmp.eq.s32.totalorder %v6180_v54, %v1719_v19 }
 0x30c   : > { %2137 = vperm.xlu1 %5405, %v7194_v17  }
 0x30e   : > { %v1722_v50 = vpop.permute.xlu1 %1721 }
 0x30f   : > { %vm1822_vm9 = vcmp.eq.s32.totalorder %v6180_v54, %v1722_v50 }
 0x310   : > { %vm4915_vm10 = vmpackc.low %vm1822_vm9, %vm1821_vm8  ;;  %5406 = vset.pattern.permute.xlu1 %v8115_v22 }
 0x311   : > { %1335 = vperm.xlu1 %5406, %v7045_v35   ;;  %4916 = vmatprep.mubr.msk.bf16.mxu0 %vm4915_vm10, %v8116_v32  ;;  %vm1407_vm10 = vcmp.eq.s32.totalorder %v6180_v54, %v7077_v51 }
 0x312   : > { %v3148_v3 = vpop.f32.mrb[44].mxu0 }
 0x313   : > { %v7422_v62 = vadd.f32 %v3148_v3, %v7042_v26  ;;  %v2078_v17 = vpop.permute.xlu1 %2077  ;;  %v3150_v47 = vpop.f32.mrb[45].mxu0 }
 0x314   : > { %vm2218_vm12 = vcmp.eq.s32.totalorder %v6180_v54, %v2078_v17  ;;  %v3151_v39 = vpop.f32.mrb[46].mxu0  ;;  %v2084_v26 = vpop.permute.xlu0 %2083  ;;  %v7446_v17 = vld [vmem:[%s5701_s19 + $0x1c8] sm:$0xff] }
 0x315   : > { %vm4979_vm13 = vmpackc.low %vm2218_vm12, %vm2217_vm11  ;;  %v7426_v21 = vadd.f32 %v3151_v39, %v7051_v4  ;;  %5407 = vset.pattern.permute.xlu1 %v8148_v37  ;;  %v3153_v35 = vpop.f32.mrb[47].mxu0  ;;  %v5556_v4 = vld [vmem:[%s5701_s19 + $0x1c0] sm:$0xff]  ;;  %vm2220_vm1 = vcmp.eq.s32.totalorder %v6180_v54, %v2084_v26 }
 0x316   : > { %2140 = vperm.xlu1 %5407, %v7223_v45   ;;  %5122 = vmatprep.mubr.msk.bf16.mxu1 %vm4979_vm13, %v8116_v32 }
 0x318   : > { %v1306_v12 = vpop.permute.xlu1 %1305  ;;  %v2087_v35 = vpop.permute.xlu0 %2086 }
 0x319   : > { %vm1406_vm15 = vcmp.eq.s32.totalorder %v6180_v54, %v1306_v12  ;;  %vm2221_vm7 = vcmp.eq.s32.totalorder %v6180_v54, %v2087_v35 }
 0x31a   : > { %vm4917_vm0 = vmpackc.low %vm1406_vm15, %vm1405_vm14  ;;  %5408 = vset.pattern.permute.xlu1 %v8117_v59 }
 0x31b   : > { %1754 = vperm.xlu1 %5408, %v5556_v4   ;;  %4918 = vmatmul.mubr.msk.bf16.gmra.mrb[88].mxu0 %vm4917_vm0, %v8116_v32 }
 0x31c   : > { %v3156_v19 = vpop.f32.mrb[48].mxu0 }
 0x31d   : > { %v7439_v45 = vadd.f32 %v3156_v19, %v7060_v57  ;;  %v2081_v50 = vpop.permute.xlu1 %2080  ;;  %v3158_v20 = vpop.f32.mrb[49].mxu0 }
 0x31e   : > { %vm2219_vm2 = vcmp.eq.s32.totalorder %v6180_v54, %v2081_v50  ;;  %v3159_v41 = vpop.f32.mrb[50].mxu0 }
 0x31f   : > { %vm4981_vm3 = vmpackc.low %vm2220_vm1, %vm2219_vm2  ;;  %v7443_v3 = vadd.f32 %v3159_v41, %v7069_v15  ;;  %1757 = vperm.xlu1 %5408, %v7446_v17   ;;  %v3161_v47 = vpop.f32.mrb[51].mxu0  ;;  %v7473_v41 = vld [vmem:[%s5701_s19 + $0x1d0] sm:$0xff] }
 0x320   : > { %5123 = vmatmul.mubr.msk.bf16.gmra.mrb[120].mxu1 %vm4981_vm3, %v8116_v32 }
 0x322   : > { %v1725_v39 = vpop.permute.xlu1 %1724 }
 0x323   : > { %5409 = vset.pattern.permute.xlu1 %v8148_v37  ;;  %vm1823_vm4 = vcmp.eq.s32.totalorder %v6180_v54, %v1725_v39 }
 0x324   : > { %2149 = vperm.xlu1 %5409, %v7280_v44  }
 0x326   : > { %v1728_v57 = vpop.permute.xlu1 %1727 }
 0x327   : > { %vm1824_vm5 = vcmp.eq.s32.totalorder %v6180_v54, %v1728_v57 }
 0x328   : > { %vm4919_vm6 = vmpackc.low %vm1824_vm5, %vm1823_vm4  ;;  %5410 = vset.pattern.permute.xlu1 %v8115_v22 }
 0x329   : > { %1341 = vperm.xlu1 %5410, %v7446_v17   ;;  %4920 = vmatprep.mubr.msk.bf16.mxu0 %vm4919_vm6, %v8116_v32  ;;  %vm1409_vm6 = vcmp.eq.s32.totalorder %v6180_v54, %v7090_v6 }
 0x32a   : > { %v3164_v15 = vpop.f32.mrb[52].mxu0 }
 0x32b   : > { %v7459_v12 = vadd.f32 %v3164_v15, %v7081_v5  ;;  %v2090_v44 = vpop.permute.xlu1 %2089  ;;  %v3166_v26 = vpop.f32.mrb[53].mxu0 }
 0x32c   : > { %vm2222_vm8 = vcmp.eq.s32.totalorder %v6180_v54, %v2090_v44  ;;  %v3167_v4 = vpop.f32.mrb[54].mxu0  ;;  %v2096_v5 = vpop.permute.xlu0 %2095 }
 0x32d   : > { %vm4983_vm9 = vmpackc.low %vm2222_vm8, %vm2221_vm7  ;;  %v7463_v19 = vadd.f32 %v3167_v4, %v7086_v2  ;;  %5411 = vset.pattern.permute.xlu1 %v8148_v37  ;;  %v3169_v50 = vpop.f32.mrb[55].mxu0  ;;  %vm2224_vm13 = vcmp.eq.s32.totalorder %v6180_v54, %v2096_v5  ;;  %v5559_v5 = vld [vmem:[%s5701_s19 + $0x1e0] sm:$0xff] }
 0x32e   : > { %2152 = vperm.xlu1 %5411, %v7317_v48   ;;  %5126 = vmatprep.mubr.msk.bf16.mxu1 %vm4983_vm9, %v8116_v32 }
 0x330   : > { %v1312_v20 = vpop.permute.xlu1 %1311 }
 0x331   : > { %vm1408_vm11 = vcmp.eq.s32.totalorder %v6180_v54, %v1312_v20 }
 0x332   : > { %vm4921_vm12 = vmpackc.low %vm1408_vm11, %vm1407_vm10  ;;  %5412 = vset.pattern.permute.xlu1 %v8117_v59 }
 0x333   : > { %1760 = vperm.xlu1 %5412, %v7473_v41   ;;  %4922 = vmatmul.mubr.msk.bf16.gmra.mrb[92].mxu0 %vm4921_vm12, %v8116_v32 }
 0x335   : > { %v2093_v2 = vpop.permute.xlu1 %2092 }
 0x336   : > { %vm2223_vm14 = vcmp.eq.s32.totalorder %v6180_v54, %v2093_v2 }
 0x337   : > { %vm4985_vm15 = vmpackc.low %vm2224_vm13, %vm2223_vm14  ;;  %1763 = vperm.xlu1 %5412, %v7063_v60  }
 0x338   : > { %v3172_v51 = vpop.f32.mrb[56].mxu0  ;;  %5127 = vmatmul.mubr.msk.bf16.gmra.mrb[124].mxu1 %vm4985_vm15, %v8116_v32 }
 0x339   : > { %v7482_v48 = vadd.f32 %v3172_v51, %v7094_v55  ;;  %v3174_v47 = vpop.f32.mrb[57].mxu0 }
 0x33a   : > { %v1731_v39 = vpop.permute.xlu1 %1730  ;;  %v3175_v57 = vpop.f32.mrb[58].mxu0 }
 0x33b   : > { %v7485_v35 = vadd.f32 %v3175_v57, %v7096_v34  ;;  %5413 = vset.pattern.permute.xlu1 %v8148_v37  ;;  %v3177_v15 = vpop.f32.mrb[59].mxu0  ;;  %vm1825_vm0 = vcmp.eq.s32.totalorder %v6180_v54, %v1731_v39 }
 0x33c   : > { %2161 = vperm.xlu1 %5413, %v7369_v14   ;;  %v2099_v14 = vpop.permute.xlu0 %2098  ;;  %v7518_v15 = vld [vmem:[%s5701_s19 + $0x1e8] sm:$0xff] }
 0x33d   : > { %vm2225_vm3 = vcmp.eq.s32.totalorder %v6180_v54, %v2099_v14 }
 0x33e   : > { %v1734_v44 = vpop.permute.xlu1 %1733  ;;  %v7489_v26 = vpop.f32.mrb[92].mxu1 }
 0x33f   : > { %vm1826_vm1 = vcmp.eq.s32.totalorder %v6180_v54, %v1734_v44  ;;  %v3021_v55 = vpop.f32.mrb[93].mxu1 }
 0x340   : > { %vm4923_vm2 = vmpackc.low %vm1826_vm1, %vm1825_vm0  ;;  %5414 = vset.pattern.permute.xlu1 %v8115_v22  ;;  %v7494_v4 = vpop.f32.mrb[94].mxu1 }
 0x341   : > { %1347 = vperm.xlu1 %5414, %v7063_v60   ;;  %v3024_v34 = vpop.f32.mrb[95].mxu1  ;;  %4924 = vmatprep.mubr.msk.bf16.mxu0 %vm4923_vm2, %v8116_v32  ;;  %v2108_v60 = vpop.permute.xlu0 %2107  ;;  %vm1411_vm2 = vcmp.eq.s32.totalorder %v6180_v54, %v7100_v42 }
 0x342   : > { %vm2228_vm9 = vcmp.eq.s32.totalorder %v6180_v54, %v2108_v60 }
 0x343   : > { %v2102_v50 = vpop.permute.xlu1 %2101 }
 0x344   : > { %vm2226_vm4 = vcmp.eq.s32.totalorder %v6180_v54, %v2102_v50 }
 0x345   : > { %vm4987_vm5 = vmpackc.low %vm2226_vm4, %vm2225_vm3  ;;  %5415 = vset.pattern.permute.xlu1 %v8148_v37 }
 0x346   : > { %2164 = vperm.xlu1 %5415, %v7399_v13   ;;  %5130 = vmatprep.mubr.msk.bf16.mxu1 %vm4987_vm5, %v8116_v32 }
 0x348   : > { %v1318_v20 = vpop.permute.xlu1 %1317 }
 0x349   : > { %vm1410_vm7 = vcmp.eq.s32.totalorder %v6180_v54, %v1318_v20 }
 0x34a   : > { %vm4925_vm8 = vmpackc.low %vm1410_vm7, %vm1409_vm6  ;;  %5416 = vset.pattern.permute.xlu1 %v8117_v59 }
 0x34b   : > { %1766 = vperm.xlu1 %5416, %v5559_v5   ;;  %v3180_v2 = vpop.f32.mrb[60].mxu0  ;;  %4926 = vmatmul.mubr.msk.bf16.gmra.mrb[96].mxu0 %vm4925_vm8, %v8116_v32 }
 0x34c   : > { %v7511_v13 = vadd.f32 %v3180_v2, %v7111_v27  ;;  %v3182_v51 = vpop.f32.mrb[61].mxu0 }
 0x34d   : > { %v2105_v47 = vpop.permute.xlu1 %2104  ;;  %v3183_v6 = vpop.f32.mrb[62].mxu0 }
 0x34e   : > { %vm2227_vm10 = vcmp.eq.s32.totalorder %v6180_v54, %v2105_v47  ;;  %v7515_v39 = vadd.f32 %v3183_v6, %v7116_v56  ;;  %v3185_v57 = vpop.f32.mrb[63].mxu0  ;;  %v2111_v56 = vpop.permute.xlu0 %2110  ;;  %v5561_v6 = vld [vmem:[%s5701_s19 + $0x1f0] sm:$0xff] }
 0x34f   : > { %vm4989_vm11 = vmpackc.low %vm2228_vm9, %vm2227_vm10  ;;  %1769 = vperm.xlu1 %5416, %v7518_v15   ;;  %vm2229_vm15 = vcmp.eq.s32.totalorder %v6180_v54, %v2111_v56 }
 0x350   : > { %5131 = vmatmul.mubr.msk.bf16.gmra.mrb[128].mxu1 %vm4989_vm11, %v8116_v32 }
 0x352   : > { %v1737_v44 = vpop.permute.xlu1 %1736  ;;  %v2120_v47 = vpop.permute.xlu0 %2119 }
 0x353   : > { %5417 = vset.pattern.permute.xlu1 %v8148_v37  ;;  %vm1827_vm12 = vcmp.eq.s32.totalorder %v6180_v54, %v1737_v44  ;;  %vm2232_vm5 = vcmp.eq.s32.totalorder %v6180_v54, %v2120_v47 }
 0x354   : > { %2173 = vperm.xlu1 %5417, %v7446_v17   ;;  %v8165_v17 = vlaneseq }
 0x356   : > { %v1740_v27 = vpop.permute.xlu1 %1739  ;;  %v3605_v34 = vshrl.u32 %v8165_v17, 7 }
 0x357   : > { %vm1828_vm13 = vcmp.eq.s32.totalorder %v6180_v54, %v1740_v27 }
 0x358   : > { %vm4927_vm14 = vmpackc.low %vm1828_vm13, %vm1827_vm12  ;;  %5418 = vset.pattern.permute.xlu1 %v8115_v22 }
 0x359   : > { %1353 = vperm.xlu1 %5418, %v7518_v15   ;;  %4928 = vmatprep.mubr.msk.bf16.mxu0 %vm4927_vm14, %v8116_v32 }
 0x35b   : > { %v2114_v55 = vpop.permute.xlu1 %2113 }
 0x35c   : > { %vm2230_vm0 = vcmp.eq.s32.totalorder %v6180_v54, %v2114_v55 }
 0x35d   : > { %vm4991_vm1 = vmpackc.low %vm2230_vm0, %vm2229_vm15  ;;  %5419 = vset.pattern.permute.xlu1 %v8148_v37  ;;  %vm1413_vm0 = vcmp.eq.s32.totalorder %v6180_v54, %v7114_v7 }
 0x35e   : > { %2176 = vperm.xlu1 %5419, %v7473_v41   ;;  %v3188_v14 = vpop.f32.mrb[64].mxu0  ;;  %5134 = vmatprep.mubr.msk.bf16.mxu1 %vm4991_vm1, %v8116_v32  ;;  %v3606_v41 = vadd.s32 8, %v3605_v34 }
 0x35f   : > { %v7536_v50 = vadd.f32 %v3188_v14, %v7131_v10  ;;  %v3190_v20 = vpop.f32.mrb[65].mxu0  ;;  %v5019_v10 = vld [vmem:[%s8032_s2] ss:$0 sm:$0xff] }
 0x360   : > { %v1324_v60 = vpop.permute.xlu1 %1323  ;;  %v3191_v5 = vpop.f32.mrb[66].mxu0  ;;  %vm7552_vm6 = vcmp.lt.s32.totalorder %v3605_v34, %v5019_v10  ;;  %vm7557_vm7 = vcmp.lt.s32.totalorder %v3606_v41, %v5019_v10  ;;  %v5562_v34 = vld [vmem:[%s5701_s19 + $0x1f8] sm:$0xff] }
 0x361   : > { %vm1412_vm3 = vcmp.eq.s32.totalorder %v6180_v54, %v1324_v60  ;;  %v7542_v2 = vadd.f32 %v3191_v5, %v7135_v31  ;;  %v3193_v51 = vpop.f32.mrb[67].mxu0 }
 0x362   : > { %vm4929_vm4 = vmpackc.low %vm1412_vm3, %vm1411_vm2  ;;  %5420 = vset.pattern.permute.xlu1 %v8117_v59 }
 0x363   : > { %1772 = vperm.xlu1 %5420, %v5561_v6   ;;  %4930 = vmatmul.mubr.msk.bf16.gmra.mrb[100].mxu0 %vm4929_vm4, %v8116_v32  ;;  %v5100_v42 = vpop.f32.mrb[96].mxu1  ;;  %vm4093_vm4 = vcmask 1041409  }
 0x364   : > { %v3358_v31 = vadd.f32 %v5100_v42, %v7254_v24  ;;  %v3349_v57 = vpop.f32.mrb[97].mxu1 }
 0x365   : > { %v3350_v59 = vadd.f32 %v3349_v57, %v7238_v53  ;;  %v2117_v27 = vpop.permute.xlu1 %2116  ;;  %v5101_v56 = vpop.f32.mrb[98].mxu1 }
 0x366   : > { %vm2231_vm8 = vcmp.eq.s32.totalorder %v6180_v54, %v2117_v27  ;;  %v3361_v17 = vadd.f32 %v5101_v56, %v7260_v23  ;;  %v3352_v14 = vpop.f32.mrb[99].mxu1  ;;  %v3616_v20 = vsel %vm7552_vm6, %v3358_v31, -1e+30  ;;  %v2123_v27 = vpop.permute.xlu0 %2122 }
 0x367   : > { %vm4993_vm9 = vmpackc.low %vm2232_vm5, %vm2231_vm8  ;;  %v3353_v24 = vadd.f32 %v3352_v14, %v7243_v58  ;;  %1775 = vperm.xlu1 %5420, %v5562_v34   ;;  %v3614_v60 = vsel %vm7552_vm6, %v3350_v59, -1e+30  ;;  %vm2233_vm13 = vcmp.eq.s32.totalorder %v6180_v54, %v2123_v27 }
 0x368   : > { %v3617_v53 = vsel %vm7557_vm7, %v3361_v17, -1e+30  ;;  %5135 = vmatmul.mubr.msk.bf16.gmra.mrb[132].mxu1 %vm4993_vm9, %v8116_v32 }
 0x369   : > { %v3685_v5 = vmax.f32 %v3616_v20, %v3617_v53  ;;  %v3615_v23 = vsel %vm7557_vm7, %v3353_v24, -1e+30  ;;  %v7584_v24 = vld [vmem:[%s8033_s3] ss:$0 sm:$0xff] }
 0x36a   : > { %v3678_v51 = vmax.f32 %v3614_v60, %v3615_v23  ;;  %v1743_v41 = vpop.permute.xlu1 %1742 }
 0x36b   : > { %v3686_v58 = vrot.slane %v3685_v5, 4  ;;  %5421 = vset.pattern.permute.xlu1 %v8148_v37  ;;  %vm1829_vm10 = vcmp.eq.s32.totalorder %v6180_v54, %v1743_v41 }
 0x36c   : > { %v3679_v10 = vrot.slane %v3678_v51, 4  ;;  %2185 = vperm.xlu1 %5421, %v7518_v15  }
 0x36d   : > { %v3687_v47 = vmax.f32 %v3685_v5, %v3686_v58 }
 0x36e   : > { %v3680_v42 = vmax.f32 %v3678_v51, %v3679_v10  ;;  %v1746_v31 = vpop.permute.xlu1 %1745 }
 0x36f   : > { %v3688_v57 = vrot.slane %v3687_v47, 2  ;;  %vm1830_vm11 = vcmp.eq.s32.totalorder %v6180_v54, %v1746_v31 }
 0x370   : > { %v3681_v59 = vrot.slane %v3680_v42, 2  ;;  %vm4931_vm12 = vmpackc.low %vm1830_vm11, %vm1829_vm10  ;;  %5423 = vset.pattern.permute.xlu1 %v8115_v22 }
 0x371   : > { %v3689_v56 = vmax.f32 %v3687_v47, %v3688_v57  ;;  %1359 = vperm.xlu1 %5423, %v5562_v34   ;;  %4932 = vmatprep.mubr.msk.bf16.mxu0 %vm4931_vm12, %v8116_v32 }
 0x372   : > { %v3682_v15 = vmax.f32 %v3680_v42, %v3681_v59  ;;  %v2132_v42 = vpop.permute.xlu0 %2131 }
 0x373   : > { %v3690_v17 = vrot.slane %v3689_v56, 1  ;;  %v2126_v14 = vpop.permute.xlu1 %2125  ;;  %vm2236_vm3 = vcmp.eq.s32.totalorder %v6180_v54, %v2132_v42 }
 0x374   : > { %v3683_v20 = vrot.slane %v3682_v15, 1  ;;  %vm2234_vm14 = vcmp.eq.s32.totalorder %v6180_v54, %v2126_v14 }
 0x375   : > { %v3691_v53 = vmax.f32 %v3689_v56, %v3690_v17  ;;  %vm4995_vm15 = vmpackc.low %vm2234_vm14, %vm2233_vm13  ;;  %5424 = vset.pattern.permute.xlu1 %v8148_v37 }
 0x376   : > { %v3684_v22 = vmax.f32 %v3682_v15, %v3683_v20  ;;  %2188 = vperm.xlu1 %5424, %v5561_v6   ;;  %v3196_v34 = vpop.f32.mrb[68].mxu0  ;;  %5138 = vmatprep.mubr.msk.bf16.mxu1 %vm4995_vm15, %v8116_v32  ;;  %vm1415_vm15 = vcmp.eq.s32.totalorder %v6180_v54, %v7129_v38 }
 0x377   : > { %v3910_v60 = vadd.f32 %v7584_v24, %v3691_v53  ;;  %v7591_v5 = vadd.f32 %v3196_v34, %v7144_v49  ;;  %v3198_v23 = vpop.f32.mrb[69].mxu0 }
 0x378   : > { %v3909_v51 = vadd.f32 %v7584_v24, %v3684_v22  ;;  %v1330_v41 = vpop.permute.xlu1 %1329  ;;  %v3199_v58 = vpop.f32.mrb[70].mxu0 }
 0x379   : > { %v3942_v10 = vmax.f32 %v3910_v60, 0.0  ;;  %vm1414_vm1 = vcmp.eq.s32.totalorder %v6180_v54, %v1330_v41  ;;  %v7598_v37 = vadd.f32 %v3199_v58, %v7149_v52  ;;  %v3201_v6 = vpop.f32.mrb[71].mxu0 }
 0x37a   : > { %v3941_v47 = vmax.f32 %v3909_v51, 0.0  ;;  %vm4933_vm2 = vmpackc.low %vm1414_vm1, %vm1413_vm0 }
 0x37b   : > { %v3974_v49 = vpack.c.bf16 %v3942_v10, %v3942_v10  ;;  %4934 = vmatmul.mubr.msk.bf16.gmra.mrb[104].mxu0 %vm4933_vm2, %v8116_v32  ;;  %v5104_v31 = vpop.f32.mrb[100].mxu1 }
 0x37c   : > { %v3973_v57 = vpack.c.bf16 %v3941_v47, %v3941_v47  ;;  %v3374_v59 = vadd.f32 %v5104_v31, %v7288_v9  ;;  %v3365_v7 = vpop.f32.mrb[101].mxu1 }
 0x37d   : > { %v4061_v27 = vunpack.c.l.b16 %v3974_v49  ;;  %v3366_v56 = vadd.f32 %v3365_v7, %v7271_v36  ;;  %v2129_v15 = vpop.permute.xlu1 %2128  ;;  %v5105_v52 = vpop.f32.mrb[102].mxu1 }
 0x37e   : > { %v4060_v17 = vunpack.c.l.b16 %v3973_v57  ;;  %vm2235_vm5 = vcmp.eq.s32.totalorder %v6180_v54, %v2129_v15  ;;  %v3377_v14 = vadd.f32 %v5105_v52, %v7294_v25  ;;  %v3368_v20 = vpop.f32.mrb[103].mxu1  ;;  %v3620_v9 = vsel %vm7552_vm6, %v3374_v59, -1e+30  ;;  %v2135_v59 = vpop.permute.xlu0 %2134 }
 0x37f   : > { %v4092_v53 = vrot.slane %v4061_v27, 7  ;;  %vm4997_vm8 = vmpackc.low %vm2236_vm3, %vm2235_vm5  ;;  %v3369_v22 = vadd.f32 %v3368_v20, %v7277_v63  ;;  %v3618_v60 = vsel %vm7552_vm6, %v3366_v56, -1e+30  ;;  %vm2237_vm12 = vcmp.eq.s32.totalorder %v6180_v54, %v2135_v59 }
 0x380   : > { %v3621_v34 = vsel %vm7557_vm7, %v3377_v14, -1e+30  ;;  %5139 = vmatmul.mubr.msk.bf16.gmra.mrb[136].mxu1 %vm4997_vm8, %v8116_v32  ;;  %vm4096_vm8 = vcmask 1042434  }
 0x381   : > { %v7613_v36 = vsel %vm4093_vm4, %v4092_v53, %v4060_v17  ;;  %v3699_v25 = vmax.f32 %v3620_v9, %v3621_v34  ;;  %v3619_v23 = vsel %vm7557_vm7, %v3369_v22, -1e+30 }
 0x382   : > { %v3692_v51 = vmax.f32 %v3618_v60, %v3619_v23  ;;  %v1749_v63 = vpop.permute.xlu1 %1748 }
 0x383   : > { %v3700_v41 = vrot.slane %v3699_v25, 4  ;;  %vm1831_vm9 = vcmp.eq.s32.totalorder %v6180_v54, %v1749_v63 }
 0x384   : > { %v3693_v58 = vrot.slane %v3692_v51, 4 }
 0x385   : > { %v3701_v10 = vmax.f32 %v3699_v25, %v3700_v41  ;;  %v2144_v41 = vpop.permute.xlu0 %2143 }
 0x386   : > { %v3694_v6 = vmax.f32 %v3692_v51, %v3693_v58  ;;  %v1752_v47 = vpop.permute.xlu1 %1751  ;;  %vm2240_vm2 = vcmp.eq.s32.totalorder %v6180_v54, %v2144_v41 }
 0x387   : > { %v3702_v42 = vrot.slane %v3701_v10, 2  ;;  %vm1832_vm10 = vcmp.eq.s32.totalorder %v6180_v54, %v1752_v47 }
 0x388   : > { %v3695_v49 = vrot.slane %v3694_v6, 2  ;;  %vm4935_vm11 = vmpackc.low %vm1832_vm10, %vm1831_vm9  ;;  %vm4099_vm9 = vcmask 1043459  }
 0x389   : > { %v3703_v31 = vmax.f32 %v3701_v10, %v3702_v42  ;;  %4936 = vmatprep.mubr.msk.bf16.mxu0 %vm4935_vm11, %v8116_v32 }
 0x38a   : > { %v3696_v57 = vmax.f32 %v3694_v6, %v3695_v49 }
 0x38b   : > { %v3704_v7 = vrot.slane %v3703_v31, 1  ;;  %v2138_v27 = vpop.permute.xlu1 %2137 }
 0x38c   : > { %v3697_v56 = vrot.slane %v3696_v57, 1  ;;  %vm2238_vm13 = vcmp.eq.s32.totalorder %v6180_v54, %v2138_v27 }
 0x38d   : > { %v3705_v15 = vmax.f32 %v3703_v31, %v3704_v7  ;;  %vm4999_vm14 = vmpackc.low %vm2238_vm13, %vm2237_vm12  ;;  %v8170_v31 = vld [vmem:[#allocation32_spill] sm:$0xff]  ;;  %v8171_v7 = vld [vmem:[#allocation29_spill] sm:$0xff] }
 0x38e   : > { %v3698_v52 = vmax.f32 %v3696_v57, %v3697_v56  ;;  %v3204_v17 = vpop.f32.mrb[72].mxu0  ;;  %5142 = vmatprep.mubr.msk.bf16.mxu1 %vm4999_vm14, %v8116_v32 }
 0x38f   : > { %v3912_v14 = vadd.f32 %v7584_v24, %v3705_v15  ;;  %v7627_v20 = vadd.f32 %v3204_v17, %v7160_v11  ;;  %v3206_v53 = vpop.f32.mrb[73].mxu0 }
 0x390   : > { %v3911_v22 = vadd.f32 %v7584_v24, %v3698_v52  ;;  %v1336_v9 = vpop.permute.xlu1 %1335  ;;  %v3207_v34 = vpop.f32.mrb[74].mxu0 }
 0x391   : > { %v3944_v60 = vmax.f32 %v3912_v14, 0.0  ;;  %vm1416_vm0 = vcmp.eq.s32.totalorder %v6180_v54, %v1336_v9  ;;  %v7634_v25 = vadd.f32 %v3207_v34, %v7165_v28  ;;  %v3209_v23 = vpop.f32.mrb[75].mxu0 }
 0x392   : > { %v3943_v51 = vmax.f32 %v3911_v22, 0.0  ;;  %vm4937_vm1 = vmpackc.low %vm1416_vm0, %vm1415_vm15 }
 0x393   : > { %v3976_v63 = vpack.c.bf16 %v3944_v60, %v3944_v60  ;;  %4938 = vmatmul.mubr.msk.bf16.gmra.mrb[108].mxu0 %vm4937_vm1, %v8116_v32  ;;  %v5108_v11 = vpop.f32.mrb[104].mxu1 }
 0x394   : > { %v3975_v58 = vpack.c.bf16 %v3943_v51, %v3943_v51  ;;  %v3390_v10 = vadd.f32 %v5108_v11, %v7324_v18  ;;  %v3381_v6 = vpop.f32.mrb[105].mxu1 }
 0x395   : > { %v4063_v47 = vunpack.c.l.b16 %v3976_v63  ;;  %v3382_v38 = vadd.f32 %v3381_v6, %v7303_v33  ;;  %v2141_v42 = vpop.permute.xlu1 %2140  ;;  %v5109_v49 = vpop.f32.mrb[106].mxu1 }
 0x396   : > { %v4062_v28 = vunpack.c.l.b16 %v3975_v58  ;;  %vm2239_vm3 = vcmp.eq.s32.totalorder %v6180_v54, %v2141_v42  ;;  %v3393_v57 = vadd.f32 %v5109_v49, %v8170_v31  ;;  %v3384_v59 = vpop.f32.mrb[107].mxu1  ;;  %v3624_v18 = vsel %vm7552_vm6, %v3390_v10, -1e+30 }
 0x397   : > { %vm5001_vm5 = vmpackc.low %vm2240_vm2, %vm2239_vm3  ;;  %v3385_v27 = vadd.f32 %v3384_v59, %v8171_v7  ;;  %v4098_v15 = vrot.slane %v4063_v47, 5  ;;  %v3622_v52 = vsel %vm7552_vm6, %v3382_v38, -1e+30  ;;  %v8172_v59 = vld [vmem:[#allocation16_spill] sm:$0xff] }
 0x398   : > { %v4095_v56 = vrot.slane %v4062_v28, 6  ;;  %v3625_v33 = vsel %vm7557_vm7, %v3393_v57, -1e+30  ;;  %5143 = vmatmul.mubr.msk.bf16.gmra.mrb[140].mxu1 %vm5001_vm5, %v8116_v32 }
 0x399   : > { %v3713_v17 = vmax.f32 %v3624_v18, %v3625_v33  ;;  %v3623_v14 = vsel %vm7557_vm7, %v3385_v27, -1e+30 }
 0x39a   : > { %v3706_v53 = vmax.f32 %v3622_v52, %v3623_v14  ;;  %v1755_v22 = vpop.permute.xlu1 %1754  ;;  %v4097_v9 = vsel %vm4096_vm8, %v4095_v56, %v7613_v36  ;;  %v2147_v36 = vpop.permute.xlu0 %2146 }
 0x39b   : > { %v3714_v34 = vrot.slane %v3713_v17, 4  ;;  %v7655_v60 = vsel %vm4099_vm9, %v4098_v15, %v4097_v9  ;;  %vm1833_vm10 = vcmp.eq.s32.totalorder %v6180_v54, %v1755_v22  ;;  %vm2241_vm13 = vcmp.eq.s32.totalorder %v6180_v54, %v2147_v36  ;;  %v8173_v15 = vld [vmem:[#allocation5_spill] sm:$0xff] }
 0x39c   : > { %v3707_v23 = vrot.slane %v3706_v53, 4  ;;  %vm1417_vm0 = vcmp.eq.s32.totalorder %v6180_v54, %v8173_v15 }
 0x39d   : > { %v3715_v51 = vmax.f32 %v3713_v17, %v3714_v34  ;;  %v8174_v17 = vld [vmem:[#allocation17_spill] sm:$0xff] }
 0x39e   : > { %v3708_v63 = vmax.f32 %v3706_v53, %v3707_v23  ;;  %v1758_v11 = vpop.permute.xlu1 %1757  ;;  %v2156_v23 = vpop.permute.xlu0 %2155 }
 0x39f   : > { %v3716_v41 = vrot.slane %v3715_v51, 2  ;;  %vm1834_vm11 = vcmp.eq.s32.totalorder %v6180_v54, %v1758_v11  ;;  %vm2244_vm3 = vcmp.eq.s32.totalorder %v6180_v54, %v2156_v23 }
 0x3a0   : > { %v3709_v58 = vrot.slane %v3708_v63, 2  ;;  %vm4939_vm12 = vmpackc.low %vm1834_vm11, %vm1833_vm10  ;;  %vm4102_vm11 = vcmask 1044484  }
 0x3a1   : > { %v3717_v10 = vmax.f32 %v3715_v51, %v3716_v41  ;;  %4940 = vmatprep.mubr.msk.bf16.mxu0 %vm4939_vm12, %v8116_v32  ;;  %vm4105_vm12 = vcmask 1045509  }
 0x3a2   : > { %v3710_v6 = vmax.f32 %v3708_v63, %v3709_v58 }
 0x3a3   : > { %v3718_v47 = vrot.slane %v3717_v10, 1  ;;  %v2150_v38 = vpop.permute.xlu1 %2149 }
 0x3a4   : > { %v3711_v42 = vrot.slane %v3710_v6, 1  ;;  %vm2242_vm14 = vcmp.eq.s32.totalorder %v6180_v54, %v2150_v38 }
 0x3a5   : > { %v3719_v49 = vmax.f32 %v3717_v10, %v3718_v47  ;;  %vm5003_vm15 = vmpackc.low %vm2242_vm14, %vm2241_vm13 }
 0x3a6   : > { %v3712_v28 = vmax.f32 %v3710_v6, %v3711_v42  ;;  %v3212_v31 = vpop.f32.mrb[76].mxu0  ;;  %5146 = vmatprep.mubr.msk.bf16.mxu1 %vm5003_vm15, %v8116_v32 }
 0x3a7   : > { %v3914_v57 = vadd.f32 %v7584_v24, %v3719_v49  ;;  %v7665_v7 = vadd.f32 %v3212_v31, %v8172_v59  ;;  %v3214_v27 = vpop.f32.mrb[77].mxu0 }
 0x3a8   : > { %v3913_v56 = vadd.f32 %v7584_v24, %v3712_v28  ;;  %v1342_v18 = vpop.permute.xlu1 %1341  ;;  %v3215_v33 = vpop.f32.mrb[78].mxu0 }
 0x3a9   : > { %v3946_v52 = vmax.f32 %v3914_v57, 0.0  ;;  %vm1418_vm1 = vcmp.eq.s32.totalorder %v6180_v54, %v1342_v18  ;;  %v7672_v14 = vadd.f32 %v3215_v33, %v8174_v17  ;;  %v3217_v53 = vpop.f32.mrb[79].mxu0 }
 0x3aa   : > { %v3945_v22 = vmax.f32 %v3913_v56, 0.0  ;;  %vm4941_vm2 = vmpackc.low %vm1418_vm1, %vm1417_vm0 }
 0x3ab   : > { %v3978_v9 = vpack.c.bf16 %v3946_v52, %v3946_v52  ;;  %4942 = vmatmul.mubr.msk.bf16.gmra.mrb[112].mxu0 %vm4941_vm2, %v8116_v32  ;;  %v5112_v34 = vpop.f32.mrb[108].mxu1 }
 0x3ac   : > { %v3977_v51 = vpack.c.bf16 %v3945_v22, %v3945_v22  ;;  %v3406_v63 = vadd.f32 %v5112_v34, %v7350_v0  ;;  %v3397_v11 = vpop.f32.mrb[109].mxu1 }
 0x3ad   : > { %v4065_v41 = vunpack.c.l.b16 %v3978_v9  ;;  %v3398_v58 = vadd.f32 %v3397_v11, %v7337_v43  ;;  %v2153_v10 = vpop.permute.xlu1 %2152  ;;  %v5113_v6 = vpop.f32.mrb[110].mxu1 }
 0x3ae   : > { %v4064_v36 = vunpack.c.l.b16 %v3977_v51  ;;  %vm2243_vm5 = vcmp.eq.s32.totalorder %v6180_v54, %v2153_v10  ;;  %v3409_v47 = vadd.f32 %v5113_v6, %v7357_v30  ;;  %v3400_v38 = vpop.f32.mrb[111].mxu1  ;;  %v3628_v0 = vsel %vm7552_vm6, %v3406_v63, -1e+30  ;;  %v8175_v10 = vld [vmem:[#allocation18_spill] sm:$0xff] }
 0x3af   : > { %vm5005_vm10 = vmpackc.low %vm2244_vm3, %vm2243_vm5  ;;  %v3401_v42 = vadd.f32 %v3400_v38, %v7343_v40  ;;  %v4104_v28 = vrot.slane %v4065_v41, 3  ;;  %v3626_v31 = vsel %vm7552_vm6, %v3398_v58, -1e+30 }
 0x3b0   : > { %v4101_v49 = vrot.slane %v4064_v36, 4  ;;  %v3629_v43 = vsel %vm7557_vm7, %v3409_v47, -1e+30  ;;  %5147 = vmatmul.mubr.msk.bf16.gmra.mrb[144].mxu1 %vm5005_vm10, %v8116_v32 }
 0x3b1   : > { %v3727_v30 = vmax.f32 %v3628_v0, %v3629_v43  ;;  %v3627_v57 = vsel %vm7557_vm7, %v3401_v42, -1e+30  ;;  %v8176_v0 = vld [vmem:[#allocation12_spill] sm:$0xff]  ;;  %v8177_v43 = vld [vmem:[#allocation19_spill] sm:$0xff] }
 0x3b2   : > { %v3720_v40 = vmax.f32 %v3626_v31, %v3627_v57  ;;  %v1761_v59 = vpop.permute.xlu1 %1760  ;;  %v4103_v27 = vsel %vm4102_vm11, %v4101_v49, %v7655_v60  ;;  %v2159_v60 = vpop.permute.xlu0 %2158  ;;  %vm1419_vm3 = vcmp.eq.s32.totalorder %v6180_v54, %v8176_v0 }
 0x3b3   : > { %v3728_v56 = vrot.slane %v3727_v30, 4  ;;  %v7693_v18 = vsel %vm4105_vm12, %v4104_v28, %v4103_v27  ;;  %vm1835_vm13 = vcmp.eq.s32.totalorder %v6180_v54, %v1761_v59  ;;  %vm2245_vm0 = vcmp.eq.s32.totalorder %v6180_v54, %v2159_v60 }
 0x3b4   : > { %v3721_v33 = vrot.slane %v3720_v40, 4 }
 0x3b5   : > { %v3729_v15 = vmax.f32 %v3727_v30, %v3728_v56 }
 0x3b6   : > { %v3722_v52 = vmax.f32 %v3720_v40, %v3721_v33  ;;  %v1764_v17 = vpop.permute.xlu1 %1763  ;;  %v2168_v27 = vpop.permute.xlu0 %2167 }
 0x3b7   : > { %v3730_v53 = vrot.slane %v3729_v15, 2  ;;  %vm1836_vm14 = vcmp.eq.s32.totalorder %v6180_v54, %v1764_v17 }
 0x3b8   : > { %v3723_v22 = vrot.slane %v3722_v52, 2  ;;  %vm4943_vm15 = vmpackc.low %vm1836_vm14, %vm1835_vm13  ;;  %vm2248_vm13 = vcmp.eq.s32.totalorder %v6180_v54, %v2168_v27 }
 0x3b9   : > { %v3731_v9 = vmax.f32 %v3729_v15, %v3730_v53  ;;  %4944 = vmatprep.mubr.msk.bf16.mxu0 %vm4943_vm15, %v8116_v32 }
 0x3ba   : > { %v3724_v34 = vmax.f32 %v3722_v52, %v3723_v22 }
 0x3bb   : > { %v3732_v23 = vrot.slane %v3731_v9, 1  ;;  %v2162_v51 = vpop.permute.xlu1 %2161 }
 0x3bc   : > { %v3725_v63 = vrot.slane %v3724_v34, 1  ;;  %vm2246_vm1 = vcmp.eq.s32.totalorder %v6180_v54, %v2162_v51 }
 0x3bd   : > { %v3733_v11 = vmax.f32 %v3731_v9, %v3732_v23  ;;  %vm5007_vm2 = vmpackc.low %vm2246_vm1, %vm2245_vm0  ;;  %vm4108_vm0 = vcmask 1046534   ;;  %vm4111_vm1 = vcmask 1047559  }
 0x3be   : > { %v3726_v41 = vmax.f32 %v3724_v34, %v3725_v63  ;;  %v3220_v58 = vpop.f32.mrb[80].mxu0  ;;  %5150 = vmatprep.mubr.msk.bf16.mxu1 %vm5007_vm2, %v8116_v32 }
 0x3bf   : > { %v7702_v6 = vadd.f32 %v3220_v58, %v8175_v10  ;;  %v3222_v36 = vpop.f32.mrb[81].mxu0  ;;  %v3916_v47 = vadd.f32 %v7584_v24, %v3733_v11 }
 0x3c0   : > { %v3915_v38 = vadd.f32 %v7584_v24, %v3726_v41  ;;  %v1348_v42 = vpop.permute.xlu1 %1347  ;;  %v3223_v49 = vpop.f32.mrb[82].mxu0 }
 0x3c1   : > { %vm1420_vm5 = vcmp.eq.s32.totalorder %v6180_v54, %v1348_v42  ;;  %v7710_v28 = vadd.f32 %v3223_v49, %v8177_v43  ;;  %v3225_v31 = vpop.f32.mrb[83].mxu0  ;;  %v3948_v30 = vmax.f32 %v3916_v47, 0.0 }
 0x3c2   : > { %v3947_v57 = vmax.f32 %v3915_v38, 0.0  ;;  %vm4945_vm10 = vmpackc.low %vm1420_vm5, %vm1419_vm3 }
 0x3c3   : > { %4946 = vmatmul.mubr.msk.bf16.gmra.mrb[116].mxu0 %vm4945_vm10, %v8116_v32  ;;  %v5116_v40 = vpop.f32.mrb[112].mxu1  ;;  %v3980_v59 = vpack.c.bf16 %v3948_v30, %v3948_v30 }
 0x3c4   : > { %v3979_v56 = vpack.c.bf16 %v3947_v57, %v3947_v57  ;;  %v3422_v33 = vadd.f32 %v5116_v40, %v7385_v46  ;;  %v3413_v15 = vpop.f32.mrb[113].mxu1 }
 0x3c5   : > { %v3414_v52 = vadd.f32 %v3413_v15, %v7365_v8  ;;  %v2165_v17 = vpop.permute.xlu1 %2164  ;;  %v5117_v53 = vpop.f32.mrb[114].mxu1  ;;  %v4067_v22 = vunpack.c.l.b16 %v3980_v59 }
 0x3c6   : > { %vm2247_vm14 = vcmp.eq.s32.totalorder %v6180_v54, %v2165_v17  ;;  %v3425_v9 = vadd.f32 %v5117_v53, %v7389_v61  ;;  %v3416_v34 = vpop.f32.mrb[115].mxu1  ;;  %v4066_v60 = vunpack.c.l.b16 %v3979_v56  ;;  %v3632_v46 = vsel %vm7552_vm6, %v3422_v33, -1e+30  ;;  %v8178_v17 = vld [vmem:[#allocation20_spill] sm:$0xff] }
 0x3c7   : > { %vm5009_vm15 = vmpackc.low %vm2248_vm13, %vm2247_vm14  ;;  %v3417_v23 = vadd.f32 %v3416_v34, %v7373_v16  ;;  %v3630_v63 = vsel %vm7552_vm6, %v3414_v52, -1e+30  ;;  %v4110_v41 = vrot.slane %v4067_v22, 1 }
 0x3c8   : > { %v3633_v8 = vsel %vm7557_vm7, %v3425_v9, -1e+30  ;;  %5151 = vmatmul.mubr.msk.bf16.gmra.mrb[148].mxu1 %vm5009_vm15, %v8116_v32  ;;  %v4107_v51 = vrot.slane %v4066_v60, 2 }
 0x3c9   : > { %v3741_v61 = vmax.f32 %v3632_v46, %v3633_v8  ;;  %v3631_v11 = vsel %vm7557_vm7, %v3417_v23, -1e+30  ;;  %v8179_v23 = vld [vmem:[#allocation14_spill] sm:$0xff]  ;;  %v8180_v8 = vld [vmem:[#allocation21_spill] sm:$0xff] }
 0x3ca   : > { %v3734_v16 = vmax.f32 %v3630_v63, %v3631_v11  ;;  %v1767_v58 = vpop.permute.xlu1 %1766  ;;  %v4109_v10 = vsel %vm4108_vm0, %v4107_v51, %v7693_v18  ;;  %v2171_v18 = vpop.permute.xlu0 %2170  ;;  %vm1421_vm15 = vcmp.eq.s32.totalorder %v6180_v54, %v8179_v23 }
 0x3cb   : > { %v3742_v36 = vrot.slane %v3741_v61, 4  ;;  %v7731_v47 = vsel %vm4111_vm1, %v4110_v41, %v4109_v10  ;;  %vm1837_vm2 = vcmp.eq.s32.totalorder %v6180_v54, %v1767_v58  ;;  %vm2249_vm10 = vcmp.eq.s32.totalorder %v6180_v54, %v2171_v18 }
 0x3cc   : > { %v3735_v38 = vrot.slane %v3734_v16, 4 }
 0x3cd   : > { %v3743_v42 = vmax.f32 %v3741_v61, %v3742_v36 }
 0x3ce   : > { %v3736_v49 = vmax.f32 %v3734_v16, %v3735_v38  ;;  %v1770_v0 = vpop.permute.xlu1 %1769  ;;  %v2180_v16 = vpop.permute.xlu0 %2179 }
 0x3cf   : > { %v3744_v43 = vrot.slane %v3743_v42, 2  ;;  %vm1838_vm3 = vcmp.eq.s32.totalorder %v6180_v54, %v1770_v0 }
 0x3d0   : > { %v3737_v31 = vrot.slane %v3736_v49, 2  ;;  %vm4947_vm5 = vmpackc.low %vm1838_vm3, %vm1837_vm2 }
 0x3d1   : > { %v3745_v30 = vmax.f32 %v3743_v42, %v3744_v43  ;;  %4948 = vmatprep.mubr.msk.bf16.mxu0 %vm4947_vm5, %v8116_v32  ;;  %vm2252_vm5 = vcmp.eq.s32.totalorder %v6180_v54, %v2180_v16 }
 0x3d2   : > { %v3738_v57 = vmax.f32 %v3736_v49, %v3737_v31 }
 0x3d3   : > { %v3746_v40 = vrot.slane %v3745_v30, 1  ;;  %v2174_v59 = vpop.permute.xlu1 %2173 }
 0x3d4   : > { %v3739_v27 = vrot.slane %v3738_v57, 1  ;;  %vm2250_vm13 = vcmp.eq.s32.totalorder %v6180_v54, %v2174_v59 }
 0x3d5   : > { %v3747_v56 = vmax.f32 %v3745_v30, %v3746_v40  ;;  %vm5011_vm14 = vmpackc.low %vm2250_vm13, %vm2249_vm10 }
 0x3d6   : > { %v3740_v33 = vmax.f32 %v3738_v57, %v3739_v27  ;;  %v3228_v15 = vpop.f32.mrb[84].mxu0  ;;  %5154 = vmatprep.mubr.msk.bf16.mxu1 %vm5011_vm14, %v8116_v32 }
 0x3d7   : > { %v3918_v52 = vadd.f32 %v7584_v24, %v3747_v56  ;;  %v7741_v53 = vadd.f32 %v3228_v15, %v8178_v17  ;;  %v3230_v22 = vpop.f32.mrb[85].mxu0 }
 0x3d8   : > { %v3917_v9 = vadd.f32 %v7584_v24, %v3740_v33  ;;  %v1354_v34 = vpop.permute.xlu1 %1353  ;;  %v3231_v60 = vpop.f32.mrb[86].mxu0 }
 0x3d9   : > { %v3950_v46 = vmax.f32 %v3918_v52, 0.0  ;;  %vm1422_vm2 = vcmp.eq.s32.totalorder %v6180_v54, %v1354_v34  ;;  %v7748_v51 = vadd.f32 %v3231_v60, %v8180_v8  ;;  %v3233_v63 = vpop.f32.mrb[87].mxu0 }
 0x3da   : > { %v3949_v61 = vmax.f32 %v3917_v9, 0.0  ;;  %vm4949_vm3 = vmpackc.low %vm1422_vm2, %vm1421_vm15 }
 0x3db   : > { %v3982_v11 = vpack.c.bf16 %v3950_v46, %v3950_v46  ;;  %4950 = vmatmul.mubr.msk.bf16.gmra.mrb[120].mxu0 %vm4949_vm3, %v8116_v32  ;;  %v5120_v41 = vpop.f32.mrb[116].mxu1  ;;  %v2183_v46 = vpop.permute.xlu0 %2182 }
 0x3dc   : > { %v3981_v58 = vpack.c.bf16 %v3949_v61, %v3949_v61  ;;  %v3438_v10 = vadd.f32 %v5120_v41, %v7422_v62  ;;  %v3429_v36 = vpop.f32.mrb[117].mxu1  ;;  %vm2253_vm3 = vcmp.eq.s32.totalorder %v6180_v54, %v2183_v46 }
 0x3dd   : > { %v4069_v38 = vunpack.c.l.b16 %v3982_v11  ;;  %v3430_v42 = vadd.f32 %v3429_v36, %v7405_v29  ;;  %v2177_v49 = vpop.permute.xlu1 %2176  ;;  %v5121_v0 = vpop.f32.mrb[118].mxu1 }
 0x3de   : > { %v4068_v43 = vunpack.c.l.b16 %v3981_v58  ;;  %vm2251_vm10 = vcmp.eq.s32.totalorder %v6180_v54, %v2177_v49  ;;  %v3441_v31 = vadd.f32 %v5121_v0, %v7426_v21  ;;  %v3432_v30 = vpop.f32.mrb[119].mxu1  ;;  %v3636_v62 = vsel %vm7552_vm6, %v3438_v10, -1e+30  ;;  %v8181_v10 = vld [vmem:[#allocation22_spill] sm:$0xff] }
 0x3df   : > { %v4113_v57 = vrot.slane %v4069_v38, 7  ;;  %vm5013_vm13 = vmpackc.low %vm2252_vm5, %vm2251_vm10  ;;  %v3433_v18 = vadd.f32 %v3432_v30, %v7409_v1  ;;  %v3634_v59 = vsel %vm7552_vm6, %v3430_v42, -1e+30  ;;  %v8183_v30 = vld [vmem:[#allocation23_spill] sm:$0xff] }
 0x3e0   : > { %v3637_v29 = vsel %vm7557_vm7, %v3441_v31, -1e+30  ;;  %5155 = vmatmul.mubr.msk.bf16.gmra.mrb[152].mxu1 %vm5013_vm13, %v8116_v32 }
 0x3e1   : > { %v7763_v40 = vsel %vm4093_vm4, %v4113_v57, %v4068_v43  ;;  %v3755_v21 = vmax.f32 %v3636_v62, %v3637_v29  ;;  %v3635_v27 = vsel %vm7557_vm7, %v3433_v18, -1e+30  ;;  %v8182_v43 = vld [vmem:[#allocation15_spill] sm:$0xff]  ;;  %v2192_v29 = vpop.permute.xlu0 %2191 }
 0x3e2   : > { %v3748_v56 = vmax.f32 %v3634_v59, %v3635_v27  ;;  %v1773_v1 = vpop.permute.xlu1 %1772  ;;  %vm1423_vm13 = vcmp.eq.s32.totalorder %v6180_v54, %v8182_v43 }
 0x3e3   : > { %v3756_v33 = vrot.slane %v3755_v21, 4  ;;  %vm1839_vm14 = vcmp.eq.s32.totalorder %v6180_v54, %v1773_v1 }
 0x3e4   : > { %v3749_v15 = vrot.slane %v3748_v56, 4 }
 0x3e5   : > { %v3757_v52 = vmax.f32 %v3755_v21, %v3756_v33 }
 0x3e6   : > { %v3750_v17 = vmax.f32 %v3748_v56, %v3749_v15  ;;  %v1776_v22 = vpop.permute.xlu1 %1775 }
 0x3e7   : > { %v3758_v9 = vrot.slane %v3757_v52, 2  ;;  %vm1840_vm15 = vcmp.eq.s32.totalorder %v6180_v54, %v1776_v22 }
 0x3e8   : > { %v3751_v34 = vrot.slane %v3750_v17, 2  ;;  %vm4951_vm2 = vmpackc.low %vm1840_vm15, %vm1839_vm14 }
 0x3e9   : > { %v3759_v60 = vmax.f32 %v3757_v52, %v3758_v9  ;;  %4952 = vmatprep.mubr.msk.bf16.mxu0 %vm4951_vm2, %v8116_v32  ;;  %vm2256_vm2 = vcmp.eq.s32.totalorder %v6180_v54, %v2192_v29 }
 0x3ea   : > { %v3752_v23 = vmax.f32 %v3750_v17, %v3751_v34 }
 0x3eb   : > { %v3760_v8 = vrot.slane %v3759_v60, 1  ;;  %v2186_v63 = vpop.permute.xlu1 %2185 }
 0x3ec   : > { %v3753_v61 = vrot.slane %v3752_v23, 1  ;;  %vm2254_vm5 = vcmp.eq.s32.totalorder %v6180_v54, %v2186_v63 }
 0x3ed   : > { %v3761_v11 = vmax.f32 %v3759_v60, %v3760_v8  ;;  %vm5015_vm10 = vmpackc.low %vm2254_vm5, %vm2253_vm3 }
 0x3ee   : > { %v3754_v41 = vmax.f32 %v3752_v23, %v3753_v61  ;;  %v3236_v16 = vpop.f32.mrb[88].mxu0  ;;  %5158 = vmatprep.mubr.msk.bf16.mxu1 %vm5015_vm10, %v8116_v32 }
 0x3ef   : > { %v3920_v58 = vadd.f32 %v7584_v24, %v3761_v11  ;;  %v7777_v36 = vadd.f32 %v3236_v16, %v8181_v10  ;;  %v3238_v38 = vpop.f32.mrb[89].mxu0 }
 0x3f0   : > { %v3919_v42 = vadd.f32 %v7584_v24, %v3754_v41  ;;  %v1360_v49 = vpop.permute.xlu1 %1359  ;;  %v3239_v0 = vpop.f32.mrb[90].mxu0 }
 0x3f1   : > { %v3952_v31 = vmax.f32 %v3920_v58, 0.0  ;;  %vm1424_vm14 = vcmp.eq.s32.totalorder %v6180_v54, %v1360_v49  ;;  %v7784_v57 = vadd.f32 %v3239_v0, %v8183_v30  ;;  %v3241_v18 = vpop.f32.mrb[91].mxu0 }
 0x3f2   : > { %v3951_v62 = vmax.f32 %v3919_v42, 0.0  ;;  %vm4953_vm15 = vmpackc.low %vm1424_vm14, %vm1423_vm13 }
 0x3f3   : > { %v3984_v59 = vpack.c.bf16 %v3952_v31, %v3952_v31  ;;  %4954 = vmatmul.mubr.msk.bf16.gmra.mrb[124].mxu0 %vm4953_vm15, %v8116_v32  ;;  %v5124_v21 = vpop.f32.mrb[120].mxu1 }
 0x3f4   : > { %v3983_v27 = vpack.c.bf16 %v3951_v62, %v3951_v62  ;;  %v3454_v56 = vadd.f32 %v5124_v21, %v7459_v12  ;;  %v3445_v1 = vpop.f32.mrb[121].mxu1  ;;  %v8184_v62 = vld [vmem:[#allocation24_spill] sm:$0xff] }
 0x3f5   : > { %v4071_v33 = vunpack.c.l.b16 %v3984_v59  ;;  %v3446_v15 = vadd.f32 %v3445_v1, %v7439_v45  ;;  %v2189_v52 = vpop.permute.xlu1 %2188  ;;  %v5125_v17 = vpop.f32.mrb[122].mxu1  ;;  %v5465_v59 = vld [vmem:[%s8034_s4] sm:$0xff]  }
 0x3f6   : > { %v4070_v22 = vunpack.c.l.b16 %v3983_v27  ;;  %vm2255_vm3 = vcmp.eq.s32.totalorder %v6180_v54, %v2189_v52  ;;  %v3457_v9 = vadd.f32 %v5125_v17, %v7463_v19  ;;  %v3448_v34 = vpop.f32.mrb[123].mxu1  ;;  %v3640_v12 = vsel %vm7552_vm6, %v3454_v56, -1e+30  ;;  %v5466_v56 = vld [vmem:[%s8034_s4 + $0x8] sm:$0xff]   ;;  %5162 = vmatprep.subr.bf16.mxu1 %v5465_v59 }
 0x3f7   : > { %vm5017_vm5 = vmpackc.low %vm2256_vm2, %vm2255_vm3  ;;  %v3449_v60 = vadd.f32 %v3448_v34, %v7443_v3  ;;  %v4117_v46 = vrot.slane %v4071_v33, 5  ;;  %v3638_v8 = vsel %vm7552_vm6, %v3446_v15, -1e+30  ;;  %v8185_v33 = vld [vmem:[#allocation25_spill] sm:$0xff]  ;;  %5163 = vmatpush3.bf16.msra.mxu1 %v5465_v59 }
 0x3f8   : > { %v4115_v23 = vrot.slane %v4070_v22, 6  ;;  %v3641_v45 = vsel %vm7557_vm7, %v3457_v9, -1e+30  ;;  %5159 = vmatmul.mubr.msk.bf16.gmra.mrb[156].mxu1 %vm5017_vm5, %v8116_v32  ;;  %5164 = vmatprep.subr.bf16.mxu1 %v5466_v56 }
 0x3f9   : > { %v3769_v54 = vmax.f32 %v3640_v12, %v3641_v45  ;;  %v3639_v19 = vsel %vm7557_vm7, %v3449_v60, -1e+30 }
 0x3fa   : > { %v3762_v63 = vmax.f32 %v3638_v8, %v3639_v19  ;;  %v4116_v3 = vsel %vm4096_vm8, %v4115_v23, %v7763_v40 }
 0x3fb   : > { %v3770_v61 = vrot.slane %v3769_v54, 4  ;;  %v4118_v11 = vsel %vm4099_vm9, %v4117_v46, %v4116_v3  ;;  %5165 = vmatpush3.bf16.msra.mxu1 %v5466_v56 }
 0x3fc   : > { %v3763_v41 = vrot.slane %v3762_v63, 4 }
 0x3fd   : > { %v3771_v16 = vmax.f32 %v3769_v54, %v3770_v61 }
 0x3fe   : > { %v3764_v58 = vmax.f32 %v3762_v63, %v3763_v41 }
 0x3ff   : > { %v3772_v10 = vrot.slane %v3771_v16, 2 }
 0x400   : > { %v3765_v32 = vrot.slane %v3764_v58, 2 }
 0x401   : > { %v3773_v38 = vmax.f32 %v3771_v16, %v3772_v10 }
 0x402   : > { %v3766_v42 = vmax.f32 %v3764_v58, %v3765_v32 }
 0x403   : > { %v3774_v49 = vrot.slane %v3773_v38, 1 }
 0x404   : > { %v3767_v0 = vrot.slane %v3766_v42, 1 }
 0x405   : > { %v3775_v43 = vmax.f32 %v3773_v38, %v3774_v49 }
 0x406   : > { %v3768_v31 = vmax.f32 %v3766_v42, %v3767_v0  ;;  %v3244_v30 = vpop.f32.mrb[92].mxu0 }
 0x407   : > { %v3922_v18 = vadd.f32 %v7584_v24, %v3775_v43  ;;  %v7807_v29 = vadd.f32 %v3244_v30, %v8184_v62  ;;  %v3246_v40 = vpop.f32.mrb[93].mxu0 }
 0x408   : > { %v3921_v21 = vadd.f32 %v7584_v24, %v3768_v31  ;;  %v3247_v27 = vpop.f32.mrb[94].mxu0 }
 0x409   : > { %v3954_v1 = vmax.f32 %v3922_v18, 0.0  ;;  %v7817_v15 = vadd.f32 %v3247_v27, %v8185_v33  ;;  %v3249_v52 = vpop.f32.mrb[95].mxu0  ;;  %v8186_v27 = vld [vmem:[#allocation26_spill] sm:$0xff] }
 0x40a   : > { %v3953_v17 = vmax.f32 %v3921_v21, 0.0 }
 0x40b   : > { %v3986_v22 = vpack.c.bf16 %v3954_v1, %v3954_v1  ;;  %v5128_v9 = vpop.f32.mrb[124].mxu1 }
 0x40c   : > { %v3985_v34 = vpack.c.bf16 %v3953_v17, %v3953_v17  ;;  %v3470_v60 = vadd.f32 %v5128_v9, %v7511_v13  ;;  %v3461_v23 = vpop.f32.mrb[125].mxu1  ;;  %v8187_v17 = vld [vmem:[#allocation27_spill] sm:$0xff] }
 0x40d   : > { %v4073_v12 = vunpack.c.l.b16 %v3986_v22  ;;  %v3462_v45 = vadd.f32 %v3461_v23, %v7482_v48  ;;  %v5129_v46 = vpop.f32.mrb[126].mxu1 }
 0x40e   : > { %v4072_v8 = vunpack.c.l.b16 %v3985_v34  ;;  %v3473_v54 = vadd.f32 %v5129_v46, %v7515_v39  ;;  %v3464_v19 = vpop.f32.mrb[127].mxu1  ;;  %v3644_v61 = vsel %vm7552_vm6, %v3470_v60, -1e+30  ;;  %v5467_v60 = vld [vmem:[%s8034_s4 + $0x10] sm:$0xff]  }
 0x40f   : > { %v3465_v63 = vadd.f32 %v3464_v19, %v7485_v35  ;;  %v4121_v13 = vrot.slane %v4073_v12, 3  ;;  %v3642_v16 = vsel %vm7552_vm6, %v3462_v45, -1e+30  ;;  %5166 = vmatprep.subr.bf16.mxu1 %v5467_v60 }
 0x410   : > { %v4119_v3 = vrot.slane %v4072_v8, 4  ;;  %v3645_v41 = vsel %vm7557_vm7, %v3473_v54, -1e+30  ;;  %5167 = vmatpush3.bf16.msra.mxu1 %v5467_v60 }
 0x411   : > { %v3783_v48 = vmax.f32 %v3644_v61, %v3645_v41  ;;  %v3643_v58 = vsel %vm7557_vm7, %v3465_v63, -1e+30 }
 0x412   : > { %v3776_v39 = vmax.f32 %v3642_v16, %v3643_v58  ;;  %v4120_v10 = vsel %vm4102_vm11, %v4119_v3, %v4118_v11 }
 0x413   : > { %v3784_v32 = vrot.slane %v3783_v48, 4  ;;  %v4122_v35 = vsel %vm4105_vm12, %v4121_v13, %v4120_v10 }
 0x414   : > { %v3777_v38 = vrot.slane %v3776_v39, 4 }
 0x415   : > { %v3785_v42 = vmax.f32 %v3783_v48, %v3784_v32 }
 0x416   : > { %v3778_v49 = vmax.f32 %v3776_v39, %v3777_v38 }
 0x417   : > { %v3786_v0 = vrot.slane %v3785_v42, 2 }
 0x418   : > { %v3779_v43 = vrot.slane %v3778_v49, 2 }
 0x419   : > { %v3787_v31 = vmax.f32 %v3785_v42, %v3786_v0 }
 0x41a   : > { %v3780_v30 = vmax.f32 %v3778_v49, %v3779_v43 }
 0x41b   : > { %v3788_v18 = vrot.slane %v3787_v31, 1 }
 0x41c   : > { %v3781_v62 = vrot.slane %v3780_v30, 1 }
 0x41d   : > { %v3789_v40 = vmax.f32 %v3787_v31, %v3788_v18 }
 0x41e   : > { %v3782_v59 = vmax.f32 %v3780_v30, %v3781_v62  ;;  %v3252_v21 = vpop.f32.mrb[96].mxu0 }
 0x41f   : > { %v7834_v56 = vadd.f32 %v3252_v21, %v8186_v27  ;;  %v3254_v1 = vpop.f32.mrb[97].mxu0  ;;  %v3924_v11 = vadd.f32 %v7584_v24, %v3789_v40 }
 0x420   : > { %v3923_v33 = vadd.f32 %v7584_v24, %v3782_v59  ;;  %v3255_v52 = vpop.f32.mrb[98].mxu0 }
 0x421   : > { %v7839_v22 = vadd.f32 %v3255_v52, %v8187_v17  ;;  %v3257_v9 = vpop.f32.mrb[99].mxu0  ;;  %v3956_v34 = vmax.f32 %v3924_v11, 0.0 }
 0x422   : > { %v3955_v23 = vmax.f32 %v3923_v33, 0.0  ;;  %v8188_v33 = vld [vmem:[#allocation28_spill] sm:$0xff] }
 0x423   : > { %v5132_v12 = vpop.f32.mrb[128].mxu1  ;;  %v3988_v45 = vpack.c.bf16 %v3956_v34, %v3956_v34 }
 0x424   : > { %v3987_v46 = vpack.c.bf16 %v3955_v23, %v3955_v23  ;;  %v3486_v8 = vadd.f32 %v5132_v12, %v7591_v5  ;;  %v3477_v54 = vpop.f32.mrb[129].mxu1  ;;  %v8189_v23 = vld [vmem:[#allocation7_spill] sm:$0xff] }
 0x425   : > { %v3478_v19 = vadd.f32 %v3477_v54, %v7536_v50  ;;  %v5133_v63 = vpop.f32.mrb[130].mxu1  ;;  %v4075_v3 = vunpack.c.l.b16 %v3988_v45 }
 0x426   : > { %v3489_v61 = vadd.f32 %v5133_v63, %v7598_v37  ;;  %v3480_v41 = vpop.f32.mrb[131].mxu1  ;;  %v4074_v13 = vunpack.c.l.b16 %v3987_v46  ;;  %v3648_v48 = vsel %vm7552_vm6, %v3486_v8, -1e+30  ;;  %v5469_v8 = vld [vmem:[%s8034_s4 + $0x20] sm:$0xff]  }
 0x427   : > { %v3481_v16 = vadd.f32 %v3480_v41, %v7542_v2  ;;  %v3646_v5 = vsel %vm7552_vm6, %v3478_v19, -1e+30  ;;  %v4125_v32 = vrot.slane %v4075_v3, 1 }
 0x428   : > { %v3649_v58 = vsel %vm7557_vm7, %v3489_v61, -1e+30  ;;  %v4123_v39 = vrot.slane %v4074_v13, 2 }
 0x429   : > { %v3797_v10 = vmax.f32 %v3648_v48, %v3649_v58  ;;  %v3647_v50 = vsel %vm7557_vm7, %v3481_v16, -1e+30 }
 0x42a   : > { %v3790_v37 = vmax.f32 %v3646_v5, %v3647_v50  ;;  %v4124_v38 = vsel %vm4108_vm0, %v4123_v39, %v4122_v35 }
 0x42b   : > { %v3798_v42 = vrot.slane %v3797_v10, 4  ;;  %v4126_v2 = vsel %vm4111_vm1, %v4125_v32, %v4124_v38 }
 0x42c   : > { %v3791_v49 = vrot.slane %v3790_v37, 4  ;;  %v4155_v0 = vpack.c.b16 %v4126_v2, %v7731_v47  ;;  %v5468_v47 = vld [vmem:[%s8034_s4 + $0x18] sm:$0xff]  }
 0x42d   : > { %v3799_v43 = vmax.f32 %v3797_v10, %v3798_v42  ;;  %5168 = vmatprep.subr.bf16.mxu1 %v5468_v47 }
 0x42e   : > { %v3792_v31 = vmax.f32 %v3790_v37, %v3791_v49  ;;  %5178 = vmatprep.mubr.bf16.mxu1 %v4155_v0  ;;  %5169 = vmatpush3.bf16.msra.mxu1 %v5468_v47 }
 0x42f   : > { %v3800_v30 = vrot.slane %v3799_v43, 2  ;;  %5170 = vmatprep.subr.bf16.mxu1 %v5469_v8 }
 0x430   : > { %v3793_v18 = vrot.slane %v3792_v31, 2 }
 0x431   : > { %v3801_v62 = vmax.f32 %v3799_v43, %v3800_v30 }
 0x432   : > { %v3794_v40 = vmax.f32 %v3792_v31, %v3793_v18  ;;  %5171 = vmatpush3.bf16.msra.mxu1 %v5469_v8 }
 0x433   : > { %v3802_v59 = vrot.slane %v3801_v62, 1 }
 0x434   : > { %v3795_v21 = vrot.slane %v3794_v40, 1 }
 0x435   : > { %v3803_v27 = vmax.f32 %v3801_v62, %v3802_v59 }
 0x436   : > { %v3796_v1 = vmax.f32 %v3794_v40, %v3795_v21  ;;  %v3260_v11 = vpop.f32.mrb[100].mxu0  ;;  %v7889_v21 = vld [vmem:[%s8033_s3] ss:$0 sm:$0xff] }
 0x437   : > { %v3926_v35 = vadd.f32 %v7584_v24, %v3803_v27  ;;  %v7861_v52 = vadd.f32 %v3260_v11, %v8188_v33  ;;  %v3262_v17 = vpop.f32.mrb[101].mxu0 }
 0x438   : > { %v3925_v9 = vadd.f32 %v7584_v24, %v3796_v1  ;;  %v3263_v34 = vpop.f32.mrb[102].mxu0  ;;  %v8190_v1 = vld [vmem:[#allocation6_spill] sm:$0xff] }
 0x439   : > { %v3958_v60 = vmax.f32 %v3926_v35, 0.0  ;;  %v7868_v12 = vadd.f32 %v3263_v34, %v8189_v23  ;;  %v3265_v45 = vpop.f32.mrb[103].mxu0 }
 0x43a   : > { %v3957_v46 = vmax.f32 %v3925_v9, 0.0  ;;  %v8191_v9 = vld [vmem:[#allocation11_spill] sm:$0xff]  ;;  %v5470_v45 = vld [vmem:[%s8034_s4 + $0x28] sm:$0xff]  }
 0x43b   : > { %v3990_v54 = vpack.c.bf16 %v3958_v60, %v3958_v60  ;;  %v5136_v19 = vpop.f32.mrb[132].mxu1  ;;  %5172 = vmatprep.subr.bf16.mxu1 %v5470_v45 }
 0x43c   : > { %v3989_v63 = vpack.c.bf16 %v3957_v46, %v3957_v46  ;;  %v3502_v3 = vadd.f32 %v5136_v19, %v7665_v7  ;;  %v3493_v61 = vpop.f32.mrb[133].mxu1  ;;  %5173 = vmatpush3.bf16.msra.mxu1 %v5470_v45 }
 0x43d   : > { %v4077_v24 = vunpack.c.l.b16 %v3990_v54  ;;  %v3494_v41 = vadd.f32 %v3493_v61, %v7627_v20  ;;  %v5137_v13 = vpop.f32.mrb[134].mxu1 }
 0x43e   : > { %v4076_v16 = vunpack.c.l.b16 %v3989_v63  ;;  %v3505_v48 = vadd.f32 %v5137_v13, %v7672_v14  ;;  %v3496_v58 = vpop.f32.mrb[135].mxu1  ;;  %v3652_v10 = vsel %vm7552_vm6, %v3502_v3, -1e+30 }
 0x43f   : > { %v4127_v39 = vrot.slane %v4077_v24, 7  ;;  %v3497_v5 = vadd.f32 %v3496_v58, %v7634_v25  ;;  %v3650_v20 = vsel %vm7552_vm6, %v3494_v41, -1e+30 }
 0x440   : > { %v3653_v7 = vsel %vm7557_vm7, %v3505_v48, -1e+30 }
 0x441   : > { %v4128_v50 = vsel %vm4093_vm4, %v4127_v39, %v4076_v16  ;;  %v3811_v32 = vmax.f32 %v3652_v10, %v3653_v7  ;;  %v3651_v14 = vsel %vm7557_vm7, %v3497_v5, -1e+30 }
 0x442   : > { %v3804_v37 = vmax.f32 %v3650_v20, %v3651_v14 }
 0x443   : > { %v3812_v38 = vrot.slane %v3811_v32, 4 }
 0x444   : > { %v3805_v42 = vrot.slane %v3804_v37, 4 }
 0x445   : > { %v3813_v2 = vmax.f32 %v3811_v32, %v3812_v38 }
 0x446   : > { %v3806_v25 = vmax.f32 %v3804_v37, %v3805_v42 }
 0x447   : > { %v3814_v49 = vrot.slane %v3813_v2, 2 }
 0x448   : > { %v3807_v0 = vrot.slane %v3806_v25, 2 }
 0x449   : > { %v3815_v43 = vmax.f32 %v3813_v2, %v3814_v49 }
 0x44a   : > { %v3808_v31 = vmax.f32 %v3806_v25, %v3807_v0 }
 0x44b   : > { %v3816_v30 = vrot.slane %v3815_v43, 1 }
 0x44c   : > { %v3809_v18 = vrot.slane %v3808_v31, 1 }
 0x44d   : > { %v3817_v62 = vmax.f32 %v3815_v43, %v3816_v30  ;;  %v5471_v30 = vld [vmem:[%s8034_s4 + $0x30] sm:$0xff]  }
 0x44e   : > { %v3810_v40 = vmax.f32 %v3808_v31, %v3809_v18  ;;  %v3268_v59 = vpop.f32.mrb[104].mxu0  ;;  %5174 = vmatprep.subr.bf16.mxu1 %v5471_v30 }
 0x44f   : > { %v3928_v27 = vadd.f32 %v7889_v21, %v3817_v62  ;;  %v7893_v11 = vadd.f32 %v3268_v59, %v8190_v1  ;;  %v3270_v35 = vpop.f32.mrb[105].mxu0  ;;  %5175 = vmatpush3.bf16.msra.mxu1 %v5471_v30 }
 0x450   : > { %v3927_v33 = vadd.f32 %v7889_v21, %v3810_v40  ;;  %v3271_v17 = vpop.f32.mrb[106].mxu0  ;;  %v8192_v40 = vld [vmem:[#allocation9_spill] sm:$0xff] }
 0x451   : > { %v3960_v47 = vmax.f32 %v3928_v27, 0.0  ;;  %v7897_v34 = vadd.f32 %v3271_v17, %v8191_v9  ;;  %v3273_v60 = vpop.f32.mrb[107].mxu0 }
 0x452   : > { %v3959_v23 = vmax.f32 %v3927_v33, 0.0  ;;  %v5472_v33 = vld [vmem:[%s8034_s4 + $0x38] sm:$0xff]  }
 0x453   : > { %v3992_v46 = vpack.c.bf16 %v3960_v47, %v3960_v47  ;;  %v5140_v8 = vpop.f32.mrb[136].mxu1  ;;  %v8193_v47 = vld [vmem:[#allocation8_spill] sm:$0xff]  ;;  %5176 = vmatprep.subr.bf16.mxu1 %v5472_v33 }
 0x454   : > { %v3991_v54 = vpack.c.bf16 %v3959_v23, %v3959_v23  ;;  %v3518_v19 = vadd.f32 %v5140_v8, %v7741_v53  ;;  %v3509_v63 = vpop.f32.mrb[137].mxu1  ;;  %5177 = vmatpush3.bf16.msra.mxu1 %v5472_v33 }
 0x455   : > { %v4079_v3 = vunpack.c.l.b16 %v3992_v46  ;;  %v3510_v61 = vadd.f32 %v3509_v63, %v7702_v6  ;;  %v5141_v24 = vpop.f32.mrb[138].mxu1 }
 0x456   : > { %v4078_v41 = vunpack.c.l.b16 %v3991_v54  ;;  %v3521_v13 = vadd.f32 %v5141_v24, %v7748_v51  ;;  %v3512_v16 = vpop.f32.mrb[139].mxu1  ;;  %v3656_v39 = vsel %vm7552_vm6, %v3518_v19, -1e+30 }
 0x457   : > { %v3513_v48 = vadd.f32 %v3512_v16, %v7710_v28  ;;  %v4131_v5 = vrot.slane %v4079_v3, 5  ;;  %v3654_v10 = vsel %vm7552_vm6, %v3510_v61, -1e+30 }
 0x458   : > { %v4129_v58 = vrot.slane %v4078_v41, 6  ;;  %v3657_v53 = vsel %vm7557_vm7, %v3521_v13, -1e+30 }
 0x459   : > { %v3825_v6 = vmax.f32 %v3656_v39, %v3657_v53  ;;  %v3655_v7 = vsel %vm7557_vm7, %v3513_v48, -1e+30 }
 0x45a   : > { %v4130_v51 = vsel %vm4096_vm8, %v4129_v58, %v4128_v50  ;;  %v3818_v20 = vmax.f32 %v3654_v10, %v3655_v7 }
 0x45b   : > { %v3826_v32 = vrot.slane %v3825_v6, 4  ;;  %v4132_v28 = vsel %vm4099_vm9, %v4131_v5, %v4130_v51 }
 0x45c   : > { %v3819_v14 = vrot.slane %v3818_v20, 4 }
 0x45d   : > { %v3827_v37 = vmax.f32 %v3825_v6, %v3826_v32 }
 0x45e   : > { %v3820_v38 = vmax.f32 %v3818_v20, %v3819_v14 }
 0x45f   : > { %v3828_v42 = vrot.slane %v3827_v37, 2 }
 0x460   : > { %v3821_v2 = vrot.slane %v3820_v38, 2 }
 0x461   : > { %v3829_v25 = vmax.f32 %v3827_v37, %v3828_v42 }
 0x462   : > { %v3822_v49 = vmax.f32 %v3820_v38, %v3821_v2 }
 0x463   : > { %v3830_v0 = vrot.slane %v3829_v25, 1 }
 0x464   : > { %v3823_v43 = vrot.slane %v3822_v49, 1 }
 0x465   : > { %v3831_v31 = vmax.f32 %v3829_v25, %v3830_v0 }
 0x466   : > { %v3824_v18 = vmax.f32 %v3822_v49, %v3823_v43  ;;  %v3276_v50 = vpop.f32.mrb[108].mxu0 }
 0x467   : > { %v3930_v62 = vadd.f32 %v7889_v21, %v3831_v31  ;;  %v7921_v59 = vadd.f32 %v3276_v50, %v8192_v40  ;;  %v3278_v27 = vpop.f32.mrb[109].mxu0  ;;  %v8194_v31 = vld [vmem:[#allocation13_spill] sm:$0xff]  ;;  %v8195_v40 = vld [vmem:[#allocation10_spill] sm:$0xff] }
 0x468   : > { %v3929_v1 = vadd.f32 %v7889_v21, %v3824_v18  ;;  %v3279_v35 = vpop.f32.mrb[110].mxu0 }
 0x469   : > { %v3962_v17 = vmax.f32 %v3930_v62, 0.0  ;;  %v7928_v9 = vadd.f32 %v3279_v35, %v8193_v47  ;;  %v3281_v60 = vpop.f32.mrb[111].mxu0 }
 0x46a   : > { %v3961_v23 = vmax.f32 %v3929_v1, 0.0 }
 0x46b   : > { %v3994_v45 = vpack.c.bf16 %v3962_v17, %v3962_v17  ;;  %v5144_v46 = vpop.f32.mrb[140].mxu1 }
 0x46c   : > { %v3993_v8 = vpack.c.bf16 %v3961_v23, %v3961_v23  ;;  %v3534_v54 = vadd.f32 %v5144_v46, %v7807_v29  ;;  %v3525_v19 = vpop.f32.mrb[141].mxu1 }
 0x46d   : > { %v4081_v63 = vunpack.c.l.b16 %v3994_v45  ;;  %v3526_v3 = vadd.f32 %v3525_v19, %v7777_v36  ;;  %v5145_v61 = vpop.f32.mrb[142].mxu1 }
 0x46e   : > { %v4080_v24 = vunpack.c.l.b16 %v3993_v8  ;;  %v3537_v41 = vadd.f32 %v5145_v61, %v7817_v15  ;;  %v3528_v13 = vpop.f32.mrb[143].mxu1  ;;  %v3660_v58 = vsel %vm7552_vm6, %v3534_v54, -1e+30 }
 0x46f   : > { %v3529_v16 = vadd.f32 %v3528_v13, %v7784_v57  ;;  %v4135_v29 = vrot.slane %v4081_v63, 3  ;;  %v3658_v53 = vsel %vm7552_vm6, %v3526_v3, -1e+30 }
 0x470   : > { %v4133_v48 = vrot.slane %v4080_v24, 4  ;;  %v3661_v39 = vsel %vm7557_vm7, %v3537_v41, -1e+30 }
 0x471   : > { %v3839_v5 = vmax.f32 %v3660_v58, %v3661_v39  ;;  %v3659_v36 = vsel %vm7557_vm7, %v3529_v16, -1e+30 }
 0x472   : > { %v4134_v15 = vsel %vm4102_vm11, %v4133_v48, %v4132_v28  ;;  %v3832_v10 = vmax.f32 %v3658_v53, %v3659_v36 }
 0x473   : > { %v3840_v6 = vrot.slane %v3839_v5, 4  ;;  %v4136_v57 = vsel %vm4105_vm12, %v4135_v29, %v4134_v15 }
 0x474   : > { %v3833_v7 = vrot.slane %v3832_v10, 4 }
 0x475   : > { %v3841_v51 = vmax.f32 %v3839_v5, %v3840_v6 }
 0x476   : > { %v3834_v20 = vmax.f32 %v3832_v10, %v3833_v7 }
 0x477   : > { %v3842_v32 = vrot.slane %v3841_v51, 2 }
 0x478   : > { %v3835_v14 = vrot.slane %v3834_v20, 2 }
 0x479   : > { %v3843_v37 = vmax.f32 %v3841_v51, %v3842_v32 }
 0x47a   : > { %v3836_v38 = vmax.f32 %v3834_v20, %v3835_v14 }
 0x47b   : > { %v3844_v42 = vrot.slane %v3843_v37, 1 }
 0x47c   : > { %v3837_v2 = vrot.slane %v3836_v38, 1 }
 0x47d   : > { %v3845_v25 = vmax.f32 %v3843_v37, %v3844_v42  ;;  %v8196_v37 = vld [vmem:[#allocation30_spill] sm:$0xff] }
 0x47e   : > { %v3838_v49 = vmax.f32 %v3836_v38, %v3837_v2  ;;  %v3284_v0 = vpop.f32.mrb[112].mxu0 }
 0x47f   : > { %v3932_v43 = vadd.f32 %v7889_v21, %v3845_v25  ;;  %v7946_v28 = vadd.f32 %v3284_v0, %v8194_v31  ;;  %v3286_v30 = vpop.f32.mrb[113].mxu0 }
 0x480   : > { %v3931_v18 = vadd.f32 %v7889_v21, %v3838_v49  ;;  %v3287_v50 = vpop.f32.mrb[114].mxu0  ;;  %v8197_v49 = vld [vmem:[#allocation31_spill] sm:$0xff] }
 0x481   : > { %v3964_v62 = vmax.f32 %v3932_v43, 0.0  ;;  %v7950_v27 = vadd.f32 %v3287_v50, %v8195_v40  ;;  %v3289_v1 = vpop.f32.mrb[115].mxu0 }
 0x482   : > { %v3963_v35 = vmax.f32 %v3931_v18, 0.0 }
 0x483   : > { %v3996_v33 = vpack.c.bf16 %v3964_v62, %v3964_v62  ;;  %v5148_v17 = vpop.f32.mrb[144].mxu1 }
 0x484   : > { %v3995_v47 = vpack.c.bf16 %v3963_v35, %v3963_v35  ;;  %v3550_v60 = vadd.f32 %v5148_v17, %v7861_v52  ;;  %v3541_v23 = vpop.f32.mrb[145].mxu1 }
 0x485   : > { %v4083_v45 = vunpack.c.l.b16 %v3996_v33  ;;  %v3542_v46 = vadd.f32 %v3541_v23, %v7834_v56  ;;  %v5149_v8 = vpop.f32.mrb[146].mxu1 }
 0x486   : > { %v4082_v54 = vunpack.c.l.b16 %v3995_v47  ;;  %v3553_v19 = vadd.f32 %v5149_v8, %v7868_v12  ;;  %v3544_v63 = vpop.f32.mrb[147].mxu1  ;;  %v3664_v24 = vsel %vm7552_vm6, %v3550_v60, -1e+30 }
 0x487   : > { %v3545_v3 = vadd.f32 %v3544_v63, %v7839_v22  ;;  %v4139_v13 = vrot.slane %v4083_v45, 1  ;;  %v3662_v52 = vsel %vm7552_vm6, %v3542_v46, -1e+30 }
 0x488   : > { %v4137_v61 = vrot.slane %v4082_v54, 2  ;;  %v3665_v41 = vsel %vm7557_vm7, %v3553_v19, -1e+30 }
 0x489   : > { %v3853_v16 = vmax.f32 %v3664_v24, %v3665_v41  ;;  %v3663_v56 = vsel %vm7557_vm7, %v3545_v3, -1e+30 }
 0x48a   : > { %v3846_v48 = vmax.f32 %v3662_v52, %v3663_v56  ;;  %v4138_v12 = vsel %vm4108_vm0, %v4137_v61, %v4136_v57 }
 0x48b   : > { %v3854_v58 = vrot.slane %v3853_v16, 4  ;;  %v7966_v22 = vsel %vm4111_vm1, %v4139_v13, %v4138_v12 }
 0x48c   : > { %v3847_v39 = vrot.slane %v3846_v48, 4 }
 0x48d   : > { %v3855_v29 = vmax.f32 %v3853_v16, %v3854_v58 }
 0x48e   : > { %v3848_v53 = vmax.f32 %v3846_v48, %v3847_v39 }
 0x48f   : > { %v3856_v5 = vrot.slane %v3855_v29, 2 }
 0x490   : > { %v3849_v36 = vrot.slane %v3848_v53, 2 }
 0x491   : > { %v3857_v15 = vmax.f32 %v3855_v29, %v3856_v5  ;;  %v8198_v29 = vld [vmem:[#allocation33_spill] sm:$0xff] }
 0x492   : > { %v3850_v10 = vmax.f32 %v3848_v53, %v3849_v36 }
 0x493   : > { %v3858_v6 = vrot.slane %v3857_v15, 1 }
 0x494   : > { %v3851_v7 = vrot.slane %v3850_v10, 1 }
 0x495   : > { %v3859_v51 = vmax.f32 %v3857_v15, %v3858_v6  ;;  %v8199_v6 = vld [vmem:[#allocation34_spill] sm:$0xff] }
 0x496   : > { %v3852_v20 = vmax.f32 %v3850_v10, %v3851_v7  ;;  %v3292_v32 = vpop.f32.mrb[116].mxu0 }
 0x497   : > { %v3934_v14 = vadd.f32 %v7889_v21, %v3859_v51  ;;  %v3293_v57 = vadd.f32 %v3292_v32, %v8196_v37  ;;  %v3294_v38 = vpop.f32.mrb[117].mxu0 }
 0x498   : > { %v3933_v42 = vadd.f32 %v7889_v21, %v3852_v20  ;;  %v3295_v2 = vpop.f32.mrb[118].mxu0 }
 0x499   : > { %v3966_v25 = vmax.f32 %v3934_v14, 0.0  ;;  %v3296_v0 = vadd.f32 %v3295_v2, %v8197_v49  ;;  %v3297_v43 = vpop.f32.mrb[119].mxu0 }
 0x49a   : > { %v3965_v31 = vmax.f32 %v3933_v42, 0.0 }
 0x49b   : > { %v3998_v30 = vpack.c.bf16 %v3966_v25, %v3966_v25  ;;  %v5152_v18 = vpop.f32.mrb[148].mxu1 }
 0x49c   : > { %v3997_v50 = vpack.c.bf16 %v3965_v31, %v3965_v31  ;;  %v3566_v62 = vadd.f32 %v5152_v18, %v7921_v59  ;;  %v3557_v40 = vpop.f32.mrb[149].mxu1 }
 0x49d   : > { %v4085_v1 = vunpack.c.l.b16 %v3998_v30  ;;  %v3558_v35 = vadd.f32 %v3557_v40, %v7893_v11  ;;  %v5153_v33 = vpop.f32.mrb[150].mxu1 }
 0x49e   : > { %v4084_v17 = vunpack.c.l.b16 %v3997_v50  ;;  %v3569_v47 = vadd.f32 %v5153_v33, %v7928_v9  ;;  %v3560_v60 = vpop.f32.mrb[151].mxu1  ;;  %v3668_v46 = vsel %vm7552_vm6, %v3566_v62, -1e+30 }
 0x49f   : > { %v4141_v23 = vrot.slane %v4085_v1, 7  ;;  %v3561_v45 = vadd.f32 %v3560_v60, %v7897_v34  ;;  %v3666_v54 = vsel %vm7552_vm6, %v3558_v35, -1e+30 }
 0x4a0   : > { %v3669_v8 = vsel %vm7557_vm7, %v3569_v47, -1e+30 }
 0x4a1   : > { %v4142_v59 = vsel %vm4093_vm4, %v4141_v23, %v4084_v17  ;;  %v3867_v11 = vmax.f32 %v3668_v46, %v3669_v8  ;;  %v3667_v19 = vsel %vm7557_vm7, %v3561_v45, -1e+30 }
 0x4a2   : > { %v3860_v9 = vmax.f32 %v3666_v54, %v3667_v19 }
 0x4a3   : > { %v3868_v63 = vrot.slane %v3867_v11, 4 }
 0x4a4   : > { %v3861_v3 = vrot.slane %v3860_v9, 4 }
 0x4a5   : > { %v3869_v61 = vmax.f32 %v3867_v11, %v3868_v63 }
 0x4a6   : > { %v3862_v34 = vmax.f32 %v3860_v9, %v3861_v3 }
 0x4a7   : > { %v3870_v24 = vrot.slane %v3869_v61, 2 }
 0x4a8   : > { %v3863_v41 = vrot.slane %v3862_v34, 2 }
 0x4a9   : > { %v3871_v13 = vmax.f32 %v3869_v61, %v3870_v24 }
 0x4aa   : > { %v3864_v52 = vmax.f32 %v3862_v34, %v3863_v41 }
 0x4ab   : > { %v3872_v16 = vrot.slane %v3871_v13, 1 }
 0x4ac   : > { %v3865_v56 = vrot.slane %v3864_v52, 1 }
 0x4ad   : > { %v3873_v48 = vmax.f32 %v3871_v13, %v3872_v16 }
 0x4ae   : > { %v3866_v12 = vmax.f32 %v3864_v52, %v3865_v56  ;;  %v3300_v58 = vpop.f32.mrb[120].mxu0 }
 0x4af   : > { %v3936_v39 = vadd.f32 %v7889_v21, %v3873_v48  ;;  %v3301_v53 = vadd.f32 %v3300_v58, %v8198_v29  ;;  %v3302_v5 = vpop.f32.mrb[121].mxu0 }
 0x4b0   : > { %v3935_v36 = vadd.f32 %v7889_v21, %v3866_v12  ;;  %v3303_v15 = vpop.f32.mrb[122].mxu0 }
 0x4b1   : > { %v3968_v10 = vmax.f32 %v3936_v39, 0.0  ;;  %v3304_v7 = vadd.f32 %v3303_v15, %v8199_v6  ;;  %v3305_v51 = vpop.f32.mrb[123].mxu0 }
 0x4b2   : > { %v3967_v20 = vmax.f32 %v3935_v36, 0.0 }
 0x4b3   : > { %v4000_v32 = vpack.c.bf16 %v3968_v10, %v3968_v10  ;;  %v5156_v14 = vpop.f32.mrb[152].mxu1 }
 0x4b4   : > { %v3999_v37 = vpack.c.bf16 %v3967_v20, %v3967_v20  ;;  %v3582_v38 = vadd.f32 %v5156_v14, %v3293_v57  ;;  %v3573_v42 = vpop.f32.mrb[153].mxu1 }
 0x4b5   : > { %v4087_v2 = vunpack.c.l.b16 %v4000_v32  ;;  %v3574_v25 = vadd.f32 %v3573_v42, %v7946_v28  ;;  %v5157_v49 = vpop.f32.mrb[154].mxu1 }
 0x4b6   : > { %v4086_v43 = vunpack.c.l.b16 %v3999_v37  ;;  %v3585_v31 = vadd.f32 %v5157_v49, %v3296_v0  ;;  %v3576_v30 = vpop.f32.mrb[155].mxu1  ;;  %v3672_v62 = vsel %vm7552_vm6, %v3582_v38, -1e+30 }
 0x4b7   : > { %v3577_v18 = vadd.f32 %v3576_v30, %v7950_v27  ;;  %v4145_v1 = vrot.slane %v4087_v2, 5  ;;  %v3670_v57 = vsel %vm7552_vm6, %v3574_v25, -1e+30 }
 0x4b8   : > { %v4143_v50 = vrot.slane %v4086_v43, 6  ;;  %v3673_v40 = vsel %vm7557_vm7, %v3585_v31, -1e+30 }
 0x4b9   : > { %v3881_v35 = vmax.f32 %v3672_v62, %v3673_v40  ;;  %v3671_v28 = vsel %vm7557_vm7, %v3577_v18, -1e+30 }
 0x4ba   : > { %v4144_v0 = vsel %vm4096_vm8, %v4143_v50, %v4142_v59  ;;  %v3874_v33 = vmax.f32 %v3670_v57, %v3671_v28 }
 0x4bb   : > { %v3882_v17 = vrot.slane %v3881_v35, 4  ;;  %v4146_v27 = vsel %vm4099_vm9, %v4145_v1, %v4144_v0 }
 0x4bc   : > { %v3875_v47 = vrot.slane %v3874_v33, 4 }
 0x4bd   : > { %v3883_v60 = vmax.f32 %v3881_v35, %v3882_v17 }
 0x4be   : > { %v3876_v23 = vmax.f32 %v3874_v33, %v3875_v47 }
 0x4bf   : > { %v3884_v45 = vrot.slane %v3883_v60, 2 }
 0x4c0   : > { %v3877_v46 = vrot.slane %v3876_v23, 2 }
 0x4c1   : > { %v3885_v8 = vmax.f32 %v3883_v60, %v3884_v45 }
 0x4c2   : > { %v3878_v54 = vmax.f32 %v3876_v23, %v3877_v46 }
 0x4c3   : > { %v3886_v11 = vrot.slane %v3885_v8, 1 }
 0x4c4   : > { %v3879_v19 = vrot.slane %v3878_v54, 1 }
 0x4c5   : > { %v3887_v9 = vmax.f32 %v3885_v8, %v3886_v11 }
 0x4c6   : > { %v3880_v63 = vmax.f32 %v3878_v54, %v3879_v19  ;;  %v3308_v3 = vpop.f32.mrb[124].mxu0 }
 0x4c7   : > { %v3938_v61 = vadd.f32 %v7889_v21, %v3887_v9  ;;  %v3309_v59 = vadd.f32 %v3308_v3, %v7489_v26  ;;  %v3310_v34 = vpop.f32.mrb[125].mxu0 }
 0x4c8   : > { %v3937_v24 = vadd.f32 %v7889_v21, %v3880_v63  ;;  %v3311_v41 = vpop.f32.mrb[126].mxu0 }
 0x4c9   : > { %v3970_v13 = vmax.f32 %v3938_v61, 0.0  ;;  %v3312_v52 = vadd.f32 %v3311_v41, %v7494_v4  ;;  %v3313_v16 = vpop.f32.mrb[127].mxu0 }
 0x4ca   : > { %v3969_v56 = vmax.f32 %v3937_v24, 0.0 }
 0x4cb   : > { %v4002_v48 = vpack.c.bf16 %v3970_v13, %v3970_v13  ;;  %v5160_v12 = vpop.f32.mrb[156].mxu1 }
 0x4cc   : > { %v4001_v58 = vpack.c.bf16 %v3969_v56, %v3969_v56  ;;  %v3598_v39 = vadd.f32 %v5160_v12, %v3309_v59  ;;  %v3589_v29 = vpop.f32.mrb[157].mxu1 }
 0x4cd   : > { %v4089_v5 = vunpack.c.l.b16 %v4002_v48  ;;  %v3590_v36 = vadd.f32 %v3589_v29, %v3301_v53  ;;  %v5161_v15 = vpop.f32.mrb[158].mxu1 }
 0x4ce   : > { %v4088_v10 = vunpack.c.l.b16 %v4001_v58  ;;  %v3601_v6 = vadd.f32 %v5161_v15, %v3312_v52  ;;  %v3592_v26 = vpop.f32.mrb[159].mxu1  ;;  %v3676_v32 = vsel %vm7552_vm6, %v3598_v39, -1e+30 }
 0x4cf   : > { %v3593_v51 = vadd.f32 %v3592_v26, %v3304_v7  ;;  %v4149_v14 = vrot.slane %v4089_v5, 3  ;;  %v3674_v37 = vsel %vm7552_vm6, %v3590_v36, -1e+30 }
 0x4d0   : > { %v4147_v20 = vrot.slane %v4088_v10, 4  ;;  %v3677_v4 = vsel %vm7557_vm7, %v3601_v6, -1e+30 }
 0x4d1   : > { %v3895_v38 = vmax.f32 %v3676_v32, %v3677_v4  ;;  %v3675_v53 = vsel %vm7557_vm7, %v3593_v51, -1e+30 }
 0x4d2   : > { %v4148_v42 = vsel %vm4102_vm11, %v4147_v20, %v4146_v27  ;;  %v3888_v2 = vmax.f32 %v3674_v37, %v3675_v53 }
 0x4d3   : > { %v3896_v25 = vrot.slane %v3895_v38, 4  ;;  %v4150_v7 = vsel %vm4105_vm12, %v4149_v14, %v4148_v42 }
 0x4d4   : > { %v3889_v49 = vrot.slane %v3888_v2, 4 }
 0x4d5   : > { %v3897_v43 = vmax.f32 %v3895_v38, %v3896_v25 }
 0x4d6   : > { %v3890_v31 = vmax.f32 %v3888_v2, %v3889_v49 }
 0x4d7   : > { %v3898_v30 = vrot.slane %v3897_v43, 2 }
 0x4d8   : > { %v3891_v18 = vrot.slane %v3890_v31, 2 }
 0x4d9   : > { %v3899_v50 = vmax.f32 %v3897_v43, %v3898_v30 }
 0x4da   : > { %v3892_v62 = vmax.f32 %v3890_v31, %v3891_v18 }
 0x4db   : > { %v3900_v40 = vrot.slane %v3899_v50, 1 }
 0x4dc   : > { %v3893_v44 = vrot.slane %v3892_v62, 1 }
 0x4dd   : > { %v3901_v1 = vmax.f32 %v3899_v50, %v3900_v40 }
 0x4de   : > { %v3894_v57 = vmax.f32 %v3892_v62, %v3893_v44 }
 0x4df   : > { %v3940_v55 = vadd.f32 %v7889_v21, %v3901_v1 }
 0x4e0   : > { %v3939_v35 = vadd.f32 %v7889_v21, %v3894_v57  ;;  %v5021_v21 = vld [vmem:[%s8035_s5] ss:$0 sm:$0xff] }
 0x4e1   : > { %v3972_v28 = vmax.f32 %v3940_v55, 0.0 }
 0x4e2   : > { %v3971_v0 = vmax.f32 %v3939_v35, 0.0 }
 0x4e3   : > { %v4004_v33 = vpack.c.bf16 %v3972_v28, %v3972_v28 }
 0x4e4   : > { %v4003_v17 = vpack.c.bf16 %v3971_v0, %v3971_v0 }
 0x4e5   : > { %v4091_v27 = vunpack.c.l.b16 %v4004_v33 }
 0x4e6   : > { %v4090_v47 = vunpack.c.l.b16 %v4003_v17 }
 0x4e7   : > { %v4153_v23 = vrot.slane %v4091_v27, 1 }
 0x4e8   : > { %v4151_v60 = vrot.slane %v4090_v47, 2 }
 0x4ea   : > { %v4152_v45 = vsel %vm4108_vm0, %v4151_v60, %v4150_v7 }
 0x4eb   : > { %v4154_v46 = vsel %vm4111_vm1, %v4153_v23, %v4152_v45 }
 0x4ec   : > { %v4156_v8 = vpack.c.b16 %v4154_v46, %v7966_v22 }
 0x4ee   : > { %5179 = vmatmul.mubr.bf16.vlgmr.msra.gmra.mrb[160].mxu1 %v4156_v8 }
 0x5c1   : > { %v5180_v54 = vpop.f32.mrb[160].mxu1 }
 0x5c2   : > { %v4241_v11 = vpop.f32.mrb[161].mxu1  ;;  %v4250_v3 = vadd.f32 %v5180_v54, %v5021_v21 }
 0x5c3   : > { %v4242_v19 = vadd.f32 %v5021_v21, %v4241_v11  ;;  %v5181_v9 = vpop.f32.mrb[162].mxu1 }
 0x5c4   : > { %v4244_v63 = vpop.f32.mrb[163].mxu1  ;;  %v4253_v61 = vadd.f32 %v5181_v9, %v5021_v21  ;;  %4258 = vst [vmem:[%s268_s28 + $0x10] sm:$0xff] %v4250_v3 }
 0x5c5   : > { %4256 = vst [vmem:[%s268_s28] sm:$0xff] %v4242_v19  ;;  %v4245_v22 = vadd.f32 %v5021_v21, %v4244_v63 }
 0x5c6   : > { %4259 = vst [vmem:[%s268_s28 + $0x18] sm:$0xff] %v4253_v61 }
 0x5c7   : > { %4257 = vst [vmem:[%s268_s28 + $0x8] sm:$0xff] %v4245_v22 }
 0x5c8 PF: > { %s17_s21 = sadd.s32 1, %s5602_s21  }
 0x5c9   : > { %p14_p5 = scmp.ge.s32.totalorder %s17_s21, 4  }
 0x5cb   :  { %16 = sbr.rel (!%p14_p5) target bundleno = 1 (0x1), region = 79 }
 0x5d2   :  { %4282 = vsyncpa [#allocation3], 1 }
 0x5d3   :  { %4284 = vsyncpa [#allocation3 + $0x1], 1 }

</bundles_post_ra>
